<compile_context>
chip_gen: v7x
topology: tpu7x:2x2x1
jax: 0.10.0
libtpu: 0.0.40
codegen_flags: <defaults>
</compile_context>

<pallas_src>
import functools

import jax
import jax.numpy as jnp
from jax.experimental import pallas as pl
from jax.experimental.pallas import tpu as pltpu


def _round_up(x, m):
    return (x + m - 1) // m * m


# ----------------------------------------------------------------------------
# Fused Pallas kernel: encoder + decoder_cal + decoder_rna for one batch tile
# ----------------------------------------------------------------------------
def _fused_vae_kernel(Kp, CalDp, RnaDp, C8p,
                      xcal_ref, xrna_ref, y_ref,
                      # encoder (split first layer, folded tail)
                      we1c_ref, we1r_ref, we1y_ref, be1_ref,
                      we2_ref, be2_ref, we34_ref, be34_ref,
                      # merged decoder first layer (encoder tail pre-folded in)
                      wz_ref, wy_ref, bd1_ref,
                      # decoder cal tail (layer 2 + folded loc head)
                      wc2_ref, bc2_ref, wc34_ref, bc34_ref,
                      # decoder rna tail
                      wr2_ref, br2_ref, wr34_ref, br34_ref,
                      out_ref):
    f32 = jnp.float32

    def mm(a, w_ref):
        # cast activations to the weight dtype (bf16 MXU fast path on v6e/v7x),
        # accumulate in f32.
        return jnp.dot(a.astype(w_ref.dtype), w_ref[...],
                       preferred_element_type=f32)

    xcal = xcal_ref[...]
    xrna = xrna_ref[...]
    y = y_ref[...]

    # ---- encoder: torch.nan_to_num(cat(xcal, xrna, y), nan=0, posinf=0, neginf=0)
    xcal_c = jnp.where(jnp.isfinite(xcal), xcal, 0.0)
    xrna_c = jnp.where(jnp.isfinite(xrna), xrna, 0.0)
    y_c = jnp.where(jnp.isfinite(y), y, 0.0)

    h1 = (mm(xcal_c, we1c_ref) + mm(xrna_c, we1r_ref) + mm(y_c, we1y_ref)
          + be1_ref[...])
    h1 = jnp.maximum(h1, 0.0)                                   # ReLU
    h2 = jnp.maximum(mm(h1, we2_ref) + be2_ref[...], 0.0)       # ReLU

    # zloc head: folded Linear(4K,2K) o Linear(2K,K); columns >= K are zero-padded.
    zpad = mm(h2, we34_ref) + be34_ref[...]                      # [TB, Kp]

    # ---- both decoders' first layer, merged, fed directly from h2:
    #      relu( zloc @ Wdec1[:K] + y @ Wdec1[K:] + b )
    #    = relu( h2 @ (We34 @ Wdec1[:K]) + y @ Wdec1[K:] + (be34 @ Wdec1[:K] + b) )
    d1 = jnp.maximum(mm(h2, wz_ref) + mm(y, wy_ref) + bd1_ref[...], 0.0)

    # ---- decoder cal tail
    hc = jnp.maximum(mm(d1[:, :C8p], wc2_ref) + bc2_ref[...], 0.0)
    xc = mm(hc, wc34_ref) + bc34_ref[...]

    # ---- decoder rna tail
    hr = jnp.maximum(mm(d1[:, C8p:], wr2_ref) + br2_ref[...], 0.0)
    xr = mm(hr, wr34_ref) + br34_ref[...]

    # lane-dense, 128-aligned stores into the packed output slab
    out_ref[:, 0:Kp] = zpad.astype(out_ref.dtype)
    out_ref[:, Kp:Kp + CalDp] = xc.astype(out_ref.dtype)
    out_ref[:, Kp + CalDp:] = xr.astype(out_ref.dtype)


# ----------------------------------------------------------------------------
# Wrapper: one pallas_call over a batch grid; weights VMEM-resident
# ----------------------------------------------------------------------------
@functools.partial(jax.jit, static_argnums=(1, 5))
def _fused_forward_impl(kparams, dims, xcal, xrna, y, single_buffer_weights):
    CalD, RnaD, NS, K = dims
    Kp = _round_up(K, 128)
    CalDp = _round_up(CalD, 128)
    RnaDp = _round_up(RnaD, 128)
    C8p = _round_up(CalD // 8, 128)
    OUTW = Kp + CalDp + RnaDp

    B = xcal.shape[0]
    # Fill the 256-wide MXU M dim (v6e/v7x) but keep >=2 grid steps so the
    # "parallel" batch axis can shard across both v7x TensorCores.
    TB = max(8, min(256, _round_up(pl.cdiv(B, 2), 8)))
    NB = pl.cdiv(B, TB)
    B_pad = NB * TB
    if B_pad != B:
        pad = B_pad - B
        xcal = jnp.pad(xcal, ((0, pad), (0, 0)))
        xrna = jnp.pad(xrna, ((0, pad), (0, 0)))
        y = jnp.pad(y, ((0, pad), (0, 0)))

    def act_spec(d):
        return pl.BlockSpec((TB, d), lambda i: (i, 0))

    if single_buffer_weights:
        def resident_spec(a):
            # constant index_map: DMA'd once; single buffer halves weight VMEM.
            return pl.BlockSpec(a.shape, lambda i: (0, 0),
                                pipeline_mode=pl.Buffered(1))
    else:
        def resident_spec(a):
            return pl.BlockSpec(a.shape, lambda i: (0, 0))

    in_specs = [act_spec(CalD), act_spec(RnaD), act_spec(NS)]
    in_specs += [resident_spec(p) for p in kparams]

    # advisory cost estimate (post-fold matmul volumes)
    H1p = _round_up((CalD + RnaD + NS) // 2, 128)
    H2p = _round_up(4 * K, 128)
    C4p = _round_up(CalD // 4, 128)
    R8p = _round_up(RnaD // 8, 128)
    R4p = _round_up(RnaD // 4, 128)
    mm_vol = (CalD * H1p + RnaD * H1p + NS * H1p        # encoder L1 (split cat)
              + H1p * H2p                               # encoder L2
              + H2p * Kp                                # folded zloc head
              + (H2p + NS) * (C8p + R8p)                # merged decoder L1
              + C8p * C4p + C4p * CalDp                 # decoder cal tail
              + R8p * R4p + R4p * RnaDp)                # decoder rna tail
    weight_bytes = sum(int(p.size) * p.dtype.itemsize for p in kparams)
    ce = pl.CostEstimate(
        flops=int(2 * B_pad * mm_vol),
        transcendentals=0,
        bytes_accessed=int(4 * (xcal.size + xrna.size + y.size + B_pad * OUTW)
                           + weight_bytes))

    # explicit scoped-VMEM budget (weights x buffers + double-buffered act/out
    # tiles + headroom), clamped below physical VMEM.
    wbuf = 1 if single_buffer_weights else 2
    act_bytes = TB * (CalD + RnaD + NS) * 4
    out_bytes = TB * OUTW * 4
    needed = int(1.3 * (wbuf * weight_bytes + 2 * act_bytes + 2 * out_bytes)) + (8 << 20)
    try:
        phys = int(pltpu.get_tpu_info().vmem_capacity_bytes)
    except Exception:
        phys = 64 << 20     # conservative (v7x per-core VMEM)
    vmem_limit = int(min(int(phys * 0.9), max(needed, 32 << 20)))

    out = pl.pallas_call(
        functools.partial(_fused_vae_kernel, Kp, CalDp, RnaDp, C8p),
        out_shape=jax.ShapeDtypeStruct((B_pad, OUTW), jnp.float32),
        grid_spec=pltpu.PrefetchScalarGridSpec(
            num_scalar_prefetch=0,
            grid=(NB,),
            in_specs=in_specs,
            out_specs=pl.BlockSpec((TB, OUTW), lambda i: (i, 0)),
        ),
        compiler_params=pltpu.CompilerParams(
            dimension_semantics=("parallel",),
            vmem_limit_bytes=vmem_limit),
        cost_estimate=ce,
    )(xcal, xrna, y, *kparams)

    zloc = out[:B, :K]
    xhat_cal = out[:B, Kp:Kp + CalD]
    xhat_rna = out[:B, Kp + CalDp:Kp + CalDp + RnaD]
    return zloc, xhat_cal, xhat_rna


def fused_forward(kparams, dims, xcal, xrna, y):
    try:
        return _fused_forward_impl(kparams, dims, xcal, xrna, y, True)
    except Exception:
        # Fallback if single-buffered (Buffered(1)) resident specs are rejected
        # by the installed Pallas/Mosaic stack.
        return _fused_forward_impl(kparams, dims, xcal, xrna, y, False)


def forward(kparams, dims, batch_loader):
    """Mirror of MultiModSupMlpVAE_v1.forward over a batch loader.

    Per-row computation is independent, so stacking the loader batches and
    running one fused kernel is mathematically identical to the per-batch
    loop + torch.cat of the reference."""
    xcal = jnp.concatenate([b[0] for b in batch_loader], axis=0)
    xrna = jnp.concatenate([b[1] for b in batch_loader], axis=0)
    y = jnp.concatenate([b[2] for b in batch_loader], axis=0)
    return fused_forward(kparams, dims, xcal, xrna, y)


# ----------------------------------------------------------------------------
# Deterministic synthetic parameters (shapes from MultiModSupMlpVAE_v1.__init__)
# ----------------------------------------------------------------------------
def _linear(key, d_in, d_out):
    kw, kb = jax.random.split(key)
    w = jax.random.normal(kw, (d_in, d_out), jnp.float32) / jnp.sqrt(d_in)
    b = jax.random.normal(kb, (1, d_out), jnp.float32) * 0.01
    return w, b


def make_raw_params(key, CalD, RnaD, NS, K):
    D = CalD + RnaD + NS
    ks = jax.random.split(key, 12)
    enc = [_linear(ks[0], D, D // 2), _linear(ks[1], D // 2, 4 * K),
           _linear(ks[2], 4 * K, 2 * K), _linear(ks[3], 2 * K, K)]
    dec_cal = [_linear(ks[4], K + NS, CalD // 8), _linear(ks[5], CalD // 8, CalD // 4),
               _linear(ks[6], CalD // 4, CalD // 2), _linear(ks[7], CalD // 2, CalD)]
    dec_rna = [_linear(ks[8], K + NS, RnaD // 8), _linear(ks[9], RnaD // 8, RnaD // 4),
               _linear(ks[10], RnaD // 4, RnaD // 2), _linear(ks[11], RnaD // 2, RnaD)]
    return dict(enc=enc, dec_cal=dec_cal, dec_rna=dec_rna)


def prepare_kernel_params(raw, CalD, RnaD, NS, K, weights_dtype=jnp.float32):
    """Split cat segments, fold trailing Linear pairs, pre-fold the encoder
    tail into the decoder z-paths, merge the decoders' first layers, and
    zero-pad every hidden/output dim to a multiple of 128 (exact)."""
    H1, H2 = (CalD + RnaD + NS) // 2, 4 * K
    C8, C4 = CalD // 8, CalD // 4
    R8, R4 = RnaD // 8, RnaD // 4
    H1p, H2p, Kp = _round_up(H1, 128), _round_up(H2, 128), _round_up(K, 128)
    C8p, C4p = _round_up(C8, 128), _round_up(C4, 128)
    R8p, R4p = _round_up(R8, 128), _round_up(R4, 128)
    CalDp, RnaDp = _round_up(CalD, 128), _round_up(RnaD, 128)

    def padw(w, r, c):
        return jnp.pad(w, ((0, r - w.shape[0]), (0, c - w.shape[1])))

    def padb(b, c):
        return jnp.pad(b, ((0, 0), (0, c - b.shape[1])))

    (we1, be1), (we2, be2), (we3, be3), (we4, be4) = raw["enc"]
    (wc1, bc1), (wc2, bc2), (wc3, bc3), (wc4, bc4) = raw["dec_cal"]
    (wr1, br1), (wr2, br2), (wr3, br3), (wr4, br4) = raw["dec_rna"]

    # encoder first layer split along the torch.cat segments
    we1c, we1r, we1y = we1[:CalD], we1[CalD:CalD + RnaD], we1[CalD + RnaD:]
    # fold encoder tail Linear(4K,2K) o Linear(2K,K)
    we34 = we3 @ we4                       # [4K, K]
    be34 = be3 @ we4 + be4                 # [1, K]

    # pre-fold encoder tail into decoder z-paths and merge the two first layers
    wc1z, wc1y = wc1[:K], wc1[K:]
    wr1z, wr1y = wr1[:K], wr1[K:]
    wz = jnp.concatenate([padw(we34 @ wc1z, H2p, C8p),
                          padw(we34 @ wr1z, H2p, R8p)], axis=1)      # [H2p, C8p+R8p]
    wy = jnp.concatenate([padw(wc1y, NS, C8p),
                          padw(wr1y, NS, R8p)], axis=1)              # [NS,  C8p+R8p]
    bd1 = jnp.concatenate([padb(be34 @ wc1z + bc1, C8p),
                           padb(be34 @ wr1z + br1, R8p)], axis=1)    # [1,   C8p+R8p]

    # folded decoder heads
    wc34, bc34 = wc3 @ wc4, bc3 @ wc4 + bc4
    wr34, br34 = wr3 @ wr4, br3 @ wr4 + br4

    wd = weights_dtype
    return (
        padw(we1c, CalD, H1p).astype(wd), padw(we1r, RnaD, H1p).astype(wd),
        padw(we1y, NS, H1p).astype(wd), padb(be1, H1p),
        padw(we2, H1p, H2p).astype(wd), padb(be2, H2p),
        padw(we34, H2p, Kp).astype(wd), padb(be34, Kp),
        wz.astype(wd), wy.astype(wd), bd1,
        padw(wc2, C8p, C4p).astype(wd), padb(bc2, C4p),
        padw(wc34, C4p, CalDp).astype(wd), padb(bc34, CalDp),
        padw(wr2, R8p, R4p).astype(wd), padb(br2, R4p),
        padw(wr34, R4p, RnaDp).astype(wd), padb(br34, RnaDp),
    )


# ----------------------------------------------------------------------------
# Pure-JAX reference of the torch forward (for correctness validation)
# ----------------------------------------------------------------------------
def reference_forward(raw, xcal, xrna, y):
    def run_chain(chain, x):
        (w1, b1), (w2, b2), (w3, b3), (w4, b4) = chain
        h = jnp.maximum(x @ w1 + b1, 0.0)
        h = jnp.maximum(h @ w2 + b2, 0.0)
        h = h @ w3 + b3
        return h @ w4 + b4

    x = jnp.concatenate([xcal, xrna, y], axis=-1)
    x = jnp.where(jnp.isfinite(x), x, 0.0)
    zloc = run_chain(raw["enc"], x)
    zy = jnp.concatenate([zloc, y], axis=-1)
    xhat_cal = run_chain(raw["dec_cal"], zy)
    xhat_rna = run_chain(raw["dec_rna"], zy)
    return zloc, xhat_cal, xhat_rna


# ----------------------------------------------------------------------------
if __name__ == "__main__":
    CalD, RnaD, NS, K = 32, 64, 4, 8
    B_total, B_batch = 16, 8
    dims = (CalD, RnaD, NS, K)

    key = jax.random.PRNGKey(0)
    k_par, k_cal, k_rna, k_lab = jax.random.split(key, 4)
    raw = make_raw_params(k_par, CalD, RnaD, NS, K)

    xcal = jax.random.normal(k_cal, (B_total, CalD), jnp.float32)
    xrna = jax.random.normal(k_rna, (B_total, RnaD), jnp.float32)
    labels = jax.random.randint(k_lab, (B_total,), 0, NS)
    y = jax.nn.one_hot(labels, NS, dtype=jnp.float32)

    # inject non-finite values to exercise nan_to_num on the encoder path
    xcal = xcal.at[0, 0].set(jnp.nan)
    xcal = xcal.at[1, 1].set(jnp.inf)
    xrna = xrna.at[2, 3].set(-jnp.inf)

    # simulate the batch_loader of the PyTorch forward()
    batch_loader = [
        (xcal[:B_batch], xrna[:B_batch], y[:B_batch]),
        (xcal[B_batch:], xrna[B_batch:], y[B_batch:]),
    ]

    zloc_ref, xc_ref, xr_ref = reference_forward(raw, xcal, xrna, y)

    # --- f32 weights: tight check against the pure-JAX reference ---
    kparams_f32 = prepare_kernel_params(raw, CalD, RnaD, NS, K, jnp.float32)
    zloc, xhat_cal, xhat_rna = forward(kparams_f32, dims, batch_loader)
    jax.block_until_ready((zloc, xhat_cal, xhat_rna))

    assert zloc.shape == (B_total, K)
    assert xhat_cal.shape == (B_total, CalD)
    assert xhat_rna.shape == (B_total, RnaD)
    assert bool(jnp.all(jnp.isfinite(zloc)))
    assert bool(jnp.all(jnp.isfinite(xhat_cal)))
    assert bool(jnp.all(jnp.isfinite(xhat_rna)))
    # folding W3@W4 (and We34 into the decoders) changes f32 rounding slightly
    assert jnp.allclose(zloc, zloc_ref, atol=2e-3, rtol=2e-3)
    assert jnp.allclose(xhat_cal, xc_ref, atol=2e-3, rtol=2e-3)
    assert jnp.allclose(xhat_rna, xr_ref, atol=2e-3, rtol=2e-3)

    # --- bf16 weights (v6e/v7x MXU fast path): loose relative-error check ---
    kparams_bf16 = prepare_kernel_params(raw, CalD, RnaD, NS, K, jnp.bfloat16)
    zloc_b, xc_b, xr_b = forward(kparams_bf16, dims, batch_loader)
    jax.block_until_ready((zloc_b, xc_b, xr_b))

    def rel_err(a, b):
        return float(jnp.linalg.norm(a - b) / (jnp.linalg.norm(b) + 1e-6))

    assert rel_err(zloc_b, zloc_ref) < 5e-2
    assert rel_err(xc_b, xc_ref) < 5e-2
    assert rel_err(xr_b, xr_ref) < 5e-2

    print("KERNEL_OK")
</pallas_src>

<mosaic_0001>
module attributes {stable_mosaic.version = 11 : i64} {
  func.func @_fused_vae_kernel(%arg0: i32, %arg1: memref<8x32xf32, #tpu.memory_space<vmem>>, %arg2: memref<8x64xf32, #tpu.memory_space<vmem>>, %arg3: memref<8x4xf32, #tpu.memory_space<vmem>>, %arg4: memref<32x128xf32, #tpu.memory_space<vmem>>, %arg5: memref<64x128xf32, #tpu.memory_space<vmem>>, %arg6: memref<4x128xf32, #tpu.memory_space<vmem>>, %arg7: memref<1x128xf32, #tpu.memory_space<vmem>>, %arg8: memref<128x128xf32, #tpu.memory_space<vmem>>, %arg9: memref<1x128xf32, #tpu.memory_space<vmem>>, %arg10: memref<128x128xf32, #tpu.memory_space<vmem>>, %arg11: memref<1x128xf32, #tpu.memory_space<vmem>>, %arg12: memref<128x256xf32, #tpu.memory_space<vmem>>, %arg13: memref<4x256xf32, #tpu.memory_space<vmem>>, %arg14: memref<1x256xf32, #tpu.memory_space<vmem>>, %arg15: memref<128x128xf32, #tpu.memory_space<vmem>>, %arg16: memref<1x128xf32, #tpu.memory_space<vmem>>, %arg17: memref<128x128xf32, #tpu.memory_space<vmem>>, %arg18: memref<1x128xf32, #tpu.memory_space<vmem>>, %arg19: memref<128x128xf32, #tpu.memory_space<vmem>>, %arg20: memref<1x128xf32, #tpu.memory_space<vmem>>, %arg21: memref<128x128xf32, #tpu.memory_space<vmem>>, %arg22: memref<1x128xf32, #tpu.memory_space<vmem>>, %arg23: memref<8x384xf32, #tpu.memory_space<vmem>>) attributes {dimension_semantics = [#tpu.dimension_semantics<parallel>], iteration_bounds = array<i64: 2>, scalar_prefetch = 0 : i64, scratch_operands = 0 : i64, tpu.core_type = #tpu.core_type<tc>, window_params = [{transform_indices = @transform_0, window_bounds = array<i64: 8, 32>}, {transform_indices = @transform_1, window_bounds = array<i64: 8, 64>}, {transform_indices = @transform_2, window_bounds = array<i64: 8, 4>}, {pipeline_mode = #tpu.pipeline_mode<synchronous>, transform_indices = @transform_3, window_bounds = array<i64: 32, 128>}, {pipeline_mode = #tpu.pipeline_mode<synchronous>, transform_indices = @transform_4, window_bounds = array<i64: 64, 128>}, {pipeline_mode = #tpu.pipeline_mode<synchronous>, transform_indices = @transform_5, window_bounds = array<i64: 4, 128>}, {pipeline_mode = #tpu.pipeline_mode<synchronous>, transform_indices = @transform_6, window_bounds = array<i64: 1, 128>}, {pipeline_mode = #tpu.pipeline_mode<synchronous>, transform_indices = @transform_7, window_bounds = array<i64: 128, 128>}, {pipeline_mode = #tpu.pipeline_mode<synchronous>, transform_indices = @transform_8, window_bounds = array<i64: 1, 128>}, {pipeline_mode = #tpu.pipeline_mode<synchronous>, transform_indices = @transform_9, window_bounds = array<i64: 128, 128>}, {pipeline_mode = #tpu.pipeline_mode<synchronous>, transform_indices = @transform_10, window_bounds = array<i64: 1, 128>}, {pipeline_mode = #tpu.pipeline_mode<synchronous>, transform_indices = @transform_11, window_bounds = array<i64: 128, 256>}, {pipeline_mode = #tpu.pipeline_mode<synchronous>, transform_indices = @transform_12, window_bounds = array<i64: 4, 256>}, {pipeline_mode = #tpu.pipeline_mode<synchronous>, transform_indices = @transform_13, window_bounds = array<i64: 1, 256>}, {pipeline_mode = #tpu.pipeline_mode<synchronous>, transform_indices = @transform_14, window_bounds = array<i64: 128, 128>}, {pipeline_mode = #tpu.pipeline_mode<synchronous>, transform_indices = @transform_15, window_bounds = array<i64: 1, 128>}, {pipeline_mode = #tpu.pipeline_mode<synchronous>, transform_indices = @transform_16, window_bounds = array<i64: 128, 128>}, {pipeline_mode = #tpu.pipeline_mode<synchronous>, transform_indices = @transform_17, window_bounds = array<i64: 1, 128>}, {pipeline_mode = #tpu.pipeline_mode<synchronous>, transform_indices = @transform_18, window_bounds = array<i64: 128, 128>}, {pipeline_mode = #tpu.pipeline_mode<synchronous>, transform_indices = @transform_19, window_bounds = array<i64: 1, 128>}, {pipeline_mode = #tpu.pipeline_mode<synchronous>, transform_indices = @transform_20, window_bounds = array<i64: 128, 128>}, {pipeline_mode = #tpu.pipeline_mode<synchronous>, transform_indices = @transform_21, window_bounds = array<i64: 1, 128>}, {transform_indices = @transform_22, window_bounds = array<i64: 8, 384>}]} {
    %c0 = arith.constant 0 : index
    %c0_0 = arith.constant 0 : index
    %0 = vector.load %arg1[%c0, %c0_0] : memref<8x32xf32, #tpu.memory_space<vmem>>, vector<8x32xf32>
    %c0_1 = arith.constant 0 : index
    %c0_2 = arith.constant 0 : index
    %1 = vector.load %arg2[%c0_1, %c0_2] : memref<8x64xf32, #tpu.memory_space<vmem>>, vector<8x64xf32>
    %c0_3 = arith.constant 0 : index
    %c0_4 = arith.constant 0 : index
    %2 = vector.load %arg3[%c0_3, %c0_4] : memref<8x4xf32, #tpu.memory_space<vmem>>, vector<8x4xf32>
    %3 = tpu.weird %0 : vector<8x32xf32> -> vector<8x32xi1>
    %cst = arith.constant dense<true> : vector<8x32xi1>
    %4 = arith.xori %3, %cst : vector<8x32xi1>
    %cst_5 = arith.constant 0.000000e+00 : f32
    %5 = vector.broadcast %cst_5 : f32 to vector<8x32xf32>
    %6 = arith.select %4, %0, %5 : vector<8x32xi1>, vector<8x32xf32>
    %7 = tpu.weird %1 : vector<8x64xf32> -> vector<8x64xi1>
    %cst_6 = arith.constant dense<true> : vector<8x64xi1>
    %8 = arith.xori %7, %cst_6 : vector<8x64xi1>
    %cst_7 = arith.constant 0.000000e+00 : f32
    %9 = vector.broadcast %cst_7 : f32 to vector<8x64xf32>
    %10 = arith.select %8, %1, %9 : vector<8x64xi1>, vector<8x64xf32>
    %11 = tpu.weird %2 : vector<8x4xf32> -> vector<8x4xi1>
    %cst_8 = arith.constant dense<true> : vector<8x4xi1>
    %12 = arith.xori %11, %cst_8 : vector<8x4xi1>
    %cst_9 = arith.constant 0.000000e+00 : f32
    %13 = vector.broadcast %cst_9 : f32 to vector<8x4xf32>
    %14 = arith.select %12, %2, %13 : vector<8x4xi1>, vector<8x4xf32>
    %c0_10 = arith.constant 0 : index
    %c0_11 = arith.constant 0 : index
    %15 = vector.load %arg4[%c0_10, %c0_11] : memref<32x128xf32, #tpu.memory_space<vmem>>, vector<32x128xf32>
    %cst_12 = arith.constant dense<0.000000e+00> : vector<8x128xf32>
    %16 = tpu.matmul %6, %15, %cst_12 {dimension_numbers = #tpu.dot_dimension_numbers<[1], [0], [0], [1], [0, 0, 1, 1], [], []>} : vector<8x32xf32>, vector<32x128xf32>, vector<8x128xf32> -> vector<8x128xf32>
    %c0_13 = arith.constant 0 : index
    %c0_14 = arith.constant 0 : index
    %17 = vector.load %arg5[%c0_13, %c0_14] : memref<64x128xf32, #tpu.memory_space<vmem>>, vector<64x128xf32>
    %cst_15 = arith.constant dense<0.000000e+00> : vector<8x128xf32>
    %18 = tpu.matmul %10, %17, %cst_15 {dimension_numbers = #tpu.dot_dimension_numbers<[1], [0], [0], [1], [0, 0, 1, 1], [], []>} : vector<8x64xf32>, vector<64x128xf32>, vector<8x128xf32> -> vector<8x128xf32>
    %19 = arith.addf %16, %18 : vector<8x128xf32>
    %c0_16 = arith.constant 0 : index
    %c0_17 = arith.constant 0 : index
    %20 = vector.load %arg6[%c0_16, %c0_17] : memref<4x128xf32, #tpu.memory_space<vmem>>, vector<4x128xf32>
    %cst_18 = arith.constant dense<0.000000e+00> : vector<8x128xf32>
    %21 = tpu.matmul %14, %20, %cst_18 {dimension_numbers = #tpu.dot_dimension_numbers<[1], [0], [0], [1], [0, 0, 1, 1], [], []>} : vector<8x4xf32>, vector<4x128xf32>, vector<8x128xf32> -> vector<8x128xf32>
    %22 = arith.addf %19, %21 : vector<8x128xf32>
    %c0_19 = arith.constant 0 : index
    %c0_20 = arith.constant 0 : index
    %23 = vector.load %arg7[%c0_19, %c0_20] : memref<1x128xf32, #tpu.memory_space<vmem>>, vector<1x128xf32>
    %24 = vector.broadcast %23 : vector<1x128xf32> to vector<8x128xf32>
    %25 = arith.addf %22, %24 : vector<8x128xf32>
    %cst_21 = arith.constant 0.000000e+00 : f32
    %26 = vector.broadcast %cst_21 : f32 to vector<8x128xf32>
    %27 = arith.maximumf %25, %26 : vector<8x128xf32>
    %c0_22 = arith.constant 0 : index
    %c0_23 = arith.constant 0 : index
    %28 = vector.load %arg8[%c0_22, %c0_23] : memref<128x128xf32, #tpu.memory_space<vmem>>, vector<128x128xf32>
    %cst_24 = arith.constant dense<0.000000e+00> : vector<8x128xf32>
    %29 = tpu.matmul %27, %28, %cst_24 {dimension_numbers = #tpu.dot_dimension_numbers<[1], [0], [0], [1], [0, 0, 1, 1], [], []>} : vector<8x128xf32>, vector<128x128xf32>, vector<8x128xf32> -> vector<8x128xf32>
    %c0_25 = arith.constant 0 : index
    %c0_26 = arith.constant 0 : index
    %30 = vector.load %arg9[%c0_25, %c0_26] : memref<1x128xf32, #tpu.memory_space<vmem>>, vector<1x128xf32>
    %31 = vector.broadcast %30 : vector<1x128xf32> to vector<8x128xf32>
    %32 = arith.addf %29, %31 : vector<8x128xf32>
    %cst_27 = arith.constant 0.000000e+00 : f32
    %33 = vector.broadcast %cst_27 : f32 to vector<8x128xf32>
    %34 = arith.maximumf %32, %33 : vector<8x128xf32>
    %c0_28 = arith.constant 0 : index
    %c0_29 = arith.constant 0 : index
    %35 = vector.load %arg10[%c0_28, %c0_29] : memref<128x128xf32, #tpu.memory_space<vmem>>, vector<128x128xf32>
    %cst_30 = arith.constant dense<0.000000e+00> : vector<8x128xf32>
    %36 = tpu.matmul %34, %35, %cst_30 {dimension_numbers = #tpu.dot_dimension_numbers<[1], [0], [0], [1], [0, 0, 1, 1], [], []>} : vector<8x128xf32>, vector<128x128xf32>, vector<8x128xf32> -> vector<8x128xf32>
    %c0_31 = arith.constant 0 : index
    %c0_32 = arith.constant 0 : index
    %37 = vector.load %arg11[%c0_31, %c0_32] : memref<1x128xf32, #tpu.memory_space<vmem>>, vector<1x128xf32>
    %38 = vector.broadcast %37 : vector<1x128xf32> to vector<8x128xf32>
    %39 = arith.addf %36, %38 : vector<8x128xf32>
    %c0_33 = arith.constant 0 : index
    %c0_34 = arith.constant 0 : index
    %40 = vector.load %arg12[%c0_33, %c0_34] : memref<128x256xf32, #tpu.memory_space<vmem>>, vector<128x256xf32>
    %cst_35 = arith.constant dense<0.000000e+00> : vector<8x256xf32>
    %41 = tpu.matmul %34, %40, %cst_35 {dimension_numbers = #tpu.dot_dimension_numbers<[1], [0], [0], [1], [0, 0, 1, 1], [], []>} : vector<8x128xf32>, vector<128x256xf32>, vector<8x256xf32> -> vector<8x256xf32>
    %c0_36 = arith.constant 0 : index
    %c0_37 = arith.constant 0 : index
    %42 = vector.load %arg13[%c0_36, %c0_37] : memref<4x256xf32, #tpu.memory_space<vmem>>, vector<4x256xf32>
    %cst_38 = arith.constant dense<0.000000e+00> : vector<8x256xf32>
    %43 = tpu.matmul %2, %42, %cst_38 {dimension_numbers = #tpu.dot_dimension_numbers<[1], [0], [0], [1], [0, 0, 1, 1], [], []>} : vector<8x4xf32>, vector<4x256xf32>, vector<8x256xf32> -> vector<8x256xf32>
    %44 = arith.addf %41, %43 : vector<8x256xf32>
    %c0_39 = arith.constant 0 : index
    %c0_40 = arith.constant 0 : index
    %45 = vector.load %arg14[%c0_39, %c0_40] : memref<1x256xf32, #tpu.memory_space<vmem>>, vector<1x256xf32>
    %46 = vector.broadcast %45 : vector<1x256xf32> to vector<8x256xf32>
    %47 = arith.addf %44, %46 : vector<8x256xf32>
    %cst_41 = arith.constant 0.000000e+00 : f32
    %48 = vector.broadcast %cst_41 : f32 to vector<8x256xf32>
    %49 = arith.maximumf %47, %48 : vector<8x256xf32>
    %50 = vector.extract_strided_slice %49 {offsets = [0, 0], sizes = [8, 128], strides = [1, 1]} : vector<8x256xf32> to vector<8x128xf32>
    %c0_42 = arith.constant 0 : index
    %c0_43 = arith.constant 0 : index
    %51 = vector.load %arg15[%c0_42, %c0_43] : memref<128x128xf32, #tpu.memory_space<vmem>>, vector<128x128xf32>
    %cst_44 = arith.constant dense<0.000000e+00> : vector<8x128xf32>
    %52 = tpu.matmul %50, %51, %cst_44 {dimension_numbers = #tpu.dot_dimension_numbers<[1], [0], [0], [1], [0, 0, 1, 1], [], []>} : vector<8x128xf32>, vector<128x128xf32>, vector<8x128xf32> -> vector<8x128xf32>
    %c0_45 = arith.constant 0 : index
    %c0_46 = arith.constant 0 : index
    %53 = vector.load %arg16[%c0_45, %c0_46] : memref<1x128xf32, #tpu.memory_space<vmem>>, vector<1x128xf32>
    %54 = vector.broadcast %53 : vector<1x128xf32> to vector<8x128xf32>
    %55 = arith.addf %52, %54 : vector<8x128xf32>
    %cst_47 = arith.constant 0.000000e+00 : f32
    %56 = vector.broadcast %cst_47 : f32 to vector<8x128xf32>
    %57 = arith.maximumf %55, %56 : vector<8x128xf32>
    %c0_48 = arith.constant 0 : index
    %c0_49 = arith.constant 0 : index
    %58 = vector.load %arg17[%c0_48, %c0_49] : memref<128x128xf32, #tpu.memory_space<vmem>>, vector<128x128xf32>
    %cst_50 = arith.constant dense<0.000000e+00> : vector<8x128xf32>
    %59 = tpu.matmul %57, %58, %cst_50 {dimension_numbers = #tpu.dot_dimension_numbers<[1], [0], [0], [1], [0, 0, 1, 1], [], []>} : vector<8x128xf32>, vector<128x128xf32>, vector<8x128xf32> -> vector<8x128xf32>
    %c0_51 = arith.constant 0 : index
    %c0_52 = arith.constant 0 : index
    %60 = vector.load %arg18[%c0_51, %c0_52] : memref<1x128xf32, #tpu.memory_space<vmem>>, vector<1x128xf32>
    %61 = vector.broadcast %60 : vector<1x128xf32> to vector<8x128xf32>
    %62 = arith.addf %59, %61 : vector<8x128xf32>
    %63 = vector.extract_strided_slice %49 {offsets = [0, 128], sizes = [8, 128], strides = [1, 1]} : vector<8x256xf32> to vector<8x128xf32>
    %c0_53 = arith.constant 0 : index
    %c0_54 = arith.constant 0 : index
    %64 = vector.load %arg19[%c0_53, %c0_54] : memref<128x128xf32, #tpu.memory_space<vmem>>, vector<128x128xf32>
    %cst_55 = arith.constant dense<0.000000e+00> : vector<8x128xf32>
    %65 = tpu.matmul %63, %64, %cst_55 {dimension_numbers = #tpu.dot_dimension_numbers<[1], [0], [0], [1], [0, 0, 1, 1], [], []>} : vector<8x128xf32>, vector<128x128xf32>, vector<8x128xf32> -> vector<8x128xf32>
    %c0_56 = arith.constant 0 : index
    %c0_57 = arith.constant 0 : index
    %66 = vector.load %arg20[%c0_56, %c0_57] : memref<1x128xf32, #tpu.memory_space<vmem>>, vector<1x128xf32>
    %67 = vector.broadcast %66 : vector<1x128xf32> to vector<8x128xf32>
    %68 = arith.addf %65, %67 : vector<8x128xf32>
    %cst_58 = arith.constant 0.000000e+00 : f32
    %69 = vector.broadcast %cst_58 : f32 to vector<8x128xf32>
    %70 = arith.maximumf %68, %69 : vector<8x128xf32>
    %c0_59 = arith.constant 0 : index
    %c0_60 = arith.constant 0 : index
    %71 = vector.load %arg21[%c0_59, %c0_60] : memref<128x128xf32, #tpu.memory_space<vmem>>, vector<128x128xf32>
    %cst_61 = arith.constant dense<0.000000e+00> : vector<8x128xf32>
    %72 = tpu.matmul %70, %71, %cst_61 {dimension_numbers = #tpu.dot_dimension_numbers<[1], [0], [0], [1], [0, 0, 1, 1], [], []>} : vector<8x128xf32>, vector<128x128xf32>, vector<8x128xf32> -> vector<8x128xf32>
    %c0_62 = arith.constant 0 : index
    %c0_63 = arith.constant 0 : index
    %73 = vector.load %arg22[%c0_62, %c0_63] : memref<1x128xf32, #tpu.memory_space<vmem>>, vector<1x128xf32>
    %74 = vector.broadcast %73 : vector<1x128xf32> to vector<8x128xf32>
    %75 = arith.addf %72, %74 : vector<8x128xf32>
    %c0_64 = arith.constant 0 : index
    %c0_65 = arith.constant 0 : index
    %76 = vector.load %arg23[%c0_64, %c0_65] : memref<8x384xf32, #tpu.memory_space<vmem>>, vector<8x128xf32>
    tpu.vector_store %arg23[%c0_64, %c0_65], %39 {strides = array<i32>} : memref<8x384xf32, #tpu.memory_space<vmem>>, vector<8x128xf32>,
    %c0_66 = arith.constant 0 : index
    %c128 = arith.constant 128 : index
    %77 = vector.load %arg23[%c0_66, %c128] : memref<8x384xf32, #tpu.memory_space<vmem>>, vector<8x128xf32>
    tpu.vector_store %arg23[%c0_66, %c128], %62 {strides = array<i32>} : memref<8x384xf32, #tpu.memory_space<vmem>>, vector<8x128xf32>,
    %c0_67 = arith.constant 0 : index
    %c256 = arith.constant 256 : index
    %78 = vector.load %arg23[%c0_67, %c256] : memref<8x384xf32, #tpu.memory_space<vmem>>, vector<8x128xf32>
    tpu.vector_store %arg23[%c0_67, %c256], %75 {strides = array<i32>} : memref<8x384xf32, #tpu.memory_space<vmem>>, vector<8x128xf32>,
    return
  }
  func.func @transform_0(%arg0: i32) -> (i32, i32) {
    %c0_i32 = arith.constant 0 : i32
    %c0_i32_0 = arith.constant 0 : i32
    return %arg0, %c0_i32 : i32, i32
  }
  func.func @transform_1(%arg0: i32) -> (i32, i32) {
    %c0_i32 = arith.constant 0 : i32
    %c0_i32_0 = arith.constant 0 : i32
    return %arg0, %c0_i32 : i32, i32
  }
  func.func @transform_2(%arg0: i32) -> (i32, i32) {
    %c0_i32 = arith.constant 0 : i32
    %c0_i32_0 = arith.constant 0 : i32
    return %arg0, %c0_i32 : i32, i32
  }
  func.func @transform_3(%arg0: i32) -> (i32, i32) {
    %c0_i32 = arith.constant 0 : i32
    %c0_i32_0 = arith.constant 0 : i32
    %c0_i32_1 = arith.constant 0 : i32
    return %c0_i32, %c0_i32_0 : i32, i32
  }
  func.func @transform_4(%arg0: i32) -> (i32, i32) {
    %c0_i32 = arith.constant 0 : i32
    %c0_i32_0 = arith.constant 0 : i32
    %c0_i32_1 = arith.constant 0 : i32
    return %c0_i32, %c0_i32_0 : i32, i32
  }
  func.func @transform_5(%arg0: i32) -> (i32, i32) {
    %c0_i32 = arith.constant 0 : i32
    %c0_i32_0 = arith.constant 0 : i32
    %c0_i32_1 = arith.constant 0 : i32
    return %c0_i32, %c0_i32_0 : i32, i32
  }
  func.func @transform_6(%arg0: i32) -> (i32, i32) {
    %c0_i32 = arith.constant 0 : i32
    %c0_i32_0 = arith.constant 0 : i32
    %c0_i32_1 = arith.constant 0 : i32
    return %c0_i32, %c0_i32_0 : i32, i32
  }
  func.func @transform_7(%arg0: i32) -> (i32, i32) {
    %c0_i32 = arith.constant 0 : i32
    %c0_i32_0 = arith.constant 0 : i32
    %c0_i32_1 = arith.constant 0 : i32
    return %c0_i32, %c0_i32_0 : i32, i32
  }
  func.func @transform_8(%arg0: i32) -> (i32, i32) {
    %c0_i32 = arith.constant 0 : i32
    %c0_i32_0 = arith.constant 0 : i32
    %c0_i32_1 = arith.constant 0 : i32
    return %c0_i32, %c0_i32_0 : i32, i32
  }
  func.func @transform_9(%arg0: i32) -> (i32, i32) {
    %c0_i32 = arith.constant 0 : i32
    %c0_i32_0 = arith.constant 0 : i32
    %c0_i32_1 = arith.constant 0 : i32
    return %c0_i32, %c0_i32_0 : i32, i32
  }
  func.func @transform_10(%arg0: i32) -> (i32, i32) {
    %c0_i32 = arith.constant 0 : i32
    %c0_i32_0 = arith.constant 0 : i32
    %c0_i32_1 = arith.constant 0 : i32
    return %c0_i32, %c0_i32_0 : i32, i32
  }
  func.func @transform_11(%arg0: i32) -> (i32, i32) {
    %c0_i32 = arith.constant 0 : i32
    %c0_i32_0 = arith.constant 0 : i32
    %c0_i32_1 = arith.constant 0 : i32
    return %c0_i32, %c0_i32_0 : i32, i32
  }
  func.func @transform_12(%arg0: i32) -> (i32, i32) {
    %c0_i32 = arith.constant 0 : i32
    %c0_i32_0 = arith.constant 0 : i32
    %c0_i32_1 = arith.constant 0 : i32
    return %c0_i32, %c0_i32_0 : i32, i32
  }
  func.func @transform_13(%arg0: i32) -> (i32, i32) {
    %c0_i32 = arith.constant 0 : i32
    %c0_i32_0 = arith.constant 0 : i32
    %c0_i32_1 = arith.constant 0 : i32
    return %c0_i32, %c0_i32_0 : i32, i32
  }
  func.func @transform_14(%arg0: i32) -> (i32, i32) {
    %c0_i32 = arith.constant 0 : i32
    %c0_i32_0 = arith.constant 0 : i32
    %c0_i32_1 = arith.constant 0 : i32
    return %c0_i32, %c0_i32_0 : i32, i32
  }
  func.func @transform_15(%arg0: i32) -> (i32, i32) {
    %c0_i32 = arith.constant 0 : i32
    %c0_i32_0 = arith.constant 0 : i32
    %c0_i32_1 = arith.constant 0 : i32
    return %c0_i32, %c0_i32_0 : i32, i32
  }
  func.func @transform_16(%arg0: i32) -> (i32, i32) {
    %c0_i32 = arith.constant 0 : i32
    %c0_i32_0 = arith.constant 0 : i32
    %c0_i32_1 = arith.constant 0 : i32
    return %c0_i32, %c0_i32_0 : i32, i32
  }
  func.func @transform_17(%arg0: i32) -> (i32, i32) {
    %c0_i32 = arith.constant 0 : i32
    %c0_i32_0 = arith.constant 0 : i32
    %c0_i32_1 = arith.constant 0 : i32
    return %c0_i32, %c0_i32_0 : i32, i32
  }
  func.func @transform_18(%arg0: i32) -> (i32, i32) {
    %c0_i32 = arith.constant 0 : i32
    %c0_i32_0 = arith.constant 0 : i32
    %c0_i32_1 = arith.constant 0 : i32
    return %c0_i32, %c0_i32_0 : i32, i32
  }
  func.func @transform_19(%arg0: i32) -> (i32, i32) {
    %c0_i32 = arith.constant 0 : i32
    %c0_i32_0 = arith.constant 0 : i32
    %c0_i32_1 = arith.constant 0 : i32
    return %c0_i32, %c0_i32_0 : i32, i32
  }
  func.func @transform_20(%arg0: i32) -> (i32, i32) {
    %c0_i32 = arith.constant 0 : i32
    %c0_i32_0 = arith.constant 0 : i32
    %c0_i32_1 = arith.constant 0 : i32
    return %c0_i32, %c0_i32_0 : i32, i32
  }
  func.func @transform_21(%arg0: i32) -> (i32, i32) {
    %c0_i32 = arith.constant 0 : i32
    %c0_i32_0 = arith.constant 0 : i32
    %c0_i32_1 = arith.constant 0 : i32
    return %c0_i32, %c0_i32_0 : i32, i32
  }
  func.func @transform_22(%arg0: i32) -> (i32, i32) {
    %c0_i32 = arith.constant 0 : i32
    %c0_i32_0 = arith.constant 0 : i32
    return %arg0, %c0_i32 : i32, i32
  }
}

module attributes {stable_mosaic.version = 11 : i64} {
  func.func @_fused_vae_kernel(%arg0: i32, %arg1: memref<8x32xf32, #tpu.memory_space<vmem>>, %arg2: memref<8x64xf32, #tpu.memory_space<vmem>>, %arg3: memref<8x4xf32, #tpu.memory_space<vmem>>, %arg4: memref<32x128xf32, #tpu.memory_space<vmem>>, %arg5: memref<64x128xf32, #tpu.memory_space<vmem>>, %arg6: memref<4x128xf32, #tpu.memory_space<vmem>>, %arg7: memref<1x128xf32, #tpu.memory_space<vmem>>, %arg8: memref<128x128xf32, #tpu.memory_space<vmem>>, %arg9: memref<1x128xf32, #tpu.memory_space<vmem>>, %arg10: memref<128x128xf32, #tpu.memory_space<vmem>>, %arg11: memref<1x128xf32, #tpu.memory_space<vmem>>, %arg12: memref<128x256xf32, #tpu.memory_space<vmem>>, %arg13: memref<4x256xf32, #tpu.memory_space<vmem>>, %arg14: memref<1x256xf32, #tpu.memory_space<vmem>>, %arg15: memref<128x128xf32, #tpu.memory_space<vmem>>, %arg16: memref<1x128xf32, #tpu.memory_space<vmem>>, %arg17: memref<128x128xf32, #tpu.memory_space<vmem>>, %arg18: memref<1x128xf32, #tpu.memory_space<vmem>>, %arg19: memref<128x128xf32, #tpu.memory_space<vmem>>, %arg20: memref<1x128xf32, #tpu.memory_space<vmem>>, %arg21: memref<128x128xf32, #tpu.memory_space<vmem>>, %arg22: memref<1x128xf32, #tpu.memory_space<vmem>>, %arg23: memref<8x384xf32, #tpu.memory_space<vmem>>) attributes {dimension_semantics = [#tpu.dimension_semantics<parallel>], iteration_bounds = array<i64: 2>, scalar_prefetch = 0 : i64, scratch_operands = 0 : i64, tpu.core_type = #tpu.core_type<tc>, window_params = [{transform_indices = @transform_0, window_bounds = array<i64: 8, 32>}, {transform_indices = @transform_1, window_bounds = array<i64: 8, 64>}, {transform_indices = @transform_2, window_bounds = array<i64: 8, 4>}, {pipeline_mode = #tpu.pipeline_mode<synchronous>, transform_indices = @transform_3, window_bounds = array<i64: 32, 128>}, {pipeline_mode = #tpu.pipeline_mode<synchronous>, transform_indices = @transform_4, window_bounds = array<i64: 64, 128>}, {pipeline_mode = #tpu.pipeline_mode<synchronous>, transform_indices = @transform_5, window_bounds = array<i64: 4, 128>}, {pipeline_mode = #tpu.pipeline_mode<synchronous>, transform_indices = @transform_6, window_bounds = array<i64: 1, 128>}, {pipeline_mode = #tpu.pipeline_mode<synchronous>, transform_indices = @transform_7, window_bounds = array<i64: 128, 128>}, {pipeline_mode = #tpu.pipeline_mode<synchronous>, transform_indices = @transform_8, window_bounds = array<i64: 1, 128>}, {pipeline_mode = #tpu.pipeline_mode<synchronous>, transform_indices = @transform_9, window_bounds = array<i64: 128, 128>}, {pipeline_mode = #tpu.pipeline_mode<synchronous>, transform_indices = @transform_10, window_bounds = array<i64: 1, 128>}, {pipeline_mode = #tpu.pipeline_mode<synchronous>, transform_indices = @transform_11, window_bounds = array<i64: 128, 256>}, {pipeline_mode = #tpu.pipeline_mode<synchronous>, transform_indices = @transform_12, window_bounds = array<i64: 4, 256>}, {pipeline_mode = #tpu.pipeline_mode<synchronous>, transform_indices = @transform_13, window_bounds = array<i64: 1, 256>}, {pipeline_mode = #tpu.pipeline_mode<synchronous>, transform_indices = @transform_14, window_bounds = array<i64: 128, 128>}, {pipeline_mode = #tpu.pipeline_mode<synchronous>, transform_indices = @transform_15, window_bounds = array<i64: 1, 128>}, {pipeline_mode = #tpu.pipeline_mode<synchronous>, transform_indices = @transform_16, window_bounds = array<i64: 128, 128>}, {pipeline_mode = #tpu.pipeline_mode<synchronous>, transform_indices = @transform_17, window_bounds = array<i64: 1, 128>}, {pipeline_mode = #tpu.pipeline_mode<synchronous>, transform_indices = @transform_18, window_bounds = array<i64: 128, 128>}, {pipeline_mode = #tpu.pipeline_mode<synchronous>, transform_indices = @transform_19, window_bounds = array<i64: 1, 128>}, {pipeline_mode = #tpu.pipeline_mode<synchronous>, transform_indices = @transform_20, window_bounds = array<i64: 128, 128>}, {pipeline_mode = #tpu.pipeline_mode<synchronous>, transform_indices = @transform_21, window_bounds = array<i64: 1, 128>}, {transform_indices = @transform_22, window_bounds = array<i64: 8, 384>}]} {
    %c0 = arith.constant 0 : index
    %c0_0 = arith.constant 0 : index
    %0 = vector.load %arg1[%c0, %c0_0] : memref<8x32xf32, #tpu.memory_space<vmem>>, vector<8x32xf32>
    %c0_1 = arith.constant 0 : index
    %c0_2 = arith.constant 0 : index
    %1 = vector.load %arg2[%c0_1, %c0_2] : memref<8x64xf32, #tpu.memory_space<vmem>>, vector<8x64xf32>
    %c0_3 = arith.constant 0 : index
    %c0_4 = arith.constant 0 : index
    %2 = vector.load %arg3[%c0_3, %c0_4] : memref<8x4xf32, #tpu.memory_space<vmem>>, vector<8x4xf32>
    %3 = tpu.weird %0 : vector<8x32xf32> -> vector<8x32xi1>
    %cst = arith.constant dense<true> : vector<8x32xi1>
    %4 = arith.xori %3, %cst : vector<8x32xi1>
    %cst_5 = arith.constant 0.000000e+00 : f32
    %5 = vector.broadcast %cst_5 : f32 to vector<8x32xf32>
    %6 = arith.select %4, %0, %5 : vector<8x32xi1>, vector<8x32xf32>
    %7 = tpu.weird %1 : vector<8x64xf32> -> vector<8x64xi1>
    %cst_6 = arith.constant dense<true> : vector<8x64xi1>
    %8 = arith.xori %7, %cst_6 : vector<8x64xi1>
    %cst_7 = arith.constant 0.000000e+00 : f32
    %9 = vector.broadcast %cst_7 : f32 to vector<8x64xf32>
    %10 = arith.select %8, %1, %9 : vector<8x64xi1>, vector<8x64xf32>
    %11 = tpu.weird %2 : vector<8x4xf32> -> vector<8x4xi1>
    %cst_8 = arith.constant dense<true> : vector<8x4xi1>
    %12 = arith.xori %11, %cst_8 : vector<8x4xi1>
    %cst_9 = arith.constant 0.000000e+00 : f32
    %13 = vector.broadcast %cst_9 : f32 to vector<8x4xf32>
    %14 = arith.select %12, %2, %13 : vector<8x4xi1>, vector<8x4xf32>
    %c0_10 = arith.constant 0 : index
    %c0_11 = arith.constant 0 : index
    %15 = vector.load %arg4[%c0_10, %c0_11] : memref<32x128xf32, #tpu.memory_space<vmem>>, vector<32x128xf32>
    %cst_12 = arith.constant dense<0.000000e+00> : vector<8x128xf32>
    %16 = tpu.matmul %6, %15, %cst_12 {dimension_numbers = #tpu.dot_dimension_numbers<[1], [0], [0], [1], [0, 0, 1, 1], [], []>} : vector<8x32xf32>, vector<32x128xf32>, vector<8x128xf32> -> vector<8x128xf32>
    %c0_13 = arith.constant 0 : index
    %c0_14 = arith.constant 0 : index
    %17 = vector.load %arg5[%c0_13, %c0_14] : memref<64x128xf32, #tpu.memory_space<vmem>>, vector<64x128xf32>
    %cst_15 = arith.constant dense<0.000000e+00> : vector<8x128xf32>
    %18 = tpu.matmul %10, %17, %cst_15 {dimension_numbers = #tpu.dot_dimension_numbers<[1], [0], [0], [1], [0, 0, 1, 1], [], []>} : vector<8x64xf32>, vector<64x128xf32>, vector<8x128xf32> -> vector<8x128xf32>
    %19 = arith.addf %16, %18 : vector<8x128xf32>
    %c0_16 = arith.constant 0 : index
    %c0_17 = arith.constant 0 : index
    %20 = vector.load %arg6[%c0_16, %c0_17] : memref<4x128xf32, #tpu.memory_space<vmem>>, vector<4x128xf32>
    %cst_18 = arith.constant dense<0.000000e+00> : vector<8x128xf32>
    %21 = tpu.matmul %14, %20, %cst_18 {dimension_numbers = #tpu.dot_dimension_numbers<[1], [0], [0], [1], [0, 0, 1, 1], [], []>} : vector<8x4xf32>, vector<4x128xf32>, vector<8x128xf32> -> vector<8x128xf32>
    %22 = arith.addf %19, %21 : vector<8x128xf32>
    %c0_19 = arith.constant 0 : index
    %c0_20 = arith.constant 0 : index
    %23 = vector.load %arg7[%c0_19, %c0_20] : memref<1x128xf32, #tpu.memory_space<vmem>>, vector<1x128xf32>
    %24 = vector.broadcast %23 : vector<1x128xf32> to vector<8x128xf32>
    %25 = arith.addf %22, %24 : vector<8x128xf32>
    %cst_21 = arith.constant 0.000000e+00 : f32
    %26 = vector.broadcast %cst_21 : f32 to vector<8x128xf32>
    %27 = arith.maximumf %25, %26 : vector<8x128xf32>
    %c0_22 = arith.constant 0 : index
    %c0_23 = arith.constant 0 : index
    %28 = vector.load %arg8[%c0_22, %c0_23] : memref<128x128xf32, #tpu.memory_space<vmem>>, vector<128x128xf32>
    %cst_24 = arith.constant dense<0.000000e+00> : vector<8x128xf32>
    %29 = tpu.matmul %27, %28, %cst_24 {dimension_numbers = #tpu.dot_dimension_numbers<[1], [0], [0], [1], [0, 0, 1, 1], [], []>} : vector<8x128xf32>, vector<128x128xf32>, vector<8x128xf32> -> vector<8x128xf32>
    %c0_25 = arith.constant 0 : index
    %c0_26 = arith.constant 0 : index
    %30 = vector.load %arg9[%c0_25, %c0_26] : memref<1x128xf32, #tpu.memory_space<vmem>>, vector<1x128xf32>
    %31 = vector.broadcast %30 : vector<1x128xf32> to vector<8x128xf32>
    %32 = arith.addf %29, %31 : vector<8x128xf32>
    %cst_27 = arith.constant 0.000000e+00 : f32
    %33 = vector.broadcast %cst_27 : f32 to vector<8x128xf32>
    %34 = arith.maximumf %32, %33 : vector<8x128xf32>
    %c0_28 = arith.constant 0 : index
    %c0_29 = arith.constant 0 : index
    %35 = vector.load %arg10[%c0_28, %c0_29] : memref<128x128xf32, #tpu.memory_space<vmem>>, vector<128x128xf32>
    %cst_30 = arith.constant dense<0.000000e+00> : vector<8x128xf32>
    %36 = tpu.matmul %34, %35, %cst_30 {dimension_numbers = #tpu.dot_dimension_numbers<[1], [0], [0], [1], [0, 0, 1, 1], [], []>} : vector<8x128xf32>, vector<128x128xf32>, vector<8x128xf32> -> vector<8x128xf32>
    %c0_31 = arith.constant 0 : index
    %c0_32 = arith.constant 0 : index
    %37 = vector.load %arg11[%c0_31, %c0_32] : memref<1x128xf32, #tpu.memory_space<vmem>>, vector<1x128xf32>
    %38 = vector.broadcast %37 : vector<1x128xf32> to vector<8x128xf32>
    %39 = arith.addf %36, %38 : vector<8x128xf32>
    %c0_33 = arith.constant 0 : index
    %c0_34 = arith.constant 0 : index
    %40 = vector.load %arg12[%c0_33, %c0_34] : memref<128x256xf32, #tpu.memory_space<vmem>>, vector<128x256xf32>
    %cst_35 = arith.constant dense<0.000000e+00> : vector<8x256xf32>
    %41 = tpu.matmul %34, %40, %cst_35 {dimension_numbers = #tpu.dot_dimension_numbers<[1], [0], [0], [1], [0, 0, 1, 1], [], []>} : vector<8x128xf32>, vector<128x256xf32>, vector<8x256xf32> -> vector<8x256xf32>
    %c0_36 = arith.constant 0 : index
    %c0_37 = arith.constant 0 : index
    %42 = vector.load %arg13[%c0_36, %c0_37] : memref<4x256xf32, #tpu.memory_space<vmem>>, vector<4x256xf32>
    %cst_38 = arith.constant dense<0.000000e+00> : vector<8x256xf32>
    %43 = tpu.matmul %2, %42, %cst_38 {dimension_numbers = #tpu.dot_dimension_numbers<[1], [0], [0], [1], [0, 0, 1, 1], [], []>} : vector<8x4xf32>, vector<4x256xf32>, vector<8x256xf32> -> vector<8x256xf32>
    %44 = arith.addf %41, %43 : vector<8x256xf32>
    %c0_39 = arith.constant 0 : index
    %c0_40 = arith.constant 0 : index
    %45 = vector.load %arg14[%c0_39, %c0_40] : memref<1x256xf32, #tpu.memory_space<vmem>>, vector<1x256xf32>
    %46 = vector.broadcast %45 : vector<1x256xf32> to vector<8x256xf32>
    %47 = arith.addf %44, %46 : vector<8x256xf32>
    %cst_41 = arith.constant 0.000000e+00 : f32
    %48 = vector.broadcast %cst_41 : f32 to vector<8x256xf32>
    %49 = arith.maximumf %47, %48 : vector<8x256xf32>
    %50 = vector.extract_strided_slice %49 {offsets = [0, 0], sizes = [8, 128], strides = [1, 1]} : vector<8x256xf32> to vector<8x128xf32>
    %c0_42 = arith.constant 0 : index
    %c0_43 = arith.constant 0 : index
    %51 = vector.load %arg15[%c0_42, %c0_43] : memref<128x128xf32, #tpu.memory_space<vmem>>, vector<128x128xf32>
    %cst_44 = arith.constant dense<0.000000e+00> : vector<8x128xf32>
    %52 = tpu.matmul %50, %51, %cst_44 {dimension_numbers = #tpu.dot_dimension_numbers<[1], [0], [0], [1], [0, 0, 1, 1], [], []>} : vector<8x128xf32>, vector<128x128xf32>, vector<8x128xf32> -> vector<8x128xf32>
    %c0_45 = arith.constant 0 : index
    %c0_46 = arith.constant 0 : index
    %53 = vector.load %arg16[%c0_45, %c0_46] : memref<1x128xf32, #tpu.memory_space<vmem>>, vector<1x128xf32>
    %54 = vector.broadcast %53 : vector<1x128xf32> to vector<8x128xf32>
    %55 = arith.addf %52, %54 : vector<8x128xf32>
    %cst_47 = arith.constant 0.000000e+00 : f32
    %56 = vector.broadcast %cst_47 : f32 to vector<8x128xf32>
    %57 = arith.maximumf %55, %56 : vector<8x128xf32>
    %c0_48 = arith.constant 0 : index
    %c0_49 = arith.constant 0 : index
    %58 = vector.load %arg17[%c0_48, %c0_49] : memref<128x128xf32, #tpu.memory_space<vmem>>, vector<128x128xf32>
    %cst_50 = arith.constant dense<0.000000e+00> : vector<8x128xf32>
    %59 = tpu.matmul %57, %58, %cst_50 {dimension_numbers = #tpu.dot_dimension_numbers<[1], [0], [0], [1], [0, 0, 1, 1], [], []>} : vector<8x128xf32>, vector<128x128xf32>, vector<8x128xf32> -> vector<8x128xf32>
    %c0_51 = arith.constant 0 : index
    %c0_52 = arith.constant 0 : index
    %60 = vector.load %arg18[%c0_51, %c0_52] : memref<1x128xf32, #tpu.memory_space<vmem>>, vector<1x128xf32>
    %61 = vector.broadcast %60 : vector<1x128xf32> to vector<8x128xf32>
    %62 = arith.addf %59, %61 : vector<8x128xf32>
    %63 = vector.extract_strided_slice %49 {offsets = [0, 128], sizes = [8, 128], strides = [1, 1]} : vector<8x256xf32> to vector<8x128xf32>
    %c0_53 = arith.constant 0 : index
    %c0_54 = arith.constant 0 : index
    %64 = vector.load %arg19[%c0_53, %c0_54] : memref<128x128xf32, #tpu.memory_space<vmem>>, vector<128x128xf32>
    %cst_55 = arith.constant dense<0.000000e+00> : vector<8x128xf32>
    %65 = tpu.matmul %63, %64, %cst_55 {dimension_numbers = #tpu.dot_dimension_numbers<[1], [0], [0], [1], [0, 0, 1, 1], [], []>} : vector<8x128xf32>, vector<128x128xf32>, vector<8x128xf32> -> vector<8x128xf32>
    %c0_56 = arith.constant 0 : index
    %c0_57 = arith.constant 0 : index
    %66 = vector.load %arg20[%c0_56, %c0_57] : memref<1x128xf32, #tpu.memory_space<vmem>>, vector<1x128xf32>
    %67 = vector.broadcast %66 : vector<1x128xf32> to vector<8x128xf32>
    %68 = arith.addf %65, %67 : vector<8x128xf32>
    %cst_58 = arith.constant 0.000000e+00 : f32
    %69 = vector.broadcast %cst_58 : f32 to vector<8x128xf32>
    %70 = arith.maximumf %68, %69 : vector<8x128xf32>
    %c0_59 = arith.constant 0 : index
    %c0_60 = arith.constant 0 : index
    %71 = vector.load %arg21[%c0_59, %c0_60] : memref<128x128xf32, #tpu.memory_space<vmem>>, vector<128x128xf32>
    %cst_61 = arith.constant dense<0.000000e+00> : vector<8x128xf32>
    %72 = tpu.matmul %70, %71, %cst_61 {dimension_numbers = #tpu.dot_dimension_numbers<[1], [0], [0], [1], [0, 0, 1, 1], [], []>} : vector<8x128xf32>, vector<128x128xf32>, vector<8x128xf32> -> vector<8x128xf32>
    %c0_62 = arith.constant 0 : index
    %c0_63 = arith.constant 0 : index
    %73 = vector.load %arg22[%c0_62, %c0_63] : memref<1x128xf32, #tpu.memory_space<vmem>>, vector<1x128xf32>
    %74 = vector.broadcast %73 : vector<1x128xf32> to vector<8x128xf32>
    %75 = arith.addf %72, %74 : vector<8x128xf32>
    %c0_64 = arith.constant 0 : index
    %c0_65 = arith.constant 0 : index
    %76 = vector.load %arg23[%c0_64, %c0_65] : memref<8x384xf32, #tpu.memory_space<vmem>>, vector<8x128xf32>
    tpu.vector_store %arg23[%c0_64, %c0_65], %39 {strides = array<i32>} : memref<8x384xf32, #tpu.memory_space<vmem>>, vector<8x128xf32>,
    %c0_66 = arith.constant 0 : index
    %c128 = arith.constant 128 : index
    %77 = vector.load %arg23[%c0_66, %c128] : memref<8x384xf32, #tpu.memory_space<vmem>>, vector<8x128xf32>
    tpu.vector_store %arg23[%c0_66, %c128], %62 {strides = array<i32>} : memref<8x384xf32, #tpu.memory_space<vmem>>, vector<8x128xf32>,
    %c0_67 = arith.constant 0 : index
    %c256 = arith.constant 256 : index
    %78 = vector.load %arg23[%c0_67, %c256] : memref<8x384xf32, #tpu.memory_space<vmem>>, vector<8x128xf32>
    tpu.vector_store %arg23[%c0_67, %c256], %75 {strides = array<i32>} : memref<8x384xf32, #tpu.memory_space<vmem>>, vector<8x128xf32>,
    return
  }
  func.func @transform_0(%arg0: i32) -> (i32, i32) {
    %c0_i32 = arith.constant 0 : i32
    %c0_i32_0 = arith.constant 0 : i32
    return %arg0, %c0_i32 : i32, i32
  }
  func.func @transform_1(%arg0: i32) -> (i32, i32) {
    %c0_i32 = arith.constant 0 : i32
    %c0_i32_0 = arith.constant 0 : i32
    return %arg0, %c0_i32 : i32, i32
  }
  func.func @transform_2(%arg0: i32) -> (i32, i32) {
    %c0_i32 = arith.constant 0 : i32
    %c0_i32_0 = arith.constant 0 : i32
    return %arg0, %c0_i32 : i32, i32
  }
  func.func @transform_3(%arg0: i32) -> (i32, i32) {
    %c0_i32 = arith.constant 0 : i32
    %c0_i32_0 = arith.constant 0 : i32
    %c0_i32_1 = arith.constant 0 : i32
    return %c0_i32, %c0_i32_0 : i32, i32
  }
  func.func @transform_4(%arg0: i32) -> (i32, i32) {
    %c0_i32 = arith.constant 0 : i32
    %c0_i32_0 = arith.constant 0 : i32
    %c0_i32_1 = arith.constant 0 : i32
    return %c0_i32, %c0_i32_0 : i32, i32
  }
  func.func @transform_5(%arg0: i32) -> (i32, i32) {
    %c0_i32 = arith.constant 0 : i32
    %c0_i32_0 = arith.constant 0 : i32
    %c0_i32_1 = arith.constant 0 : i32
    return %c0_i32, %c0_i32_0 : i32, i32
  }
  func.func @transform_6(%arg0: i32) -> (i32, i32) {
    %c0_i32 = arith.constant 0 : i32
    %c0_i32_0 = arith.constant 0 : i32
    %c0_i32_1 = arith.constant 0 : i32
    return %c0_i32, %c0_i32_0 : i32, i32
  }
  func.func @transform_7(%arg0: i32) -> (i32, i32) {
    %c0_i32 = arith.constant 0 : i32
    %c0_i32_0 = arith.constant 0 : i32
    %c0_i32_1 = arith.constant 0 : i32
    return %c0_i32, %c0_i32_0 : i32, i32
  }
  func.func @transform_8(%arg0: i32) -> (i32, i32) {
    %c0_i32 = arith.constant 0 : i32
    %c0_i32_0 = arith.constant 0 : i32
    %c0_i32_1 = arith.constant 0 : i32
    return %c0_i32, %c0_i32_0 : i32, i32
  }
  func.func @transform_9(%arg0: i32) -> (i32, i32) {
    %c0_i32 = arith.constant 0 : i32
    %c0_i32_0 = arith.constant 0 : i32
    %c0_i32_1 = arith.constant 0 : i32
    return %c0_i32, %c0_i32_0 : i32, i32
  }
  func.func @transform_10(%arg0: i32) -> (i32, i32) {
    %c0_i32 = arith.constant 0 : i32
    %c0_i32_0 = arith.constant 0 : i32
    %c0_i32_1 = arith.constant 0 : i32
    return %c0_i32, %c0_i32_0 : i32, i32
  }
  func.func @transform_11(%arg0: i32) -> (i32, i32) {
    %c0_i32 = arith.constant 0 : i32
    %c0_i32_0 = arith.constant 0 : i32
    %c0_i32_1 = arith.constant 0 : i32
    return %c0_i32, %c0_i32_0 : i32, i32
  }
  func.func @transform_12(%arg0: i32) -> (i32, i32) {
    %c0_i32 = arith.constant 0 : i32
    %c0_i32_0 = arith.constant 0 : i32
    %c0_i32_1 = arith.constant 0 : i32
    return %c0_i32, %c0_i32_0 : i32, i32
  }
  func.func @transform_13(%arg0: i32) -> (i32, i32) {
    %c0_i32 = arith.constant 0 : i32
    %c0_i32_0 = arith.constant 0 : i32
    %c0_i32_1 = arith.constant 0 : i32
    return %c0_i32, %c0_i32_0 : i32, i32
  }
  func.func @transform_14(%arg0: i32) -> (i32, i32) {
    %c0_i32 = arith.constant 0 : i32
    %c0_i32_0 = arith.constant 0 : i32
    %c0_i32_1 = arith.constant 0 : i32
    return %c0_i32, %c0_i32_0 : i32, i32
  }
  func.func @transform_15(%arg0: i32) -> (i32, i32) {
    %c0_i32 = arith.constant 0 : i32
    %c0_i32_0 = arith.constant 0 : i32
    %c0_i32_1 = arith.constant 0 : i32
    return %c0_i32, %c0_i32_0 : i32, i32
  }
  func.func @transform_16(%arg0: i32) -> (i32, i32) {
    %c0_i32 = arith.constant 0 : i32
    %c0_i32_0 = arith.constant 0 : i32
    %c0_i32_1 = arith.constant 0 : i32
    return %c0_i32, %c0_i32_0 : i32, i32
  }
  func.func @transform_17(%arg0: i32) -> (i32, i32) {
    %c0_i32 = arith.constant 0 : i32
    %c0_i32_0 = arith.constant 0 : i32
    %c0_i32_1 = arith.constant 0 : i32
    return %c0_i32, %c0_i32_0 : i32, i32
  }
  func.func @transform_18(%arg0: i32) -> (i32, i32) {
    %c0_i32 = arith.constant 0 : i32
    %c0_i32_0 = arith.constant 0 : i32
    %c0_i32_1 = arith.constant 0 : i32
    return %c0_i32, %c0_i32_0 : i32, i32
  }
  func.func @transform_19(%arg0: i32) -> (i32, i32) {
    %c0_i32 = arith.constant 0 : i32
    %c0_i32_0 = arith.constant 0 : i32
    %c0_i32_1 = arith.constant 0 : i32
    return %c0_i32, %c0_i32_0 : i32, i32
  }
  func.func @transform_20(%arg0: i32) -> (i32, i32) {
    %c0_i32 = arith.constant 0 : i32
    %c0_i32_0 = arith.constant 0 : i32
    %c0_i32_1 = arith.constant 0 : i32
    return %c0_i32, %c0_i32_0 : i32, i32
  }
  func.func @transform_21(%arg0: i32) -> (i32, i32) {
    %c0_i32 = arith.constant 0 : i32
    %c0_i32_0 = arith.constant 0 : i32
    %c0_i32_1 = arith.constant 0 : i32
    return %c0_i32, %c0_i32_0 : i32, i32
  }
  func.func @transform_22(%arg0: i32) -> (i32, i32) {
    %c0_i32 = arith.constant 0 : i32
    %c0_i32_0 = arith.constant 0 : i32
    return %arg0, %c0_i32 : i32, i32
  }
}

</mosaic_0001>

<bundles_post_ra>
// kernel: _fused_forward_impl.1
= control target key start
LH: loop header
LB: loop body
LE: loop exit
PB: predicated region body
PF: predicated region fallthrough
CT: control target
= control target key end

     0   :  { %s4022_s0 = inlined_call_operand.vmem [shape: f32[16,32], index: 0, kind: input, shape index: {}]   ;;  %s4023_s1 = inlined_call_operand.hbm [shape: f32[16,64], index: 1, kind: input, shape index: {}]   ;;  %s4024_s2 = inlined_call_operand.vmem [shape: f32[16,4], index: 2, kind: input, shape index: {}]   ;;  %s4025_s3 = inlined_call_operand.vmem [shape: f32[32,128], index: 3, kind: input, shape index: {}]   ;;  %s4026_s4 = inlined_call_operand.hbm [shape: f32[64,128], index: 4, kind: input, shape index: {}]   ;;  %s4027_s5 = inlined_call_operand.vmem [shape: f32[4,128], index: 5, kind: input, shape index: {}]   ;;  %s4028_s6 = inlined_call_operand.vmem [shape: f32[1,128], index: 6, kind: input, shape index: {}]   ;;  %s4029_s7 = inlined_call_operand.hbm [shape: f32[128,128], index: 7, kind: input, shape index: {}]   ;;  %s4030_s8 = inlined_call_operand.hbm [shape: f32[1,128], index: 8, kind: input, shape index: {}]   ;;  %s4031_s9 = inlined_call_operand.hbm [shape: f32[128,128], index: 9, kind: input, shape index: {}]   ;;  %s4032_s10 = inlined_call_operand.hbm [shape: f32[1,128], index: 10, kind: input, shape index: {}]   ;;  %s4033_s11 = inlined_call_operand.hbm [shape: f32[128,256], index: 11, kind: input, shape index: {}]   ;;  %s4034_s12 = inlined_call_operand.vmem [shape: f32[4,256], index: 12, kind: input, shape index: {}]   ;;  %s4035_s13 = inlined_call_operand.vmem [shape: f32[1,256], index: 13, kind: input, shape index: {}]   ;;  %s4036_s14 = inlined_call_operand.hbm [shape: f32[128,128], index: 14, kind: input, shape index: {}]   ;;  %s4037_s15 = inlined_call_operand.vmem [shape: f32[1,128], index: 15, kind: input, shape index: {}]   ;;  %s4038_s16 = inlined_call_operand.hbm [shape: f32[128,128], index: 16, kind: input, shape index: {}]   ;;  %s4039_s17 = inlined_call_operand.vmem [shape: f32[1,128], index: 17, kind: input, shape index: {}]   ;;  %s4040_s18 = inlined_call_operand.hbm [shape: f32[128,128], index: 18, kind: input, shape index: {}]   ;;  %s4041_s19 = inlined_call_operand.hbm [shape: f32[1,128], index: 19, kind: input, shape index: {}]   ;;  %s4042_s20 = inlined_call_operand.hbm [shape: f32[128,128], index: 20, kind: input, shape index: {}]   ;;  %s4043_s21 = inlined_call_operand.hbm [shape: f32[1,128], index: 21, kind: input, shape index: {}]   ;;  %s4044_s22 = inlined_call_operand.vmem [shape: f32[16,384], index: 22, kind: output, shape index: {}]  }
   0x1   :  { %4057 = sst [smem:[#allocation32_spill]] %s4022_s0 }
   0x2   :  { %4058 = sst [smem:[#allocation33_spill]] %s4023_s1 }
   0x3   :  { %4059 = sst [smem:[#allocation34_spill]] %s4024_s2 }
   0x4   :  { %4060 = sst [smem:[#allocation35_spill]] %s4025_s3 }
   0x5   :  { %4061 = sst [smem:[#allocation36_spill]] %s4026_s4 }
   0x6   :  { %4062 = sst [smem:[#allocation37_spill]] %s4027_s5 }
   0x7   :  { %4063 = sst [smem:[#allocation38_spill]] %s4028_s6 }
   0x8   :  { %4064 = sst [smem:[#allocation39_spill]] %s4029_s7 }
   0x9   :  { %4065 = sst [smem:[#allocation40_spill]] %s4030_s8 }
   0xa   :  { %4066 = sst [smem:[#allocation41_spill]] %s4034_s12 }
   0xb   :  { %4067 = sst [smem:[#allocation42_spill]] %s4035_s13 }
   0xc   :  { %4068 = sst [smem:[#allocation43_spill]] %s4037_s15 }
   0xd   :  { %4069 = sst [smem:[#allocation44_spill]] %s4039_s17 }
   0xe   :  { %4070 = sst [smem:[#allocation45_spill]] %s4044_s22 }
   0xf   :  { %27 = vsyncpa [#allocation3], 0 }
  0x10   :  { %29 = vsyncpa [#allocation3 + $0x1], 0 }
  0x11   :  { %30 = vsyncpa [#allocation5], 0 }
  0x12   :  { %31 = vsyncpa [#allocation8], 0 }
  0x13   :  { %32 = vsyncpa [#allocation11], 0 }
  0x14   :  { %33 = vsyncpa [#allocation14], 0 }
  0x15   :  { %34 = vsyncpa [#allocation17], 0 }
  0x16   :  { %35 = vsyncpa [#allocation20], 0  ;;  %s3472_s3 = smov 0   ;;  %s3474_s28 = smov 0  }
  0x17   :  { %s3476_s29 = smov 0   ;;  %s3478_s30 = smov 0  }
  0x18 LB: > { %4071 = sst [smem:[#allocation29_spill]] %s3322_s3  ;;  %s3336_s4 = smov [#allocation4]   ;;  %s3334_s30 = sphi %s3478_s30, %s4116_s30   ;;  %s3330_s29 = sphi %s3476_s29, %s4115_s29   ;;  %s3326_s28 = sphi %s3474_s28, %s4114_s28   ;;  %s3322_s3 = sphi %s3472_s3, %s4113_s3  }
  0x19   : > { %s564_s0 = sshll.u32 %s3336_s4, 4  ;;  %s3493_s23 = sadd.s32 4294967295, %s3334_s30   ;;  %s3498_s0 = int_to_ptr.vmem [resolvable:$true] %s564_s0 }
  0x1a   : > { %4072 = sst [smem:[#allocation30_spill]] %s3493_s23  ;;  %p2132_p0 = scmp.ge.s32.totalorder %s3334_s30, 1 }
  0x1b   : > { %p4053_p1 = scmp.eq.s32.totalorder %s3493_s23, 0  ;;  %p549_p2 = scmp.lt.s32.totalorder %s3334_s30, 3 }
  0x1c   : > { %s3337_s5 = smov [#allocation7]   ;;  %s3338_s25 = smov [#allocation10]  }
  0x1d   : > { %p3500_p3 = pnand %p2132_p0, %p549_p2  ;;  %s597_s24 = sshll.u32 %s3337_s5, 4  ;;  %s3512_s24 = int_to_ptr.vmem [resolvable:$true] %s597_s24 }
  0x1e   : > { %s621_s26 = sshll.u32 %s3338_s25, 4  ;;  %s4076_s4 = sld [smem:[#allocation36_spill]]  ;;  %s3514_s26 = int_to_ptr.vmem [resolvable:$true] %s621_s26 }
  0x1f   : > { %s4073_s1 = scalar_select %p3500_p3, 1, 0 }
  0x20   : > { %p2791_p4 = pneg %p3500_p3 }
  0x21   : > { %4074 = sst [smem:[#allocation31_spill]] %s4073_s1 }
  0x22   : > { %p3508_p5 = pnand %p2791_p4, %p4053_p1 }
  0x24   : > { %s2910_s17 = scalar_lea.hbm %s4076_s4, 1024  ;;  %p3524_p7 = pneg %p3508_p5 }
  0x25   : > { %p2911_p6 = scmp.ne.s32.totalorder %s4076_s4, %s2910_s17  ;;  %p2917_p10 = scmp.lt.u32.totalorder %s2910_s17, %s4076_s4 }
  0x27   : > { %p2913_p8 = pnand %p3524_p7, %p2911_p6 }
  0x29   : > { %p2914_p9 = pneg %p2913_p8 }
  0x2b   : > { %p2919_p11 = pnand %p2917_p10, %p2914_p9 }
  0x2d   : > { %2922 = shalt.err (!%p2919_p11)
}
  0x2e   : > { %s2923_s15 = scalar_lea.vmem %s3498_s0, 1024  ;;  %p2931_p2 = scmp.lt.s32.totalorder %s3498_s0, %s3498_s0 }
  0x2f   : > { %p2924_p12 = scmp.ne.s32.totalorder %s3498_s0, %s2923_s15  ;;  %p2932_p4 = scmp.lt.s32.totalorder %s2923_s15, %s2923_s15 }
  0x31   : > { %p2926_p13 = pnand %p2924_p12, %p3524_p7  ;;  %p2933_p6 = por %p2932_p4, %p2931_p2 }
  0x33   : > { %p2927_p0 = pneg %p2926_p13 }
  0x35   : > { %p2934_p8 = pnand %p2933_p6, %p2927_p0 }
  0x37   : > { %2937 = shalt.err (!%p2934_p8)
}
  0x38   : > { %s4051_s22 = smov 128   ;;  %s4056_s13 = smov 8  }
  0x39   : > { %2794 = dma.hbm_to_vmem [thread:$0]  (!%p3508_p5), %s4076_s4, 1024, %s3498_s0, [#allocation5], %s4051_s22, %s4051_s22, %s4056_s13  }
  0x3a   : > { %s4078_s8 = sld [smem:[#allocation40_spill]] }
  0x40   : > { %s2938_s15 = scalar_lea.hbm %s4078_s8, 16 }
  0x41   : > { %p2939_p9 = scmp.ne.s32.totalorder %s4078_s8, %s2938_s15  ;;  %p2945_p12 = scmp.lt.u32.totalorder %s2938_s15, %s4078_s8 }
  0x43   : > { %p2941_p10 = pnand %p2939_p9, %p3524_p7 }
  0x45   : > { %p2942_p11 = pneg %p2941_p10 }
  0x47   : > { %p2947_p13 = pnand %p2945_p12, %p2942_p11 }
  0x49   : > { %2950 = shalt.err (!%p2947_p13)
}
  0x4a   : > { %s2951_s0 = scalar_lea.vmem %s3512_s24, 16  ;;  %s2958_s12 = scalar_lea.vmem %s3512_s24, 32 }
  0x4b   : > { %p2952_p0 = scmp.ne.s32.totalorder %s3512_s24, %s2951_s0  ;;  %p2959_p6 = scmp.lt.s32.totalorder %s3512_s24, %s3512_s24 }
  0x4c   : > { %p2960_p8 = scmp.lt.s32.totalorder %s2958_s12, %s2951_s0 }
  0x4d   : > { %p2954_p2 = pnand %p2952_p0, %p3524_p7 }
  0x4e   : > { %p2961_p9 = por %p2960_p8, %p2959_p6 }
  0x4f   : > { %p2955_p4 = pneg %p2954_p2 }
  0x51   : > { %p2962_p10 = pnand %p2961_p9, %p2955_p4 }
  0x53   : > { %2965 = shalt.err (!%p2962_p10)
}
  0x54   : > { %2800 = dma.hbm_to_vmem [thread:$0]  (!%p3508_p5), %s4078_s8, 16, %s3512_s24, [#allocation8]  }
  0x55   : > { %s2966_s2 = scalar_lea.hbm %s4032_s10, 16 }
  0x56   : > { %p2967_p11 = scmp.ne.s32.totalorder %s4032_s10, %s2966_s2  ;;  %p2973_p0 = scmp.lt.u32.totalorder %s2966_s2, %s4032_s10 }
  0x58   : > { %p2969_p12 = pnand %p2967_p11, %p3524_p7 }
  0x5a   : > { %p2970_p13 = pneg %p2969_p12 }
  0x5c   : > { %p2975_p2 = pnand %p2973_p0, %p2970_p13 }
  0x5e   : > { %2978 = shalt.err (!%p2975_p2)
}
  0x5f   : > { %s2979_s24 = scalar_lea.vmem %s3514_s26, 16  ;;  %s2986_s12 = scalar_lea.vmem %s3514_s26, 32 }
  0x60   : > { %p2980_p4 = scmp.ne.s32.totalorder %s3514_s26, %s2979_s24  ;;  %p2987_p9 = scmp.lt.s32.totalorder %s3514_s26, %s3514_s26 }
  0x61   : > { %p2988_p10 = scmp.lt.s32.totalorder %s2986_s12, %s2979_s24 }
  0x62   : > { %p2982_p6 = pnand %p2980_p4, %p3524_p7 }
  0x63   : > { %p2989_p11 = por %p2988_p10, %p2987_p9 }
  0x64   : > { %p2983_p8 = pneg %p2982_p6 }
  0x66   : > { %p2990_p12 = pnand %p2989_p11, %p2983_p8 }
  0x68   : > { %2993 = shalt.err (!%p2990_p12)
}
  0x69   : > { %2806 = dma.hbm_to_vmem [thread:$0]  (!%p3508_p5), %s4032_s10, 16, %s3514_s26, [#allocation11]  }
  0x6a   : > { %s3341_s1 = smov [#allocation13]   ;;  %s3342_s2 = smov [#allocation16]  }
  0x6b   : > { %s650_s17 = sshll.u32 %s3341_s1, 4  ;;  %s682_s27 = sshll.u32 %s3342_s2, 4  ;;  %s651_s17 = int_to_ptr.vmem [resolvable:$true] %s650_s17  ;;  %s683_s27 = int_to_ptr.vmem [resolvable:$true] %s682_s27 }
  0x6c   : > { %s2994_s0 = scalar_lea.hbm %s4036_s14, 2048 }
  0x6d   : > { %p2995_p13 = scmp.ne.s32.totalorder %s4036_s14, %s2994_s0  ;;  %p3001_p4 = scmp.lt.u32.totalorder %s2994_s0, %s4036_s14 }
  0x6f   : > { %p2997_p0 = pnand %p2995_p13, %p3524_p7 }
  0x71   : > { %p2998_p2 = pneg %p2997_p0 }
  0x73   : > { %p3003_p6 = pnand %p3001_p4, %p2998_p2 }
  0x75   : > { %3006 = shalt.err (!%p3003_p6)
}
  0x76   : > { %s3007_s26 = scalar_lea.vmem %s651_s17, 2048  ;;  %p3015_p11 = scmp.lt.s32.totalorder %s651_s17, %s651_s17 }
  0x77   : > { %p3008_p8 = scmp.ne.s32.totalorder %s651_s17, %s3007_s26  ;;  %p3016_p12 = scmp.lt.s32.totalorder %s3007_s26, %s3007_s26 }
  0x79   : > { %p3010_p9 = pnand %p3008_p8, %p3524_p7  ;;  %p3017_p1 = por %p3016_p12, %p3015_p11 }
  0x7b   : > { %p3011_p10 = pneg %p3010_p9 }
  0x7d   : > { %p3018_p3 = pnand %p3017_p1, %p3011_p10 }
  0x7f   : > { %3021 = shalt.err (!%p3018_p3)
}
  0x80   : > { %s4079_s23 = smov 128   ;;  %s3022_s15 = scalar_lea.hbm %s4040_s18, 2048 }
  0x81   : > { %2812 = dma.hbm_to_vmem [thread:$0]  (!%p3508_p5), %s4036_s14, 2048, %s651_s17, [#allocation14], %s4079_s23, %s4079_s23, %s4056_s13  }
  0x82   : > { %p3023_p1 = scmp.ne.s32.totalorder %s4040_s18, %s3022_s15  ;;  %p3029_p0 = scmp.lt.u32.totalorder %s3022_s15, %s4040_s18 }
  0x84   : > { %p3025_p3 = pnand %p3023_p1, %p3524_p7 }
  0x86   : > { %p3026_p13 = pneg %p3025_p3 }
  0x88   : > { %p3031_p2 = pnand %p3029_p0, %p3026_p13 }
  0x8a   : > { %3034 = shalt.err (!%p3031_p2)
}
  0x8b   : > { %s3035_s26 = scalar_lea.vmem %s683_s27, 2048  ;;  %p3043_p9 = scmp.lt.s32.totalorder %s683_s27, %s683_s27 }
  0x8c   : > { %p3036_p4 = scmp.ne.s32.totalorder %s683_s27, %s3035_s26  ;;  %p3044_p10 = scmp.lt.s32.totalorder %s3035_s26, %s3035_s26 }
  0x8e   : > { %p3038_p6 = pnand %p3036_p4, %p3524_p7  ;;  %p3045_p11 = por %p3044_p10, %p3043_p9 }
  0x90   : > { %p3039_p8 = pneg %p3038_p6 }
  0x92   : > { %p3046_p12 = pnand %p3045_p11, %p3039_p8 }
  0x94   : > { %3049 = shalt.err (!%p3046_p12)
}
  0x95   : > { %2818 = dma.hbm_to_vmem [thread:$0]  (!%p3508_p5), %s4040_s18, 2048, %s683_s27, [#allocation17], %s4079_s23, %s4079_s23, %s4056_s13  }
  0x96   : > { %s3343_s1 = smov [#allocation19]   ;;  %s3344_s25 = smov [#allocation6]  }
  0x97   : > { %s706_s2 = sshll.u32 %s3343_s1, 4  ;;  %s583_s15 = sshll.u32 %s3344_s25, 4  ;;  %s707_s2 = int_to_ptr.vmem [resolvable:$true] %s706_s2  ;;  %s584_s15 = int_to_ptr.vmem [resolvable:$true] %s583_s15 }
  0x98   : > { %s3050_s12 = scalar_lea.hbm %s4042_s20, 2048 }
  0x99   : > { %p3051_p1 = scmp.ne.s32.totalorder %s4042_s20, %s3050_s12  ;;  %p3057_p0 = scmp.lt.u32.totalorder %s3050_s12, %s4042_s20 }
  0x9b   : > { %p3053_p3 = pnand %p3051_p1, %p3524_p7 }
  0x9d   : > { %p3054_p13 = pneg %p3053_p3 }
  0x9f   : > { %p3059_p2 = pnand %p3057_p0, %p3054_p13 }
  0xa1   : > { %3062 = shalt.err (!%p3059_p2)
}
  0xa2   : > { %s3063_s27 = scalar_lea.vmem %s707_s2, 2048  ;;  %p3071_p9 = scmp.lt.s32.totalorder %s707_s2, %s707_s2 }
  0xa3   : > { %p3064_p4 = scmp.ne.s32.totalorder %s707_s2, %s3063_s27  ;;  %p3072_p10 = scmp.lt.s32.totalorder %s3063_s27, %s3063_s27 }
  0xa5   : > { %p3066_p6 = pnand %p3064_p4, %p3524_p7  ;;  %p3073_p11 = por %p3072_p10, %p3071_p9 }
  0xa7   : > { %p3067_p8 = pneg %p3066_p6 }
  0xa9   : > { %p3074_p12 = pnand %p3073_p11, %p3067_p8 }
  0xab   : > { %3077 = shalt.err (!%p3074_p12)
}
  0xac   : > { %2824 = dma.hbm_to_vmem [thread:$0]  (!%p3508_p5), %s4042_s20, 2048, %s707_s2, [#allocation20], %s4079_s23, %s4079_s23, %s4056_s13  }
  0xad   : > { %s4080_s7 = sld [smem:[#allocation39_spill]] }
  0xb3   : > { %s3078_s0 = scalar_lea.hbm %s4080_s7, 2048 }
  0xb4   : > { %p3079_p1 = scmp.ne.s32.totalorder %s4080_s7, %s3078_s0  ;;  %p3085_p0 = scmp.lt.u32.totalorder %s3078_s0, %s4080_s7 }
  0xb6   : > { %p3081_p3 = pnand %p3079_p1, %p3524_p7 }
  0xb8   : > { %p3082_p13 = pneg %p3081_p3 }
  0xba   : > { %p3087_p2 = pnand %p3085_p0, %p3082_p13 }
  0xbc   : > { %3090 = shalt.err (!%p3087_p2)
}
  0xbd   : > { %s3091_s17 = scalar_lea.vmem %s584_s15, 2048  ;;  %p3099_p9 = scmp.lt.s32.totalorder %s584_s15, %s584_s15 }
  0xbe   : > { %p3092_p4 = scmp.ne.s32.totalorder %s584_s15, %s3091_s17  ;;  %p3100_p10 = scmp.lt.s32.totalorder %s3091_s17, %s3091_s17 }
  0xc0   : > { %p3094_p6 = pnand %p3092_p4, %p3524_p7  ;;  %p3101_p11 = por %p3100_p10, %p3099_p9 }
  0xc2   : > { %p3095_p8 = pneg %p3094_p6 }
  0xc4   : > { %p3102_p12 = pnand %p3101_p11, %p3095_p8 }
  0xc6   : > { %3105 = shalt.err (!%p3102_p12)
}
  0xc7   : > { %2797 = dma.hbm_to_vmem [thread:$0]  (!%p3508_p5), %s4080_s7, 2048, %s584_s15, [#allocation5], %s4079_s23, %s4079_s23, %s4056_s13  }
  0xc8   : > { %s3345_s4 = smov [#allocation9]   ;;  %s3346_s1 = smov [#allocation12]  }
  0xc9   : > { %s607_s22 = sshll.u32 %s3345_s4, 4  ;;  %s631_s25 = sshll.u32 %s3346_s1, 4  ;;  %s608_s22 = int_to_ptr.vmem [resolvable:$true] %s607_s22  ;;  %s632_s25 = int_to_ptr.vmem [resolvable:$true] %s631_s25 }
  0xca   : > { %s3106_s12 = scalar_lea.hbm %s4031_s9, 2048 }
  0xcb   : > { %p3107_p1 = scmp.ne.s32.totalorder %s4031_s9, %s3106_s12  ;;  %p3113_p0 = scmp.lt.u32.totalorder %s3106_s12, %s4031_s9 }
  0xcd   : > { %p3109_p3 = pnand %p3107_p1, %p3524_p7 }
  0xcf   : > { %p3110_p13 = pneg %p3109_p3 }
  0xd1   : > { %p3115_p2 = pnand %p3113_p0, %p3110_p13 }
  0xd3   : > { %3118 = shalt.err (!%p3115_p2)
}
  0xd4   : > { %s3119_s15 = scalar_lea.vmem %s608_s22, 2048  ;;  %p3127_p9 = scmp.lt.s32.totalorder %s608_s22, %s608_s22 }
  0xd5   : > { %p3120_p4 = scmp.ne.s32.totalorder %s608_s22, %s3119_s15  ;;  %p3128_p10 = scmp.lt.s32.totalorder %s3119_s15, %s3119_s15 }
  0xd7   : > { %p3122_p6 = pnand %p3120_p4, %p3524_p7  ;;  %p3129_p11 = por %p3128_p10, %p3127_p9 }
  0xd9   : > { %p3123_p8 = pneg %p3122_p6 }
  0xdb   : > { %p3130_p12 = pnand %p3129_p11, %p3123_p8 }
  0xdd   : > { %3133 = shalt.err (!%p3130_p12)
}
  0xde   : > { %2803 = dma.hbm_to_vmem [thread:$0]  (!%p3508_p5), %s4031_s9, 2048, %s608_s22, [#allocation8], %s4079_s23, %s4079_s23, %s4056_s13  }
  0xdf   : > { %s3134_s24 = scalar_lea.hbm %s4033_s11, 4096 }
  0xe0   : > { %p3135_p1 = scmp.ne.s32.totalorder %s4033_s11, %s3134_s24  ;;  %p3141_p0 = scmp.lt.u32.totalorder %s3134_s24, %s4033_s11 }
  0xe2   : > { %p3137_p3 = pnand %p3135_p1, %p3524_p7 }
  0xe4   : > { %p3138_p13 = pneg %p3137_p3 }
  0xe6   : > { %p3143_p2 = pnand %p3141_p0, %p3138_p13 }
  0xe8   : > { %3146 = shalt.err (!%p3143_p2)
}
  0xe9   : > { %s3147_s2 = scalar_lea.vmem %s632_s25, 4096  ;;  %p3155_p9 = scmp.lt.s32.totalorder %s632_s25, %s632_s25 }
  0xea   : > { %p3148_p4 = scmp.ne.s32.totalorder %s632_s25, %s3147_s2  ;;  %p3156_p10 = scmp.lt.s32.totalorder %s3147_s2, %s3147_s2 }
  0xec   : > { %p3150_p6 = pnand %p3148_p4, %p3524_p7  ;;  %p3157_p11 = por %p3156_p10, %p3155_p9 }
  0xee   : > { %p3151_p8 = pneg %p3150_p6 }
  0xf0   : > { %p3158_p12 = pnand %p3157_p11, %p3151_p8 }
  0xf2   : > { %3161 = shalt.err (!%p3158_p12)
}
  0xf3   : > { %s3347_s22 = smov 256   ;;  %s3348_s15 = smov 16  }
  0xf4   : > { %2809 = dma.hbm_to_vmem [thread:$0]  (!%p3508_p5), %s4033_s11, 4096, %s632_s25, [#allocation11], %s3347_s22, %s3347_s22, %s3348_s15  }
  0xf5   : > { %s3349_s1 = smov [#allocation15]   ;;  %s3350_s24 = smov [#allocation18]  }
  0xf6   : > { %s666_s0 = sshll.u32 %s3349_s1, 4  ;;  %s696_s12 = sshll.u32 %s3350_s24, 4  ;;  %s667_s0 = int_to_ptr.vmem [resolvable:$true] %s666_s0  ;;  %s697_s12 = int_to_ptr.vmem [resolvable:$true] %s696_s12 }
  0xf7   : > { %s3162_s17 = scalar_lea.hbm %s4038_s16, 2048 }
  0xf8   : > { %p3163_p1 = scmp.ne.s32.totalorder %s4038_s16, %s3162_s17  ;;  %p3169_p0 = scmp.lt.u32.totalorder %s3162_s17, %s4038_s16 }
  0xfa   : > { %p3165_p3 = pnand %p3163_p1, %p3524_p7 }
  0xfc   : > { %p3166_p13 = pneg %p3165_p3 }
  0xfe   : > { %p3171_p2 = pnand %p3169_p0, %p3166_p13 }
 0x100   : > { %3174 = shalt.err (!%p3171_p2)
}
 0x101   : > { %s3175_s25 = scalar_lea.vmem %s667_s0, 2048  ;;  %p3183_p9 = scmp.lt.s32.totalorder %s667_s0, %s667_s0 }
 0x102   : > { %p3176_p4 = scmp.ne.s32.totalorder %s667_s0, %s3175_s25  ;;  %p3184_p10 = scmp.lt.s32.totalorder %s3175_s25, %s3175_s25 }
 0x104   : > { %p3178_p6 = pnand %p3176_p4, %p3524_p7  ;;  %p3185_p11 = por %p3184_p10, %p3183_p9 }
 0x106   : > { %p3179_p8 = pneg %p3178_p6 }
 0x108   : > { %p3186_p12 = pnand %p3185_p11, %p3179_p8 }
 0x10a   : > { %3189 = shalt.err (!%p3186_p12)
}
 0x10b   : > { %s4081_s13 = smov 8   ;;  %s3190_s27 = scalar_lea.hbm %s4041_s19, 16 }
 0x10c   : > { %2815 = dma.hbm_to_vmem [thread:$0]  (!%p3508_p5), %s4038_s16, 2048, %s667_s0, [#allocation14], %s4079_s23, %s4079_s23, %s4081_s13  }
 0x10d   : > { %p3191_p1 = scmp.ne.s32.totalorder %s4041_s19, %s3190_s27  ;;  %p3197_p0 = scmp.lt.u32.totalorder %s3190_s27, %s4041_s19 }
 0x10f   : > { %p3193_p3 = pnand %p3191_p1, %p3524_p7 }
 0x111   : > { %p3194_p13 = pneg %p3193_p3 }
 0x113   : > { %p3199_p2 = pnand %p3197_p0, %p3194_p13 }
 0x115   : > { %3202 = shalt.err (!%p3199_p2)
}
 0x116   : > { %s3203_s26 = scalar_lea.vmem %s697_s12, 16  ;;  %s3210_s23 = scalar_lea.vmem %s697_s12, 32 }
 0x117   : > { %p3204_p4 = scmp.ne.s32.totalorder %s697_s12, %s3203_s26  ;;  %p3211_p9 = scmp.lt.s32.totalorder %s697_s12, %s697_s12 }
 0x118   : > { %p3212_p10 = scmp.lt.s32.totalorder %s3210_s23, %s3203_s26 }
 0x119   : > { %p3206_p6 = pnand %p3204_p4, %p3524_p7 }
 0x11a   : > { %p3213_p11 = por %p3212_p10, %p3211_p9 }
 0x11b   : > { %p3207_p8 = pneg %p3206_p6 }
 0x11d   : > { %p3214_p12 = pnand %p3213_p11, %p3207_p8 }
 0x11f   : > { %3217 = shalt.err (!%p3214_p12)
}
 0x120   : > { %2821 = dma.hbm_to_vmem [thread:$0]  (!%p3508_p5), %s4041_s19, 16, %s697_s12, [#allocation17]  }
 0x121   : > { %s3351_s2 = smov [#allocation21]   ;;  %s3218_s8 = scalar_lea.hbm %s4043_s21, 16 }
 0x122   : > { %s720_s25 = sshll.u32 %s3351_s2, 4  ;;  %p3219_p1 = scmp.ne.s32.totalorder %s4043_s21, %s3218_s8  ;;  %s721_s25 = int_to_ptr.vmem [resolvable:$true] %s720_s25 }
 0x123   : > { %p3225_p0 = scmp.lt.u32.totalorder %s3218_s8, %s4043_s21 }
 0x124   : > { %p3221_p3 = pnand %p3219_p1, %p3524_p7 }
 0x126   : > { %p3222_p13 = pneg %p3221_p3 }
 0x128   : > { %p3227_p2 = pnand %p3225_p0, %p3222_p13 }
 0x12a   : > { %3230 = shalt.err (!%p3227_p2)
}
 0x12b   : > { %s3231_s12 = scalar_lea.vmem %s721_s25, 16  ;;  %s3238_s1 = scalar_lea.vmem %s721_s25, 32 }
 0x12c   : > { %p3232_p4 = scmp.ne.s32.totalorder %s721_s25, %s3231_s12  ;;  %p3239_p9 = scmp.lt.s32.totalorder %s721_s25, %s721_s25 }
 0x12d   : > { %p3240_p10 = scmp.lt.s32.totalorder %s3238_s1, %s3231_s12 }
 0x12e   : > { %p3234_p6 = pnand %p3232_p4, %p3524_p7 }
 0x12f   : > { %p3241_p11 = por %p3240_p10, %p3239_p9 }
 0x130   : > { %p3235_p8 = pneg %p3234_p6 }
 0x132   : > { %p3242_p12 = pnand %p3241_p11, %p3235_p8 }
 0x134   : > { %3245 = shalt.err (!%p3242_p12)
}
 0x135   : > { %s4082_s5 = sld [smem:[#allocation29_spill]]  ;;  %s4083_s26 = sld [smem:[#allocation30_spill]] }
 0x136   : > { %2827 = dma.hbm_to_vmem [thread:$0]  (!%p3508_p5), %s4043_s21, 16, %s721_s25, [#allocation20]  }
 0x137   : > { %s3777_s23 = sadd.s32 1, %s3334_s30   ;;  %s74_s6 = sadd.s32 1, %s3330_s29 }
 0x138   : > { %s71_s0 = ssub.s32 %s3334_s30, %s3777_s23  ;;  %p81_p7 = scmp.ne.s32.totalorder %s3330_s29, %s3326_s28 }
 0x139   : > { %p72_p1 = scmp.eq.s32.totalorder %s71_s0, 0  ;;  %p82_p3 = scmp.eq.s32.totalorder %s3334_s30, 0 }
 0x13a   : > { %p2844_p0 = scmp.lt.s32.totalorder %s3334_s30, 2  ;;  %s738_s13 = sand.u32 1, %s3330_s29  }
 0x13b   : > { %p87_p13 = scmp.ne.s32.totalorder %s3326_s28, %s4082_s5  ;;  %p83_p2 = por %p82_p3, %p81_p7 }
 0x13c   : > { %s3789_s17 = scalar_select %p72_p1, %s3330_s29, %s74_s6  }
 0x13d   : > { %p4084_p4 = scmp.eq.s32.totalorder %s4083_s26, 0  ;;  %s2147_s25 = sshll.u32 %s3334_s30, 7 }
 0x13e   : > { %s2146_s7 = sshll.u32 %s738_s13, 3  ;;  %s4086_s15 = sld [smem:[#allocation33_spill]] }
 0x13f   : > { %p3793_p6 = por %p4084_p4, %p87_p13  ;;  %s742_s4 = scalar_lea.vmem [#allocation2], %s2146_s7 }
 0x140   : > { %s749_s12 = sshll.u32 %s742_s4, 4  ;;  %p3804_p5 = pnand %p2844_p0, %p83_p2  ;;  %s3808_s12 = int_to_ptr.vmem [resolvable:$true] %s749_s12 }
 0x141   : > { %s739_s30 = scalar_lea.sflag [#allocation3], %s738_s13 }
 0x142   : > { %p3248_p9 = pneg %p3804_p5 }
 0x144   : > { %s3802_s27 = scalar_lea.hbm %s4086_s15, %s2147_s25  ;;  %s3251_s26 = scalar_lea.hbm %s4086_s15, 256 }
 0x145   : > { %s3246_s24 = scalar_lea.hbm %s3802_s27, 128  ;;  %p3252_p12 = scmp.lt.u32.totalorder %s3802_s27, %s4086_s15 }
 0x146   : > { %p3247_p8 = scmp.ne.s32.totalorder %s3802_s27, %s3246_s24  ;;  %p3253_p7 = scmp.lt.u32.totalorder %s3251_s26, %s3246_s24 }
 0x147   : > { %p3255_p3 = scmp.lt.u32.totalorder %s3246_s24, %s3802_s27 }
 0x148   : > { %p3249_p10 = pnand %p3248_p9, %p3247_p8  ;;  %p3254_p1 = por %p3253_p7, %p3252_p12 }
 0x14a   : > { %p3250_p11 = pneg %p3249_p10  ;;  %p3256_p13 = por %p3255_p3, %p3254_p1 }
 0x14c   : > { %p3257_p0 = pnand %p3256_p13, %p3250_p11 }
 0x14e   : > { %3260 = shalt.err (!%p3257_p0)
}
 0x14f   : > { %s3261_s13 = scalar_lea.vmem %s3808_s12, 128  ;;  %s3352_s25 = smov [#allocation2]  }
 0x150   : > { %p3262_p2 = scmp.ne.s32.totalorder %s3808_s12, %s3261_s13  ;;  %s3266_s7 = sshll.u32 %s3352_s25, 4  ;;  %s3267_s7 = int_to_ptr.vmem [resolvable:$false] %s3266_s7 }
 0x151   : > { %s3268_s8 = scalar_lea.vmem %s3267_s7, 256  ;;  %p3269_p10 = scmp.lt.s32.totalorder %s3808_s12, %s3267_s7 }
 0x152   : > { %p3264_p4 = pnand %p3262_p2, %p3248_p9  ;;  %p3270_p12 = scmp.lt.s32.totalorder %s3268_s8, %s3261_s13 }
 0x154   : > { %p3265_p8 = pneg %p3264_p4  ;;  %p3271_p7 = por %p3270_p12, %p3269_p10 }
 0x156   : > { %p3272_p1 = pnand %p3271_p7, %p3265_p8 }
 0x158   : > { %3275 = shalt.err (!%p3272_p1)
}
 0x159   : > { %2831 = dma.hbm_to_vmem [thread:$0]  (!%p3804_p5), %s3802_s27, 128, %s3808_s12, %s739_s30  }
 0x15a   : > { %s4088_s22 = sld [smem:[#allocation31_spill]] }
 0x160   : > { %p4089_p11 = scmp.ne.s32.totalorder %s4088_s22, 0 }
 0x161   : > { %s767_s4 = sand.u32 (!%p4089_p11), 1, %s3326_s28  }
 0x162   : > { %765 = sbr.rel (%p4089_p11) target bundleno = 1530 (0x5fa), region = 108  ;;  %s3838_s24 = sshll.u32 (!%p4089_p11), %s767_s4, 3 }
 0x163   : > { %s768_s3 = scalar_lea.sflag (!%p4089_p11), [#allocation3], %s767_s4  ;;  %s771_s5 = scalar_lea.vmem (!%p4089_p11), [#allocation2], %s3838_s24 }
 0x169   : > { %3293 = dma.done.wait (%p3793_p6), %s768_s3, 128  }
 0x16a   : > { %3295 = vsyncadd (%p3793_p6), %s768_s3, 4294967168  ;;  %s4090_s1 = sld [smem:[#allocation30_spill]] }
 0x170   : > { %p4091_p9 = scmp.eq.s32.totalorder %s4090_s1, 0 }
 0x172   : > { %3297 = dma.done.wait (%p4091_p9), [#allocation5], 3072   ;;  %p4092_p5 = pmov %p4091_p9 }
 0x174   : > { %3299 = vsyncadd (%p4092_p5), [#allocation5], 4294964224  ;;  %p4093_p3 = pmov %p4092_p5 }
 0x176   : > { %3301 = dma.done.wait (%p4093_p3), [#allocation8], 2064   ;;  %p4094_p13 = pmov %p4093_p3 }
 0x177   : > { %p4095_p0 = pmov %p4093_p3 }
 0x178   : > { %3303 = vsyncadd (%p4094_p13), [#allocation8], 4294965232 }
 0x179   : > { %3305 = dma.done.wait (%p4095_p0), [#allocation11], 4112   ;;  %p4096_p2 = pmov %p4095_p0 }
 0x17a   : > { %p4097_p6 = pmov %p4095_p0 }
 0x17b   : > { %3307 = vsyncadd (%p4096_p2), [#allocation11], 4294963184 }
 0x17c   : > { %3309 = dma.done.wait (%p4097_p6), [#allocation14], 4096   ;;  %p4098_p4 = pmov %p4095_p0 }
 0x17d   : > { %p4099_p8 = pmov %p4095_p0 }
 0x17e   : > { %3311 = vsyncadd (%p4098_p4), [#allocation14], 4294963200 }
 0x17f   : > { %3313 = dma.done.wait (%p4099_p8), [#allocation17], 2064   ;;  %p4100_p10 = pmov %p4095_p0 }
 0x180   : > { %p4101_p12 = pmov %p4095_p0 }
 0x181   : > { %3315 = vsyncadd (%p4100_p10), [#allocation17], 4294965232 }
 0x182   : > { %3317 = dma.done.wait (%p4101_p12), [#allocation20], 2064   ;;  %p4102_p7 = pmov %p4095_p0 }
 0x183   : > { %v3353_v0 = vmov 0.0|0.0   ;;  %vm3354_vm0 = vmmov 0   ;;  %v3355_v1 = vmov 0.0   ;;  %v917_v2 = vld [vmem:[#allocation4] sm:$0xff]  ;;  %v918_v3 = vld [vmem:[#allocation4 + $0x8] sm:$0xff]  ;;  %v919_v4 = vld [vmem:[#allocation4 + $0x10] sm:$0xff] }
 0x184   : > { %3319 = vsyncadd (%p4102_p7), [#allocation20], 4294965232  ;;  %2544 = vmatprep.subr.bf16.mxu1 %v3353_v0  ;;  %2315 = vmatprep.mubr.msk.f32.mxu1 %vm3354_vm0, %v3355_v1  ;;  %p888_p1 = scmp.lt.s32.totalorder %s4090_s1, 1  ;;  %v2545_v5 = vpack.c.bf16 %v918_v3, %v917_v2  ;;  %v920_v6 = vld [vmem:[#allocation4 + $0x18] sm:$0xff]  ;;  %v921_v8 = vld [vmem:[#allocation4 + $0x20] sm:$0xff]  ;;  %s4103_s30 = sld [smem:[#allocation32_spill]] }
 0x185   : > { %2586 = vmatprep.subr.bf16.mxu0 %v3353_v0  ;;  %2401 = vmatprep.mubr.msk.f32.mxu0 %vm3354_vm0, %v3355_v1  ;;  %v2548_v7 = vpack.c.bf16 %v920_v6, %v919_v4  ;;  %v922_v9 = vld [vmem:[#allocation4 + $0x28] sm:$0xff]  ;;  %v902_v10 = vld [vmem:[%s771_s5] sm:$0xff]  ;;  %vm3356_vm2 = vmmov 1   ;;  %s4104_s13 = sld [smem:[#allocation35_spill]]  ;;  %vm925_vm4 = vcmask 523264   ;;  %s4105_s4 = sld [smem:[#allocation34_spill]] }
 0x186   : > { %2546 = vmatpush3.bf16.msra.mxu1 %v2545_v5  ;;  %s4118_s1 = smov (!%p888_p1, %s4090_s1), 1  ;;  %v2551_v11 = vpack.c.bf16 %v922_v9, %v921_v8  ;;  %v923_v12 = vld [vmem:[#allocation4 + $0x30] sm:$0xff]  ;;  %v924_v13 = vld [vmem:[#allocation4 + $0x38] sm:$0xff]  ;;  %vm907_vm1 = vweird.f32 %v902_v10  ;;  %vm999_vm8 = vcmask 261120   ;;  %vm1078_vm9 = vcmask 1043456   ;;  %v1162_v26 = vld [vmem:[#allocation6] sm:$0xff] }
 0x187   : > { %2547 = vmatprep.subr.bf16.mxu1 %v3353_v0  ;;  %s2162_s2 = sshll.u32 %s4118_s1, 3  ;;  %v2554_v14 = vpack.c.bf16 %v924_v13, %v923_v12  ;;  %vm908_vm3 = vmxor %vm907_vm1, %vm3356_vm2  ;;  %v1163_v27 = vld [vmem:[#allocation6 + $0x8] sm:$0xff]  ;;  %vm1074_vm11 = vcmask 31744   ;;  %v1164_v30 = vld [vmem:[#allocation6 + $0x10] sm:$0xff]  ;;  %s4107_s25 = sld [smem:[#allocation41_spill]] }
 0x188   : > { %v909_v18 = vsel %vm908_vm3, %v902_v10, 0.0  ;;  %v2563_v29 = vpack.c.bf16 %v1163_v27, %v1162_v26  ;;  %v1165_v31 = vld [vmem:[#allocation6 + $0x18] sm:$0xff]  ;;  %v1166_v33 = vld [vmem:[#allocation6 + $0x20] sm:$0xff]  ;;  %v1167_v34 = vld [vmem:[#allocation6 + $0x28] sm:$0xff]  ;;  %s4108_s22 = sld [smem:[#allocation38_spill]]  ;;  %s4109_s3 = sld [smem:[#allocation42_spill]] }
 0x189   : > { %v2566_v32 = vpack.c.bf16 %v1165_v31, %v1164_v30  ;;  %v2569_v35 = vpack.c.bf16 %v1167_v34, %v1166_v33  ;;  %v1168_v36 = vld [vmem:[#allocation6 + $0x30] sm:$0xff]  ;;  %v1169_v37 = vld [vmem:[#allocation6 + $0x38] sm:$0xff]  ;;  %v1170_v39 = vld [vmem:[#allocation6 + $0x40] sm:$0xff]  ;;  %s2740_s5 = smul.u32 24, %s4118_s1  ;;  %s4111_s6 = sld [smem:[#allocation43_spill]] }
 0x18a   : > { %2549 = vmatpush3.bf16.msra.mxu1 %v2548_v7  ;;  %s891_s26 = scalar_lea.vmem %s4103_s30, %s2162_s2  ;;  %v2572_v38 = vpack.c.bf16 %v1169_v37, %v1168_v36  ;;  %v1171_v40 = vld [vmem:[#allocation6 + $0x48] sm:$0xff]  ;;  %v1172_v42 = vld [vmem:[#allocation6 + $0x50] sm:$0xff]  ;;  %v1173_v43 = vld [vmem:[#allocation6 + $0x58] sm:$0xff]  ;;  %s4112_s7 = sld [smem:[#allocation44_spill]] }
 0x18b   : > { %2550 = vmatprep.subr.bf16.mxu1 %v3353_v0  ;;  %v913_v15 = vld [vmem:[%s4104_s13] sm:$0xff]  ;;  %v914_v16 = vld [vmem:[%s4104_s13 + $0x8] sm:$0xff]  ;;  %s895_s24 = scalar_lea.vmem %s4105_s4, %s2162_s2  ;;  %v915_v20 = vld [vmem:[%s4104_s13 + $0x10] sm:$0xff]  ;;  %v2575_v41 = vpack.c.bf16 %v1171_v40, %v1170_v39  ;;  %v2578_v44 = vpack.c.bf16 %v1173_v43, %v1172_v42  ;;  %s4110_s2 = sld [smem:[#allocation45_spill]] }
 0x18c   : > { %v901_v17 = vld [vmem:[%s891_s26] sm:$0xff]  ;;  %v2557_v19 = vpack.c.bf16 %v914_v16, %v913_v15  ;;  %v916_v21 = vld [vmem:[%s4104_s13 + $0x18] sm:$0xff]  ;;  %s4106_s26 = sld [smem:[#allocation37_spill]]  ;;  %v1174_v45 = vld [vmem:[#allocation6 + $0x60] sm:$0xff] }
 0x18d   : > { %vm904_vm5 = vweird.f32 %v901_v17  ;;  %v3905_v22 = vld [vmem:[%s895_s24] sm:$0xff]  ;;  %v2560_v23 = vpack.c.bf16 %v916_v21, %v915_v20  ;;  %v1175_v46 = vld [vmem:[#allocation6 + $0x68] sm:$0xff]  ;;  %v1177_v49 = vld [vmem:[#allocation6 + $0x78] sm:$0xff] }
 0x18e   : > { %2552 = vmatpush3.bf16.msra.mxu1 %v2551_v11  ;;  %vm905_vm6 = vmxor %vm904_vm5, %vm3356_vm2  ;;  %vm910_vm7 = vweird.f32 %v3905_v22  ;;  %v2581_v47 = vpack.c.bf16 %v1175_v46, %v1174_v45  ;;  %v1176_v48 = vld [vmem:[#allocation6 + $0x70] sm:$0xff]  ;;  %v1256_v53 = vld [vmem:[#allocation9] sm:$0xff] }
 0x18f   : > { %2553 = vmatprep.subr.bf16.mxu1 %v3353_v0  ;;  %v906_v24 = vsel %vm905_vm6, %v901_v17, 0.0  ;;  %vm911_vm10 = vmxor %vm910_vm7, %vm3356_vm2  ;;  %v2584_v50 = vpack.c.bf16 %v1177_v49, %v1176_v48  ;;  %v1381_v51 = vld [vmem:[%s4107_s25] sm:$0xff]  ;;  %v1259_v57 = vld [vmem:[#allocation9 + $0x18] sm:$0xff] }
 0x190   : > { %v912_v28 = vsel %vm911_vm10, %v3905_v22, 0.0  ;;  %v1383_v52 = vcombine.high %v1381_v51, %v1381_v51  ;;  %v1257_v54 = vld [vmem:[#allocation9 + $0x8] sm:$0xff]  ;;  %v1258_v56 = vld [vmem:[#allocation9 + $0x10] sm:$0xff]  ;;  %v1260_v59 = vld [vmem:[#allocation9 + $0x20] sm:$0xff] }
 0x191   : > { %v2587_v55 = vpack.c.bf16 %v1257_v54, %v1256_v53  ;;  %v2590_v58 = vpack.c.bf16 %v1259_v57, %v1258_v56  ;;  %v1261_v60 = vld [vmem:[#allocation9 + $0x28] sm:$0xff]  ;;  %v1262_v62 = vld [vmem:[#allocation9 + $0x30] sm:$0xff]  ;;  %v1263_v63 = vld [vmem:[#allocation9 + $0x38] sm:$0xff]  ;;  %s3979_s30 = scalar_lea.vmem %s4110_s2, %s2740_s5 }
 0x192   : > { %2555 = vmatpush3.bf16.msra.mxu1 %v2554_v14  ;;  %v1073_v25 = vld [vmem:[%s4106_s26] sm:$0xf]  ;;  %v2593_v61 = vpack.c.bf16 %v1261_v60, %v1260_v59  ;;  %v2596_v2 = vpack.c.bf16 %v1263_v63, %v1262_v62  ;;  %v1264_v3 = vld [vmem:[#allocation9 + $0x40] sm:$0xff]  ;;  %v1267_v7 = vld [vmem:[#allocation9 + $0x58] sm:$0xff] }
 0x193   : > { %2556 = vmatprep.subr.bf16.mxu1 %v3353_v0  ;;  %2588 = vmatpush3.bf16.msra.mxu0 %v2587_v55  ;;  %v1265_v4 = vld [vmem:[#allocation9 + $0x48] sm:$0xff]  ;;  %v1266_v6 = vld [vmem:[#allocation9 + $0x50] sm:$0xff]  ;;  %v1268_v9 = vld [vmem:[#allocation9 + $0x60] sm:$0xff] }
 0x194   : > { %2589 = vmatprep.subr.bf16.mxu0 %v3353_v0  ;;  %v2599_v5 = vpack.c.bf16 %v1265_v4, %v1264_v3  ;;  %v2602_v8 = vpack.c.bf16 %v1267_v7, %v1266_v6  ;;  %v1269_v10 = vld [vmem:[#allocation9 + $0x68] sm:$0xff]  ;;  %v1356_v30 = vld [vmem:[#allocation12 + $0x38] sm:$0xff]  ;;  %v1355_v34 = vld [vmem:[#allocation12 + $0x30] sm:$0xff] }
 0x195   : > { %2316 = vmatmul.mubr.msk.f32.vlgmr.msra.gmra.mrb[0].mxu1 %vm925_vm4, %v909_v18  ;;  %v2605_v11 = vpack.c.bf16 %v1269_v10, %v1268_v9  ;;  %v2169_v18 = vld [vmem:[%s4108_s22] ss:$0 sm:$0xff]  ;;  %v1349_v27 = vld [vmem:[#allocation12] sm:$0xff]  ;;  %v1360_v36 = vld [vmem:[#allocation12 + $0x58] sm:$0xff] }
 0x196   : > { %2558 = vmatpush3.bf16.msra.mxu1 %v2557_v19  ;;  %2326 = vmatprep.mubr.msk.f32.mxu1 %vm3354_vm0, %v3355_v1  ;;  %v1350_v21 = vld [vmem:[#allocation12 + $0x8] sm:$0xff]  ;;  %v1353_v33 = vld [vmem:[#allocation12 + $0x20] sm:$0xff]  ;;  %v1359_v40 = vld [vmem:[#allocation12 + $0x50] sm:$0xff] }
 0x197   : > { %2559 = vmatprep.subr.bf16.mxu1 %v3353_v0  ;;  %2591 = vmatpush3.bf16.msra.mxu0 %v2590_v58  ;;  %v2616_v37 = vpack.c.bf16 %v1355_v34, %v1353_v33  ;;  %v1357_v39 = vld [vmem:[#allocation12 + $0x40] sm:$0xff]  ;;  %v1364_v42 = vld [vmem:[#allocation12 + $0x78] sm:$0xff]  ;;  %v1363_v46 = vld [vmem:[#allocation12 + $0x70] sm:$0xff] }
 0x198   : > { %2592 = vmatprep.subr.bf16.mxu0 %v3353_v0  ;;  %v2620_v43 = vpack.c.bf16 %v1359_v40, %v1357_v39  ;;  %v1361_v45 = vld [vmem:[#allocation12 + $0x60] sm:$0xff]  ;;  %v1368_v48 = vld [vmem:[#allocation12 + $0x98] sm:$0xff]  ;;  %v1371_v57 = vld [vmem:[#allocation12 + $0xb0] sm:$0xff] }
 0x199   : > { %v1372_v53 = vld [vmem:[#allocation12 + $0xb8] sm:$0xff]  ;;  %v1369_v56 = vld [vmem:[#allocation12 + $0xa0] sm:$0xff]  ;;  %v1374_v58 = vld [vmem:[#allocation12 + $0xc8] sm:$0xff] }
 0x19a   : > { %2561 = vmatpush3.bf16.msra.mxu1 %v2560_v23  ;;  %v1352_v23 = vld [vmem:[#allocation12 + $0x18] sm:$0xff]  ;;  %v2632_v60 = vpack.c.bf16 %v1371_v57, %v1369_v56  ;;  %v1373_v62 = vld [vmem:[#allocation12 + $0xc0] sm:$0xff]  ;;  %v1375_v63 = vld [vmem:[#allocation12 + $0xd0] sm:$0xff] }
 0x19b   : > { %2329 = vmatprep.subr.mxu1 %v3355_v1  ;;  %2594 = vmatpush3.bf16.msra.mxu0 %v2593_v61  ;;  %v2610_v26 = vpack.c.bf16 %v1352_v23, %v1350_v21  ;;  %v1376_v59 = vld [vmem:[#allocation12 + $0xd8] sm:$0xff]  ;;  %v1378_v3 = vld [vmem:[#allocation12 + $0xe8] sm:$0xff]  ;;  %v1379_v10 = vld [vmem:[#allocation12 + $0xf0] sm:$0xff] }
 0x19c   : > { %2595 = vmatprep.subr.bf16.mxu0 %v3353_v0  ;;  %v2634_v61 = vpack.c.bf16 %v1376_v59, %v1374_v58  ;;  %v1380_v4 = vld [vmem:[#allocation12 + $0xf8] sm:$0xff]  ;;  %v1270_v6 = vld [vmem:[#allocation9 + $0x70] sm:$0xff] }
 0x19d   : > { %2327 = vmatmul.mubr.msk.f32.vlgmr.msra.gmra.mrb[2].mxu1 %vm999_vm8, %v906_v24  ;;  %v1271_v7 = vld [vmem:[#allocation9 + $0x78] sm:$0xff]  ;;  %v1741_v33 = vld [vmem:[#allocation16 + $0x28] sm:$0xff] }
 0x19e   : > { %2330 = vmatpush3.msk.msra.mxu1 %vm1078_vm9, %v1073_v25  ;;  %2331 = vmatprep.mubr.msk.f32.mxu1 %vm3354_vm0, %v3355_v1  ;;  %v2608_v9 = vpack.c.bf16 %v1271_v7, %v1270_v6  ;;  %v1551_v23 = vld [vmem:[#allocation13 + $0x10] sm:$0xff]  ;;  %v1743_v39 = vld [vmem:[#allocation16 + $0x38] sm:$0xff]  ;;  %v1749_v56 = vld [vmem:[#allocation16 + $0x68] sm:$0xff] }
 0x19f   : > { %2562 = vmatprep.subr.bf16.mxu1 %v3353_v0  ;;  %2597 = vmatpush3.bf16.msra.mxu0 %v2596_v2  ;;  %v2636_v2 = vpack.c.bf16 %v1375_v63, %v1373_v62  ;;  %v1563_v59 = vld [vmem:[#allocation13 + $0x70] sm:$0xff]  ;;  %v1751_v63 = vld [vmem:[#allocation16 + $0x78] sm:$0xff]  ;;  %v1533_v6 = vld [vmem:[%s4109_s3] sm:$0x3] }
 0x1a0   : > { %2598 = vmatprep.subr.bf16.mxu0 %v3353_v0  ;;  %v1750_v62 = vld [vmem:[#allocation16 + $0x70] sm:$0xff] }
 0x1a1   : > { %2332 = vmatmul.mubr.msk.f32.vlgmr.msra.gmra.mrb[4].mxu1 %vm1074_vm11, %v912_v28  ;;  %v1351_v28 = vld [vmem:[#allocation12 + $0x10] sm:$0xff] }
 0x1a2   : > { %2564 = vmatpush3.bf16.msra.mxu1 %v2563_v29  ;;  %2366 = vmatprep.mubr.msk.f32.mxu1 %vm3354_vm0, %v3355_v1  ;;  %v1354_v29 = vld [vmem:[#allocation12 + $0x28] sm:$0xff]  ;;  %v2612_v31 = vpack.c.bf16 %v1351_v28, %v1349_v27  ;;  %v1739_v27 = vld [vmem:[#allocation16 + $0x18] sm:$0xff] }
 0x1a3   : > { %2565 = vmatprep.subr.bf16.mxu1 %v3353_v0  ;;  %2600 = vmatpush3.bf16.msra.mxu0 %v2599_v5  ;;  %v2638_v5 = vpack.c.bf16 %v1380_v4, %v1378_v3  ;;  %v1535_v3 = vlaneseq }
 0x1a4   : > { %2601 = vmatprep.subr.bf16.mxu0 %v3353_v0 }
 0x1a5   : > { %v1536_v4 = vshrl.u32 %v1535_v3, 7 }
 0x1a6   : > { %2567 = vmatpush3.bf16.msra.mxu1 %v2566_v32  ;;  %v2614_v32 = vpack.c.bf16 %v1356_v30, %v1354_v29  ;;  %v1553_v30 = vld [vmem:[#allocation13 + $0x20] sm:$0xff] }
 0x1a7   : > { %2568 = vmatprep.subr.bf16.mxu1 %v3353_v0  ;;  %2603 = vmatpush3.bf16.msra.mxu0 %v2602_v8  ;;  %v1377_v8 = vld [vmem:[#allocation12 + $0xe0] sm:$0xff]  ;;  %v1541_v7 = vsub.s32 1, %v1536_v4 }
 0x1a8   : > { %2604 = vmatprep.subr.bf16.mxu0 %v3353_v0 }
 0x1aa   : > { %2570 = vmatpush3.bf16.msra.mxu1 %v2569_v35  ;;  %v1358_v35 = vld [vmem:[#allocation12 + $0x48] sm:$0xff] }
 0x1ab   : > { %2571 = vmatprep.subr.bf16.mxu1 %v3353_v0  ;;  %2606 = vmatpush3.bf16.msra.mxu0 %v2605_v11  ;;  %v2640_v11 = vpack.c.bf16 %v1379_v10, %v1377_v8  ;;  %v1542_v10 = vrot.slane %v1533_v6, %v1541_v7  ;;  %v1843_v7 = vld [vmem:[#allocation19 + $0x68] sm:$0xff] }
 0x1ac   : > { %2607 = vmatprep.subr.bf16.mxu0 %v3353_v0 }
 0x1ae   : > { %2573 = vmatpush3.bf16.msra.mxu1 %v2572_v38  ;;  %v2618_v38 = vpack.c.bf16 %v1360_v36, %v1358_v35  ;;  %v1555_v36 = vld [vmem:[#allocation13 + $0x30] sm:$0xff] }
 0x1af   : > { %2574 = vmatprep.subr.bf16.mxu1 %v3353_v0  ;;  %2609 = vmatpush3.bf16.msra.mxu0 %v2608_v9  ;;  %v2171_v9 = vld [vmem:[#allocation10] ss:$0 sm:$0xff] }
 0x1b0   : > { %2642 = vmatprep.subr.bf16.mxu0 %v3353_v0 }
 0x1b2   : > { %2576 = vmatpush3.bf16.msra.mxu1 %v2575_v41  ;;  %v1362_v41 = vld [vmem:[#allocation12 + $0x68] sm:$0xff] }
 0x1b3   : > { %2577 = vmatprep.subr.bf16.mxu1 %v3353_v0 }
 0x1b6   : > { %2579 = vmatpush3.bf16.msra.mxu1 %v2578_v44  ;;  %v2622_v44 = vpack.c.bf16 %v1364_v42, %v1362_v41  ;;  %v1557_v42 = vld [vmem:[#allocation13 + $0x40] sm:$0xff] }
 0x1b7   : > { %2580 = vmatprep.subr.bf16.mxu1 %v3353_v0 }
 0x1ba   : > { %2582 = vmatpush3.bf16.msra.mxu1 %v2581_v47  ;;  %v1366_v47 = vld [vmem:[#allocation12 + $0x88] sm:$0xff] }
 0x1bb   : > { %2583 = vmatprep.subr.bf16.mxu1 %v3353_v0  ;;  %v2626_v49 = vpack.c.bf16 %v1368_v48, %v1366_v47  ;;  %v1559_v48 = vld [vmem:[#allocation13 + $0x50] sm:$0xff] }
 0x1be   : > { %2585 = vmatpush3.bf16.msra.mxu1 %v2584_v50  ;;  %v1365_v50 = vld [vmem:[#allocation12 + $0x80] sm:$0xff] }
 0x1bf   : > { %2172 = vmatprep.subr.msk.mxu1 %vm1078_vm9, %v1383_v52  ;;  %v1370_v52 = vld [vmem:[#allocation12 + $0xa8] sm:$0xff] }
 0x1c0   : > { %v2630_v55 = vpack.c.bf16 %v1372_v53, %v1370_v52  ;;  %v1561_v53 = vld [vmem:[#allocation13 + $0x60] sm:$0xff] }
 0x268   : > { %v995_v12 = vpop.f32.mrb[0].mxu1 }
 0x269   : > { %v2317_v13 = vpop.f32.mrb[1].mxu1 }
 0x26a   : > { %v1549_v13 = vld [vmem:[#allocation13] sm:$0xff] }
 0x270   : > { %v1069_v14 = vpop.f32.mrb[2].mxu1 }
 0x271   : > { %v1070_v15 = vadd.f32 %v1069_v14, %v995_v12  ;;  %v2328_v16 = vpop.f32.mrb[3].mxu1  ;;  %v2170_v12 = vld [vmem:[#allocation7] ss:$0 sm:$0xff]  ;;  %v1550_v14 = vld [vmem:[#allocation13 + $0x8] sm:$0xff] }
 0x272   : > { %v1737_v16 = vld [vmem:[#allocation16 + $0x8] sm:$0xff] }
 0x274   : > { %v1148_v17 = vpop.f32.mrb[4].mxu1 }
 0x275   : > { %v1152_v19 = vadd.f32 %v1148_v17, %v1070_v15  ;;  %v2333_v20 = vpop.f32.mrb[5].mxu1  ;;  %v1736_v15 = vld [vmem:[#allocation16] sm:$0xff] }
 0x276   : > { %v2643_v20 = vpack.c.bf16 %v1550_v14, %v1549_v13  ;;  %v2691_v21 = vpack.c.bf16 %v1737_v16, %v1736_v15 }
 0x277   : > { %v1160_v24 = vadd.f32 %v2169_v18, %v1152_v19 }
 0x279   : > { %v1161_v25 = vmax.f32 %v1160_v24, 0.0 }
 0x27b   : > { %2367 = vmatmul.mubr.f32.vlgmr.msra.gmra.mrb[6].mxu1 %v1161_v25  ;;  %v1552_v25 = vld [vmem:[#allocation13 + $0x18] sm:$0xff] }
 0x27c   : > { %2173 = vmatpush1.msk.msra.mxu1 %vm1078_vm9, %v1381_v51  ;;  %1455 = vmatprep.mubr.f32.mxu1 %v3355_v1  ;;  %v1367_v51 = vld [vmem:[#allocation12 + $0x90] sm:$0xff]  ;;  %v2646_v28 = vpack.c.bf16 %v1552_v25, %v1551_v23 }
 0x27d   : > { %2611 = vmatprep.subr.bf16.mxu1 %v2610_v26  ;;  %v2628_v54 = vpack.c.bf16 %v1367_v51, %v1365_v50  ;;  %v1738_v26 = vld [vmem:[#allocation16 + $0x10] sm:$0xff]  ;;  %v1747_v50 = vld [vmem:[#allocation16 + $0x58] sm:$0xff] }
 0x27e   : > { %v2694_v29 = vpack.c.bf16 %v1739_v27, %v1738_v26  ;;  %v1645_v23 = vld [vmem:[#allocation15 + $0x10] sm:$0xff]  ;;  %v1647_v27 = vld [vmem:[#allocation15 + $0x20] sm:$0xff] }
 0x27f   : > { %2174 = vmatmul.mubr.msk.f32.vlgmr.msra.gmra.mrb[8].mxu1 %vm1074_vm11, %v3905_v22  ;;  %v2624_v22 = vpack.c.bf16 %v1363_v46, %v1361_v45  ;;  %v1745_v45 = vld [vmem:[#allocation16 + $0x48] sm:$0xff] }
 0x280   : > { %2613 = vmatpush1.bf16.msra.mxu1 %v2612_v31  ;;  %1526 = vmatprep.mubr.f32.mxu1 %v3355_v1  ;;  %v1554_v31 = vld [vmem:[#allocation13 + $0x28] sm:$0xff] }
 0x281   : > { %2615 = vmatprep.subr.bf16.mxu1 %v2614_v32  ;;  %v1740_v32 = vld [vmem:[#allocation16 + $0x20] sm:$0xff]  ;;  %v2649_v34 = vpack.c.bf16 %v1554_v31, %v1553_v30  ;;  %v1649_v30 = vld [vmem:[#allocation15 + $0x30] sm:$0xff]  ;;  %v1650_v31 = vld [vmem:[#allocation15 + $0x38] sm:$0xff] }
 0x282   : > { %v2697_v35 = vpack.c.bf16 %v1741_v33, %v1740_v32  ;;  %v2676_v32 = vpack.c.bf16 %v1650_v31, %v1649_v30  ;;  %v1651_v33 = vld [vmem:[#allocation15 + $0x40] sm:$0xff] }
 0x284   : > { %2617 = vmatpush1.bf16.msra.mxu1 %v2616_v37  ;;  %v1556_v37 = vld [vmem:[#allocation13 + $0x38] sm:$0xff] }
 0x285   : > { %2619 = vmatprep.subr.bf16.mxu1 %v2618_v38  ;;  %v1742_v38 = vld [vmem:[#allocation16 + $0x30] sm:$0xff]  ;;  %v2652_v40 = vpack.c.bf16 %v1556_v37, %v1555_v36  ;;  %v1654_v37 = vld [vmem:[#allocation15 + $0x58] sm:$0xff] }
 0x286   : > { %v2700_v41 = vpack.c.bf16 %v1743_v39, %v1742_v38  ;;  %v1653_v36 = vld [vmem:[#allocation15 + $0x50] sm:$0xff]  ;;  %v1655_v39 = vld [vmem:[#allocation15 + $0x60] sm:$0xff] }
 0x287   : > { %v2682_v38 = vpack.c.bf16 %v1654_v37, %v1653_v36 }
 0x288   : > { %2621 = vmatpush1.bf16.msra.mxu1 %v2620_v43  ;;  %v1558_v43 = vld [vmem:[#allocation13 + $0x48] sm:$0xff] }
 0x289   : > { %2623 = vmatprep.subr.bf16.mxu1 %v2622_v44  ;;  %v1744_v44 = vld [vmem:[#allocation16 + $0x40] sm:$0xff]  ;;  %v2655_v46 = vpack.c.bf16 %v1558_v43, %v1557_v42  ;;  %v1657_v42 = vld [vmem:[#allocation15 + $0x70] sm:$0xff]  ;;  %v1658_v43 = vld [vmem:[#allocation15 + $0x78] sm:$0xff] }
 0x28a   : > { %v2703_v47 = vpack.c.bf16 %v1745_v45, %v1744_v44  ;;  %v2688_v44 = vpack.c.bf16 %v1658_v43, %v1657_v42  ;;  %v2175_v45 = vld [vmem:[%s4111_s6] ss:$0 sm:$0xff] }
 0x28c   : > { %2625 = vmatpush1.bf16.msra.mxu1 %v2624_v22  ;;  %v1560_v22 = vld [vmem:[#allocation13 + $0x58] sm:$0xff] }
 0x28d   : > { %2627 = vmatprep.subr.bf16.mxu1 %v2626_v49  ;;  %v1746_v49 = vld [vmem:[#allocation16 + $0x50] sm:$0xff]  ;;  %v2658_v51 = vpack.c.bf16 %v1560_v22, %v1559_v48 }
 0x28e   : > { %v2706_v52 = vpack.c.bf16 %v1747_v50, %v1746_v49 }
 0x290   : > { %2629 = vmatpush1.bf16.msra.mxu1 %v2628_v54  ;;  %v1562_v54 = vld [vmem:[#allocation13 + $0x68] sm:$0xff] }
 0x291   : > { %2631 = vmatprep.subr.bf16.mxu1 %v2630_v55  ;;  %v1748_v55 = vld [vmem:[#allocation16 + $0x60] sm:$0xff]  ;;  %v2661_v57 = vpack.c.bf16 %v1562_v54, %v1561_v53  ;;  %v1832_v54 = vld [vmem:[#allocation19 + $0x10] sm:$0xff] }
 0x292   : > { %v2709_v58 = vpack.c.bf16 %v1749_v56, %v1748_v55  ;;  %v1833_v55 = vld [vmem:[#allocation19 + $0x18] sm:$0xff] }
 0x293   : > { %v2718_v56 = vpack.c.bf16 %v1833_v55, %v1832_v54 }
 0x294   : > { %2633 = vmatpush1.bf16.msra.mxu1 %v2632_v60  ;;  %v1564_v60 = vld [vmem:[#allocation13 + $0x78] sm:$0xff] }
 0x295   : > { %2635 = vmatprep.subr.bf16.mxu1 %v2634_v61  ;;  %v2664_v61 = vpack.c.bf16 %v1564_v60, %v1563_v59  ;;  %v1836_v60 = vld [vmem:[#allocation19 + $0x30] sm:$0xff] }
 0x298   : > { %2637 = vmatpush1.bf16.msra.mxu1 %v2636_v2  ;;  %v2712_v2 = vpack.c.bf16 %v1751_v63, %v1750_v62  ;;  %v1838_v63 = vld [vmem:[#allocation19 + $0x40] sm:$0xff] }
 0x299   : > { %2639 = vmatprep.subr.bf16.mxu1 %v2638_v5  ;;  %v1537_v5 = vsub.s32 0, %v1536_v4  ;;  %v1841_v4 = vld [vmem:[#allocation19 + $0x58] sm:$0xff] }
 0x29b   : > { %v1538_v8 = vrot.slane %v1533_v6, %v1537_v5  ;;  %v1842_v6 = vld [vmem:[#allocation19 + $0x60] sm:$0xff] }
 0x29c   : > { %2641 = vmatpush1.bf16.msra.mxu1 %v2640_v11  ;;  %v1643_v11 = vld [vmem:[#allocation15] sm:$0xff] }
 0x29d   : > { %2690 = vmatprep.subr.bf16.mxu1 %v3353_v0 }
 0x34e   : > { %v1251_v17 = vpop.f32.mrb[6].mxu1 }
 0x34f   : > { %v1252_v18 = vadd.f32 %v2170_v12, %v1251_v17  ;;  %v2368_v19 = vpop.f32.mrb[7].mxu1  ;;  %v1644_v12 = vld [vmem:[#allocation15 + $0x8] sm:$0xff] }
 0x351   : > { %v1255_v24 = vmax.f32 %v1252_v18, 0.0 }
 0x353   : > { %2402 = vmatmul.mubr.f32.vlgmr.msra.gmra.mrb[0].mxu0 %v1255_v24  ;;  %1527 = vmatmul.mubr.f32.vlgmr.msra.gmra.mrb[8].mxu1 %v1255_v24  ;;  %v1646_v24 = vld [vmem:[#allocation15 + $0x18] sm:$0xff] }
 0x354   : > { %2644 = vmatpush3.bf16.msra.mxu0 %v2643_v20  ;;  %2692 = vmatpush3.bf16.msra.mxu1 %v2691_v21  ;;  %v2667_v20 = vpack.c.bf16 %v1644_v12, %v1643_v11  ;;  %v2670_v26 = vpack.c.bf16 %v1646_v24, %v1645_v23  ;;  %v2177_v11 = vld [vmem:[#allocation18] ss:$0 sm:$0xff] }
 0x355   : > { %2645 = vmatprep.subr.bf16.mxu0 %v3353_v0  ;;  %2693 = vmatprep.subr.bf16.mxu1 %v3353_v0 }
 0x356   : > { %2436 = vmatprep.mubr.msk.f32.mxu0 %vm3354_vm0, %v3355_v1  ;;  %2506 = vmatprep.mubr.msk.f32.mxu1 %vm3354_vm0, %v3355_v1 }
 0x358   : > { %2647 = vmatpush3.bf16.msra.mxu0 %v2646_v28  ;;  %2695 = vmatpush3.bf16.msra.mxu1 %v2694_v29  ;;  %v1648_v28 = vld [vmem:[#allocation15 + $0x28] sm:$0xff] }
 0x359   : > { %2648 = vmatprep.subr.bf16.mxu0 %v3353_v0  ;;  %2696 = vmatprep.subr.bf16.mxu1 %v3353_v0  ;;  %v2673_v29 = vpack.c.bf16 %v1648_v28, %v1647_v27 }
 0x35c   : > { %2650 = vmatpush3.bf16.msra.mxu0 %v2649_v34  ;;  %2698 = vmatpush3.bf16.msra.mxu1 %v2697_v35  ;;  %v1652_v34 = vld [vmem:[#allocation15 + $0x48] sm:$0xff] }
 0x35d   : > { %2651 = vmatprep.subr.bf16.mxu0 %v3353_v0  ;;  %2699 = vmatprep.subr.bf16.mxu1 %v3353_v0  ;;  %v2679_v35 = vpack.c.bf16 %v1652_v34, %v1651_v33 }
 0x360   : > { %2653 = vmatpush3.bf16.msra.mxu0 %v2652_v40  ;;  %2701 = vmatpush3.bf16.msra.mxu1 %v2700_v41  ;;  %v1656_v40 = vld [vmem:[#allocation15 + $0x68] sm:$0xff] }
 0x361   : > { %2654 = vmatprep.subr.bf16.mxu0 %v3353_v0  ;;  %2702 = vmatprep.subr.bf16.mxu1 %v3353_v0  ;;  %v2685_v41 = vpack.c.bf16 %v1656_v40, %v1655_v39 }
 0x364   : > { %2656 = vmatpush3.bf16.msra.mxu0 %v2655_v46  ;;  %2704 = vmatpush3.bf16.msra.mxu1 %v2703_v47  ;;  %v1830_v46 = vld [vmem:[#allocation19] sm:$0xff]  ;;  %v1831_v47 = vld [vmem:[#allocation19 + $0x8] sm:$0xff] }
 0x365   : > { %2657 = vmatprep.subr.bf16.mxu0 %v3353_v0  ;;  %2705 = vmatprep.subr.bf16.mxu1 %v3353_v0 }
 0x368   : > { %2659 = vmatpush3.bf16.msra.mxu0 %v2658_v51  ;;  %2707 = vmatpush3.bf16.msra.mxu1 %v2706_v52  ;;  %v2715_v52 = vpack.c.bf16 %v1831_v47, %v1830_v46 }
 0x369   : > { %2660 = vmatprep.subr.bf16.mxu0 %v3353_v0  ;;  %2708 = vmatprep.subr.bf16.mxu1 %v3353_v0 }
 0x36c   : > { %2662 = vmatpush3.bf16.msra.mxu0 %v2661_v57  ;;  %2710 = vmatpush3.bf16.msra.mxu1 %v2709_v58  ;;  %v1834_v57 = vld [vmem:[#allocation19 + $0x20] sm:$0xff]  ;;  %v1835_v58 = vld [vmem:[#allocation19 + $0x28] sm:$0xff] }
 0x36d   : > { %2663 = vmatprep.subr.bf16.mxu0 %v3353_v0  ;;  %2711 = vmatprep.subr.bf16.mxu1 %v3353_v0  ;;  %v2721_v59 = vpack.c.bf16 %v1835_v58, %v1834_v57 }
 0x370   : > { %2665 = vmatpush3.bf16.msra.mxu0 %v2664_v61  ;;  %2713 = vmatpush3.bf16.msra.mxu1 %v2712_v2  ;;  %v1837_v61 = vld [vmem:[#allocation19 + $0x38] sm:$0xff]  ;;  %v1839_v2 = vld [vmem:[#allocation19 + $0x48] sm:$0xff] }
 0x371   : > { %2666 = vmatprep.subr.bf16.mxu0 %v3353_v0  ;;  %v2724_v62 = vpack.c.bf16 %v1837_v61, %v1836_v60  ;;  %v2727_v3 = vpack.c.bf16 %v1839_v2, %v1838_v63 }
 0x426   : > { %v1345_v13 = vpop.f32.mrb[0].mxu0  ;;  %v1528_v14 = vpop.f32.mrb[8].mxu1 }
 0x427   : > { %v1346_v15 = vadd.f32 %v2171_v9, %v1345_v13  ;;  %v1545_v16 = vadd.f32 %v1538_v8, %v1528_v14  ;;  %v2403_v17 = vpop.f32.mrb[1].mxu0  ;;  %v1530_v18 = vpop.f32.mrb[9].mxu1  ;;  %v2733_v8 = vpack.c.bf16 %v1843_v7, %v1842_v6  ;;  %v1844_v9 = vld [vmem:[#allocation19 + $0x70] sm:$0xff] }
 0x428   : > { %v1546_v19 = vadd.f32 %v1542_v10, %v1530_v18  ;;  %v1845_v10 = vld [vmem:[#allocation19 + $0x78] sm:$0xff] }
 0x429   : > { %1923 = vst [vmem:[%s3979_s30] sm:$0xff] %v1346_v15  ;;  %v1547_v21 = vmax.f32 %v1545_v16, 0.0  ;;  %v2736_v12 = vpack.c.bf16 %v1845_v10, %v1844_v9  ;;  %v2176_v15 = vld [vmem:[%s4112_s7] ss:$0 sm:$0xff] }
 0x42a   : > { %v1548_v25 = vmax.f32 %v1546_v19, 0.0  ;;  %v2178_v19 = vld [vmem:[#allocation21] ss:$0 sm:$0xff] }
 0x42b   : > { %2437 = vmatmul.mubr.f32.vlgmr.msra.gmra.mrb[2].mxu0 %v1547_v21 }
 0x42c   : > { %2507 = vmatmul.mubr.f32.vlgmr.msra.gmra.mrb[10].mxu1 %v1548_v25  ;;  %2668 = vmatpush3.bf16.msra.mxu0 %v2667_v20 }
 0x42d   : > { %2669 = vmatprep.subr.bf16.mxu0 %v3353_v0  ;;  %2471 = vmatprep.mubr.msk.f32.mxu0 %vm3354_vm0, %v3355_v1 }
 0x430   : > { %2671 = vmatpush3.bf16.msra.mxu0 %v2670_v26 }
 0x431   : > { %2672 = vmatprep.subr.bf16.mxu0 %v3353_v0 }
 0x434   : > { %2674 = vmatpush3.bf16.msra.mxu0 %v2673_v29 }
 0x435   : > { %2675 = vmatprep.subr.bf16.mxu0 %v3353_v0 }
 0x438   : > { %2677 = vmatpush3.bf16.msra.mxu0 %v2676_v32 }
 0x439   : > { %2678 = vmatprep.subr.bf16.mxu0 %v3353_v0 }
 0x43c   : > { %2680 = vmatpush3.bf16.msra.mxu0 %v2679_v35 }
 0x43d   : > { %2681 = vmatprep.subr.bf16.mxu0 %v3353_v0 }
 0x440   : > { %2683 = vmatpush3.bf16.msra.mxu0 %v2682_v38 }
 0x441   : > { %2684 = vmatprep.subr.bf16.mxu0 %v3353_v0 }
 0x444   : > { %2686 = vmatpush3.bf16.msra.mxu0 %v2685_v41 }
 0x445   : > { %2687 = vmatprep.subr.bf16.mxu0 %v3353_v0 }
 0x448   : > { %2689 = vmatpush3.bf16.msra.mxu0 %v2688_v44 }
 0x449   : > { %2714 = vmatprep.subr.bf16.mxu0 %v3353_v0 }
 0x4fe   : > { %v1638_v48 = vpop.f32.mrb[2].mxu0 }
 0x4ff   : > { %v1639_v22 = vadd.f32 %v2175_v45, %v1638_v48  ;;  %v2438_v49 = vpop.f32.mrb[3].mxu0  ;;  %v1825_v50 = vpop.f32.mrb[10].mxu1 }
 0x500   : > { %v2508_v51 = vpop.f32.mrb[11].mxu1  ;;  %v1826_v13 = vadd.f32 %v2177_v11, %v1825_v50 }
 0x501   : > { %v1642_v53 = vmax.f32 %v1639_v22, 0.0 }
 0x502   : > { %v1829_v14 = vmax.f32 %v1826_v13, 0.0 }
 0x503   : > { %2472 = vmatmul.mubr.f32.vlgmr.msra.gmra.mrb[4].mxu0 %v1642_v53 }
 0x504   : > { %2716 = vmatpush3.bf16.msra.mxu0 %v2715_v52  ;;  %2541 = vmatprep.mubr.msk.f32.mxu0 %vm3354_vm0, %v3355_v1  ;;  %v1840_v1 = vld [vmem:[#allocation19 + $0x50] sm:$0xff] }
 0x505   : > { %2717 = vmatprep.subr.bf16.mxu0 %v3353_v0  ;;  %v2730_v5 = vpack.c.bf16 %v1841_v4, %v1840_v1 }
 0x508   : > { %2719 = vmatpush3.bf16.msra.mxu0 %v2718_v56 }
 0x509   : > { %2720 = vmatprep.subr.bf16.mxu0 %v3353_v0 }
 0x50c   : > { %2722 = vmatpush3.bf16.msra.mxu0 %v2721_v59 }
 0x50d   : > { %2723 = vmatprep.subr.bf16.mxu0 %v3353_v0 }
 0x510   : > { %2725 = vmatpush3.bf16.msra.mxu0 %v2724_v62 }
 0x511   : > { %2726 = vmatprep.subr.bf16.mxu0 %v3353_v0 }
 0x514   : > { %2728 = vmatpush3.bf16.msra.mxu0 %v2727_v3 }
 0x515   : > { %2729 = vmatprep.subr.bf16.mxu0 %v3353_v0 }
 0x518   : > { %2731 = vmatpush3.bf16.msra.mxu0 %v2730_v5 }
 0x519   : > { %2732 = vmatprep.subr.bf16.mxu0 %v3353_v0 }
 0x51c   : > { %2734 = vmatpush3.bf16.msra.mxu0 %v2733_v8 }
 0x51d   : > { %2735 = vmatprep.subr.bf16.mxu0 %v3353_v0 }
 0x520   : > { %2737 = vmatpush3.bf16.msra.mxu0 %v2736_v12 }
 0x523   : > { %2542 = vmatmul.mubr.f32.vlgmr.msra.gmra.mrb[6].mxu0 %v1829_v14 }
 0x5d6   : > { %v1732_v16 = vpop.f32.mrb[4].mxu0 }
 0x5d7   : > { %v1733_v17 = vadd.f32 %v2176_v15, %v1732_v16  ;;  %v2473_v18 = vpop.f32.mrb[5].mxu0 }
 0x5d9   : > { %1924 = vst [vmem:[%s3979_s30 + $0x8] sm:$0xff] %v1733_v17 }
 0x5f6   : > { %v1919_v20 = vpop.f32.mrb[6].mxu0 }
 0x5f7   : > { %v1920_v21 = vadd.f32 %v2178_v19, %v1919_v20  ;;  %v2543_v23 = vpop.f32.mrb[7].mxu0 }
 0x5f9   : > { %1925 = vst [vmem:[%s3979_s30 + $0x10] sm:$0xff] %v1920_v21 }
 0x5fa PF: > { %p38_p11 = scmp.ge.s32.totalorder %s3777_s23, 4   ;;  %s4113_s3 = smov %s3326_s28 }
 0x5fb   : > { %s4114_s28 = smov %s3330_s29  ;;  %s4115_s29 = smov %s3789_s17 }
 0x5fc   : > { %s4116_s30 = smov %s3777_s23  ;;  %40 = sbr.rel (!%p38_p11) target bundleno = 24 (0x18), region = 202 }
 0x603   :  { %1947 = vsyncpa [#allocation3], 1 }
 0x604   :  { %1949 = vsyncpa [#allocation3 + $0x1], 1 }
 0x605   :  { %1950 = vsyncpa [#allocation5], 1 }
 0x606   :  { %1951 = vsyncpa [#allocation8], 1 }
 0x607   :  { %1952 = vsyncpa [#allocation11], 1 }
 0x608   :  { %1953 = vsyncpa [#allocation14], 1 }
 0x609   :  { %1954 = vsyncpa [#allocation17], 1 }
 0x60a   :  { %1955 = vsyncpa [#allocation20], 1 }

// kernel: _fused_forward_impl.1
= control target key start
LH: loop header
LB: loop body
LE: loop exit
PB: predicated region body
PF: predicated region fallthrough
CT: control target
= control target key end

     0   :  { %s4022_s0 = inlined_call_operand.vmem [shape: f32[16,32], index: 0, kind: input, shape index: {}]   ;;  %s4023_s1 = inlined_call_operand.hbm [shape: f32[16,64], index: 1, kind: input, shape index: {}]   ;;  %s4024_s2 = inlined_call_operand.vmem [shape: f32[16,4], index: 2, kind: input, shape index: {}]   ;;  %s4025_s3 = inlined_call_operand.vmem [shape: f32[32,128], index: 3, kind: input, shape index: {}]   ;;  %s4026_s4 = inlined_call_operand.hbm [shape: f32[64,128], index: 4, kind: input, shape index: {}]   ;;  %s4027_s5 = inlined_call_operand.vmem [shape: f32[4,128], index: 5, kind: input, shape index: {}]   ;;  %s4028_s6 = inlined_call_operand.vmem [shape: f32[1,128], index: 6, kind: input, shape index: {}]   ;;  %s4029_s7 = inlined_call_operand.hbm [shape: f32[128,128], index: 7, kind: input, shape index: {}]   ;;  %s4030_s8 = inlined_call_operand.hbm [shape: f32[1,128], index: 8, kind: input, shape index: {}]   ;;  %s4031_s9 = inlined_call_operand.hbm [shape: f32[128,128], index: 9, kind: input, shape index: {}]   ;;  %s4032_s10 = inlined_call_operand.hbm [shape: f32[1,128], index: 10, kind: input, shape index: {}]   ;;  %s4033_s11 = inlined_call_operand.hbm [shape: f32[128,256], index: 11, kind: input, shape index: {}]   ;;  %s4034_s12 = inlined_call_operand.vmem [shape: f32[4,256], index: 12, kind: input, shape index: {}]   ;;  %s4035_s13 = inlined_call_operand.vmem [shape: f32[1,256], index: 13, kind: input, shape index: {}]   ;;  %s4036_s14 = inlined_call_operand.hbm [shape: f32[128,128], index: 14, kind: input, shape index: {}]   ;;  %s4037_s15 = inlined_call_operand.vmem [shape: f32[1,128], index: 15, kind: input, shape index: {}]   ;;  %s4038_s16 = inlined_call_operand.hbm [shape: f32[128,128], index: 16, kind: input, shape index: {}]   ;;  %s4039_s17 = inlined_call_operand.vmem [shape: f32[1,128], index: 17, kind: input, shape index: {}]   ;;  %s4040_s18 = inlined_call_operand.hbm [shape: f32[128,128], index: 18, kind: input, shape index: {}]   ;;  %s4041_s19 = inlined_call_operand.hbm [shape: f32[1,128], index: 19, kind: input, shape index: {}]   ;;  %s4042_s20 = inlined_call_operand.hbm [shape: f32[128,128], index: 20, kind: input, shape index: {}]   ;;  %s4043_s21 = inlined_call_operand.hbm [shape: f32[1,128], index: 21, kind: input, shape index: {}]   ;;  %s4044_s22 = inlined_call_operand.vmem [shape: f32[16,384], index: 22, kind: output, shape index: {}]  }
   0x1   :  { %4057 = sst [smem:[#allocation32_spill]] %s4022_s0 }
   0x2   :  { %4058 = sst [smem:[#allocation33_spill]] %s4023_s1 }
   0x3   :  { %4059 = sst [smem:[#allocation34_spill]] %s4024_s2 }
   0x4   :  { %4060 = sst [smem:[#allocation35_spill]] %s4025_s3 }
   0x5   :  { %4061 = sst [smem:[#allocation36_spill]] %s4026_s4 }
   0x6   :  { %4062 = sst [smem:[#allocation37_spill]] %s4027_s5 }
   0x7   :  { %4063 = sst [smem:[#allocation38_spill]] %s4028_s6 }
   0x8   :  { %4064 = sst [smem:[#allocation39_spill]] %s4029_s7 }
   0x9   :  { %4065 = sst [smem:[#allocation40_spill]] %s4030_s8 }
   0xa   :  { %4066 = sst [smem:[#allocation41_spill]] %s4034_s12 }
   0xb   :  { %4067 = sst [smem:[#allocation42_spill]] %s4035_s13 }
   0xc   :  { %4068 = sst [smem:[#allocation43_spill]] %s4037_s15 }
   0xd   :  { %4069 = sst [smem:[#allocation44_spill]] %s4039_s17 }
   0xe   :  { %4070 = sst [smem:[#allocation45_spill]] %s4044_s22 }
   0xf   :  { %27 = vsyncpa [#allocation3], 0 }
  0x10   :  { %29 = vsyncpa [#allocation3 + $0x1], 0 }
  0x11   :  { %30 = vsyncpa [#allocation5], 0 }
  0x12   :  { %31 = vsyncpa [#allocation8], 0 }
  0x13   :  { %32 = vsyncpa [#allocation11], 0 }
  0x14   :  { %33 = vsyncpa [#allocation14], 0 }
  0x15   :  { %34 = vsyncpa [#allocation17], 0 }
  0x16   :  { %35 = vsyncpa [#allocation20], 0  ;;  %s3472_s3 = smov 0   ;;  %s3474_s28 = smov 0  }
  0x17   :  { %s3476_s29 = smov 0   ;;  %s3478_s30 = smov 0  }
  0x18 LB: > { %4071 = sst [smem:[#allocation29_spill]] %s3322_s3  ;;  %s3336_s4 = smov [#allocation4]   ;;  %s3334_s30 = sphi %s3478_s30, %s4116_s30   ;;  %s3330_s29 = sphi %s3476_s29, %s4115_s29   ;;  %s3326_s28 = sphi %s3474_s28, %s4114_s28   ;;  %s3322_s3 = sphi %s3472_s3, %s4113_s3  }
  0x19   : > { %s564_s0 = sshll.u32 %s3336_s4, 4  ;;  %s3493_s23 = sadd.s32 4294967295, %s3334_s30   ;;  %s3498_s0 = int_to_ptr.vmem [resolvable:$true] %s564_s0 }
  0x1a   : > { %4072 = sst [smem:[#allocation30_spill]] %s3493_s23  ;;  %p2132_p0 = scmp.ge.s32.totalorder %s3334_s30, 1 }
  0x1b   : > { %p4053_p1 = scmp.eq.s32.totalorder %s3493_s23, 0  ;;  %p549_p2 = scmp.lt.s32.totalorder %s3334_s30, 3 }
  0x1c   : > { %s3337_s5 = smov [#allocation7]   ;;  %s3338_s25 = smov [#allocation10]  }
  0x1d   : > { %p3500_p3 = pnand %p2132_p0, %p549_p2  ;;  %s597_s24 = sshll.u32 %s3337_s5, 4  ;;  %s3512_s24 = int_to_ptr.vmem [resolvable:$true] %s597_s24 }
  0x1e   : > { %s621_s26 = sshll.u32 %s3338_s25, 4  ;;  %s4076_s4 = sld [smem:[#allocation36_spill]]  ;;  %s3514_s26 = int_to_ptr.vmem [resolvable:$true] %s621_s26 }
  0x1f   : > { %s4073_s1 = scalar_select %p3500_p3, 1, 0 }
  0x20   : > { %p2791_p4 = pneg %p3500_p3 }
  0x21   : > { %4074 = sst [smem:[#allocation31_spill]] %s4073_s1 }
  0x22   : > { %p3508_p5 = pnand %p2791_p4, %p4053_p1 }
  0x24   : > { %s2910_s17 = scalar_lea.hbm %s4076_s4, 1024  ;;  %p3524_p7 = pneg %p3508_p5 }
  0x25   : > { %p2911_p6 = scmp.ne.s32.totalorder %s4076_s4, %s2910_s17  ;;  %p2917_p10 = scmp.lt.u32.totalorder %s2910_s17, %s4076_s4 }
  0x27   : > { %p2913_p8 = pnand %p3524_p7, %p2911_p6 }
  0x29   : > { %p2914_p9 = pneg %p2913_p8 }
  0x2b   : > { %p2919_p11 = pnand %p2917_p10, %p2914_p9 }
  0x2d   : > { %2922 = shalt.err (!%p2919_p11)
}
  0x2e   : > { %s2923_s15 = scalar_lea.vmem %s3498_s0, 1024  ;;  %p2931_p2 = scmp.lt.s32.totalorder %s3498_s0, %s3498_s0 }
  0x2f   : > { %p2924_p12 = scmp.ne.s32.totalorder %s3498_s0, %s2923_s15  ;;  %p2932_p4 = scmp.lt.s32.totalorder %s2923_s15, %s2923_s15 }
  0x31   : > { %p2926_p13 = pnand %p2924_p12, %p3524_p7  ;;  %p2933_p6 = por %p2932_p4, %p2931_p2 }
  0x33   : > { %p2927_p0 = pneg %p2926_p13 }
  0x35   : > { %p2934_p8 = pnand %p2933_p6, %p2927_p0 }
  0x37   : > { %2937 = shalt.err (!%p2934_p8)
}
  0x38   : > { %s4051_s22 = smov 128   ;;  %s4056_s13 = smov 8  }
  0x39   : > { %2794 = dma.hbm_to_vmem [thread:$0]  (!%p3508_p5), %s4076_s4, 1024, %s3498_s0, [#allocation5], %s4051_s22, %s4051_s22, %s4056_s13  }
  0x3a   : > { %s4078_s8 = sld [smem:[#allocation40_spill]] }
  0x40   : > { %s2938_s15 = scalar_lea.hbm %s4078_s8, 16 }
  0x41   : > { %p2939_p9 = scmp.ne.s32.totalorder %s4078_s8, %s2938_s15  ;;  %p2945_p12 = scmp.lt.u32.totalorder %s2938_s15, %s4078_s8 }
  0x43   : > { %p2941_p10 = pnand %p2939_p9, %p3524_p7 }
  0x45   : > { %p2942_p11 = pneg %p2941_p10 }
  0x47   : > { %p2947_p13 = pnand %p2945_p12, %p2942_p11 }
  0x49   : > { %2950 = shalt.err (!%p2947_p13)
}
  0x4a   : > { %s2951_s0 = scalar_lea.vmem %s3512_s24, 16  ;;  %s2958_s12 = scalar_lea.vmem %s3512_s24, 32 }
  0x4b   : > { %p2952_p0 = scmp.ne.s32.totalorder %s3512_s24, %s2951_s0  ;;  %p2959_p6 = scmp.lt.s32.totalorder %s3512_s24, %s3512_s24 }
  0x4c   : > { %p2960_p8 = scmp.lt.s32.totalorder %s2958_s12, %s2951_s0 }
  0x4d   : > { %p2954_p2 = pnand %p2952_p0, %p3524_p7 }
  0x4e   : > { %p2961_p9 = por %p2960_p8, %p2959_p6 }
  0x4f   : > { %p2955_p4 = pneg %p2954_p2 }
  0x51   : > { %p2962_p10 = pnand %p2961_p9, %p2955_p4 }
  0x53   : > { %2965 = shalt.err (!%p2962_p10)
}
  0x54   : > { %2800 = dma.hbm_to_vmem [thread:$0]  (!%p3508_p5), %s4078_s8, 16, %s3512_s24, [#allocation8]  }
  0x55   : > { %s2966_s2 = scalar_lea.hbm %s4032_s10, 16 }
  0x56   : > { %p2967_p11 = scmp.ne.s32.totalorder %s4032_s10, %s2966_s2  ;;  %p2973_p0 = scmp.lt.u32.totalorder %s2966_s2, %s4032_s10 }
  0x58   : > { %p2969_p12 = pnand %p2967_p11, %p3524_p7 }
  0x5a   : > { %p2970_p13 = pneg %p2969_p12 }
  0x5c   : > { %p2975_p2 = pnand %p2973_p0, %p2970_p13 }
  0x5e   : > { %2978 = shalt.err (!%p2975_p2)
}
  0x5f   : > { %s2979_s24 = scalar_lea.vmem %s3514_s26, 16  ;;  %s2986_s12 = scalar_lea.vmem %s3514_s26, 32 }
  0x60   : > { %p2980_p4 = scmp.ne.s32.totalorder %s3514_s26, %s2979_s24  ;;  %p2987_p9 = scmp.lt.s32.totalorder %s3514_s26, %s3514_s26 }
  0x61   : > { %p2988_p10 = scmp.lt.s32.totalorder %s2986_s12, %s2979_s24 }
  0x62   : > { %p2982_p6 = pnand %p2980_p4, %p3524_p7 }
  0x63   : > { %p2989_p11 = por %p2988_p10, %p2987_p9 }
  0x64   : > { %p2983_p8 = pneg %p2982_p6 }
  0x66   : > { %p2990_p12 = pnand %p2989_p11, %p2983_p8 }
  0x68   : > { %2993 = shalt.err (!%p2990_p12)
}
  0x69   : > { %2806 = dma.hbm_to_vmem [thread:$0]  (!%p3508_p5), %s4032_s10, 16, %s3514_s26, [#allocation11]  }
  0x6a   : > { %s3341_s1 = smov [#allocation13]   ;;  %s3342_s2 = smov [#allocation16]  }
  0x6b   : > { %s650_s17 = sshll.u32 %s3341_s1, 4  ;;  %s682_s27 = sshll.u32 %s3342_s2, 4  ;;  %s651_s17 = int_to_ptr.vmem [resolvable:$true] %s650_s17  ;;  %s683_s27 = int_to_ptr.vmem [resolvable:$true] %s682_s27 }
  0x6c   : > { %s2994_s0 = scalar_lea.hbm %s4036_s14, 2048 }
  0x6d   : > { %p2995_p13 = scmp.ne.s32.totalorder %s4036_s14, %s2994_s0  ;;  %p3001_p4 = scmp.lt.u32.totalorder %s2994_s0, %s4036_s14 }
  0x6f   : > { %p2997_p0 = pnand %p2995_p13, %p3524_p7 }
  0x71   : > { %p2998_p2 = pneg %p2997_p0 }
  0x73   : > { %p3003_p6 = pnand %p3001_p4, %p2998_p2 }
  0x75   : > { %3006 = shalt.err (!%p3003_p6)
}
  0x76   : > { %s3007_s26 = scalar_lea.vmem %s651_s17, 2048  ;;  %p3015_p11 = scmp.lt.s32.totalorder %s651_s17, %s651_s17 }
  0x77   : > { %p3008_p8 = scmp.ne.s32.totalorder %s651_s17, %s3007_s26  ;;  %p3016_p12 = scmp.lt.s32.totalorder %s3007_s26, %s3007_s26 }
  0x79   : > { %p3010_p9 = pnand %p3008_p8, %p3524_p7  ;;  %p3017_p1 = por %p3016_p12, %p3015_p11 }
  0x7b   : > { %p3011_p10 = pneg %p3010_p9 }
  0x7d   : > { %p3018_p3 = pnand %p3017_p1, %p3011_p10 }
  0x7f   : > { %3021 = shalt.err (!%p3018_p3)
}
  0x80   : > { %s4079_s23 = smov 128   ;;  %s3022_s15 = scalar_lea.hbm %s4040_s18, 2048 }
  0x81   : > { %2812 = dma.hbm_to_vmem [thread:$0]  (!%p3508_p5), %s4036_s14, 2048, %s651_s17, [#allocation14], %s4079_s23, %s4079_s23, %s4056_s13  }
  0x82   : > { %p3023_p1 = scmp.ne.s32.totalorder %s4040_s18, %s3022_s15  ;;  %p3029_p0 = scmp.lt.u32.totalorder %s3022_s15, %s4040_s18 }
  0x84   : > { %p3025_p3 = pnand %p3023_p1, %p3524_p7 }
  0x86   : > { %p3026_p13 = pneg %p3025_p3 }
  0x88   : > { %p3031_p2 = pnand %p3029_p0, %p3026_p13 }
  0x8a   : > { %3034 = shalt.err (!%p3031_p2)
}
  0x8b   : > { %s3035_s26 = scalar_lea.vmem %s683_s27, 2048  ;;  %p3043_p9 = scmp.lt.s32.totalorder %s683_s27, %s683_s27 }
  0x8c   : > { %p3036_p4 = scmp.ne.s32.totalorder %s683_s27, %s3035_s26  ;;  %p3044_p10 = scmp.lt.s32.totalorder %s3035_s26, %s3035_s26 }
  0x8e   : > { %p3038_p6 = pnand %p3036_p4, %p3524_p7  ;;  %p3045_p11 = por %p3044_p10, %p3043_p9 }
  0x90   : > { %p3039_p8 = pneg %p3038_p6 }
  0x92   : > { %p3046_p12 = pnand %p3045_p11, %p3039_p8 }
  0x94   : > { %3049 = shalt.err (!%p3046_p12)
}
  0x95   : > { %2818 = dma.hbm_to_vmem [thread:$0]  (!%p3508_p5), %s4040_s18, 2048, %s683_s27, [#allocation17], %s4079_s23, %s4079_s23, %s4056_s13  }
  0x96   : > { %s3343_s1 = smov [#allocation19]   ;;  %s3344_s25 = smov [#allocation6]  }
  0x97   : > { %s706_s2 = sshll.u32 %s3343_s1, 4  ;;  %s583_s15 = sshll.u32 %s3344_s25, 4  ;;  %s707_s2 = int_to_ptr.vmem [resolvable:$true] %s706_s2  ;;  %s584_s15 = int_to_ptr.vmem [resolvable:$true] %s583_s15 }
  0x98   : > { %s3050_s12 = scalar_lea.hbm %s4042_s20, 2048 }
  0x99   : > { %p3051_p1 = scmp.ne.s32.totalorder %s4042_s20, %s3050_s12  ;;  %p3057_p0 = scmp.lt.u32.totalorder %s3050_s12, %s4042_s20 }
  0x9b   : > { %p3053_p3 = pnand %p3051_p1, %p3524_p7 }
  0x9d   : > { %p3054_p13 = pneg %p3053_p3 }
  0x9f   : > { %p3059_p2 = pnand %p3057_p0, %p3054_p13 }
  0xa1   : > { %3062 = shalt.err (!%p3059_p2)
}
  0xa2   : > { %s3063_s27 = scalar_lea.vmem %s707_s2, 2048  ;;  %p3071_p9 = scmp.lt.s32.totalorder %s707_s2, %s707_s2 }
  0xa3   : > { %p3064_p4 = scmp.ne.s32.totalorder %s707_s2, %s3063_s27  ;;  %p3072_p10 = scmp.lt.s32.totalorder %s3063_s27, %s3063_s27 }
  0xa5   : > { %p3066_p6 = pnand %p3064_p4, %p3524_p7  ;;  %p3073_p11 = por %p3072_p10, %p3071_p9 }
  0xa7   : > { %p3067_p8 = pneg %p3066_p6 }
  0xa9   : > { %p3074_p12 = pnand %p3073_p11, %p3067_p8 }
  0xab   : > { %3077 = shalt.err (!%p3074_p12)
}
  0xac   : > { %2824 = dma.hbm_to_vmem [thread:$0]  (!%p3508_p5), %s4042_s20, 2048, %s707_s2, [#allocation20], %s4079_s23, %s4079_s23, %s4056_s13  }
  0xad   : > { %s4080_s7 = sld [smem:[#allocation39_spill]] }
  0xb3   : > { %s3078_s0 = scalar_lea.hbm %s4080_s7, 2048 }
  0xb4   : > { %p3079_p1 = scmp.ne.s32.totalorder %s4080_s7, %s3078_s0  ;;  %p3085_p0 = scmp.lt.u32.totalorder %s3078_s0, %s4080_s7 }
  0xb6   : > { %p3081_p3 = pnand %p3079_p1, %p3524_p7 }
  0xb8   : > { %p3082_p13 = pneg %p3081_p3 }
  0xba   : > { %p3087_p2 = pnand %p3085_p0, %p3082_p13 }
  0xbc   : > { %3090 = shalt.err (!%p3087_p2)
}
  0xbd   : > { %s3091_s17 = scalar_lea.vmem %s584_s15, 2048  ;;  %p3099_p9 = scmp.lt.s32.totalorder %s584_s15, %s584_s15 }
  0xbe   : > { %p3092_p4 = scmp.ne.s32.totalorder %s584_s15, %s3091_s17  ;;  %p3100_p10 = scmp.lt.s32.totalorder %s3091_s17, %s3091_s17 }
  0xc0   : > { %p3094_p6 = pnand %p3092_p4, %p3524_p7  ;;  %p3101_p11 = por %p3100_p10, %p3099_p9 }
  0xc2   : > { %p3095_p8 = pneg %p3094_p6 }
  0xc4   : > { %p3102_p12 = pnand %p3101_p11, %p3095_p8 }
  0xc6   : > { %3105 = shalt.err (!%p3102_p12)
}
  0xc7   : > { %2797 = dma.hbm_to_vmem [thread:$0]  (!%p3508_p5), %s4080_s7, 2048, %s584_s15, [#allocation5], %s4079_s23, %s4079_s23, %s4056_s13  }
  0xc8   : > { %s3345_s4 = smov [#allocation9]   ;;  %s3346_s1 = smov [#allocation12]  }
  0xc9   : > { %s607_s22 = sshll.u32 %s3345_s4, 4  ;;  %s631_s25 = sshll.u32 %s3346_s1, 4  ;;  %s608_s22 = int_to_ptr.vmem [resolvable:$true] %s607_s22  ;;  %s632_s25 = int_to_ptr.vmem [resolvable:$true] %s631_s25 }
  0xca   : > { %s3106_s12 = scalar_lea.hbm %s4031_s9, 2048 }
  0xcb   : > { %p3107_p1 = scmp.ne.s32.totalorder %s4031_s9, %s3106_s12  ;;  %p3113_p0 = scmp.lt.u32.totalorder %s3106_s12, %s4031_s9 }
  0xcd   : > { %p3109_p3 = pnand %p3107_p1, %p3524_p7 }
  0xcf   : > { %p3110_p13 = pneg %p3109_p3 }
  0xd1   : > { %p3115_p2 = pnand %p3113_p0, %p3110_p13 }
  0xd3   : > { %3118 = shalt.err (!%p3115_p2)
}
  0xd4   : > { %s3119_s15 = scalar_lea.vmem %s608_s22, 2048  ;;  %p3127_p9 = scmp.lt.s32.totalorder %s608_s22, %s608_s22 }
  0xd5   : > { %p3120_p4 = scmp.ne.s32.totalorder %s608_s22, %s3119_s15  ;;  %p3128_p10 = scmp.lt.s32.totalorder %s3119_s15, %s3119_s15 }
  0xd7   : > { %p3122_p6 = pnand %p3120_p4, %p3524_p7  ;;  %p3129_p11 = por %p3128_p10, %p3127_p9 }
  0xd9   : > { %p3123_p8 = pneg %p3122_p6 }
  0xdb   : > { %p3130_p12 = pnand %p3129_p11, %p3123_p8 }
  0xdd   : > { %3133 = shalt.err (!%p3130_p12)
}
  0xde   : > { %2803 = dma.hbm_to_vmem [thread:$0]  (!%p3508_p5), %s4031_s9, 2048, %s608_s22, [#allocation8], %s4079_s23, %s4079_s23, %s4056_s13  }
  0xdf   : > { %s3134_s24 = scalar_lea.hbm %s4033_s11, 4096 }
  0xe0   : > { %p3135_p1 = scmp.ne.s32.totalorder %s4033_s11, %s3134_s24  ;;  %p3141_p0 = scmp.lt.u32.totalorder %s3134_s24, %s4033_s11 }
  0xe2   : > { %p3137_p3 = pnand %p3135_p1, %p3524_p7 }
  0xe4   : > { %p3138_p13 = pneg %p3137_p3 }
  0xe6   : > { %p3143_p2 = pnand %p3141_p0, %p3138_p13 }
  0xe8   : > { %3146 = shalt.err (!%p3143_p2)
}
  0xe9   : > { %s3147_s2 = scalar_lea.vmem %s632_s25, 4096  ;;  %p3155_p9 = scmp.lt.s32.totalorder %s632_s25, %s632_s25 }
  0xea   : > { %p3148_p4 = scmp.ne.s32.totalorder %s632_s25, %s3147_s2  ;;  %p3156_p10 = scmp.lt.s32.totalorder %s3147_s2, %s3147_s2 }
  0xec   : > { %p3150_p6 = pnand %p3148_p4, %p3524_p7  ;;  %p3157_p11 = por %p3156_p10, %p3155_p9 }
  0xee   : > { %p3151_p8 = pneg %p3150_p6 }
  0xf0   : > { %p3158_p12 = pnand %p3157_p11, %p3151_p8 }
  0xf2   : > { %3161 = shalt.err (!%p3158_p12)
}
  0xf3   : > { %s3347_s22 = smov 256   ;;  %s3348_s15 = smov 16  }
  0xf4   : > { %2809 = dma.hbm_to_vmem [thread:$0]  (!%p3508_p5), %s4033_s11, 4096, %s632_s25, [#allocation11], %s3347_s22, %s3347_s22, %s3348_s15  }
  0xf5   : > { %s3349_s1 = smov [#allocation15]   ;;  %s3350_s24 = smov [#allocation18]  }
  0xf6   : > { %s666_s0 = sshll.u32 %s3349_s1, 4  ;;  %s696_s12 = sshll.u32 %s3350_s24, 4  ;;  %s667_s0 = int_to_ptr.vmem [resolvable:$true] %s666_s0  ;;  %s697_s12 = int_to_ptr.vmem [resolvable:$true] %s696_s12 }
  0xf7   : > { %s3162_s17 = scalar_lea.hbm %s4038_s16, 2048 }
  0xf8   : > { %p3163_p1 = scmp.ne.s32.totalorder %s4038_s16, %s3162_s17  ;;  %p3169_p0 = scmp.lt.u32.totalorder %s3162_s17, %s4038_s16 }
  0xfa   : > { %p3165_p3 = pnand %p3163_p1, %p3524_p7 }
  0xfc   : > { %p3166_p13 = pneg %p3165_p3 }
  0xfe   : > { %p3171_p2 = pnand %p3169_p0, %p3166_p13 }
 0x100   : > { %3174 = shalt.err (!%p3171_p2)
}
 0x101   : > { %s3175_s25 = scalar_lea.vmem %s667_s0, 2048  ;;  %p3183_p9 = scmp.lt.s32.totalorder %s667_s0, %s667_s0 }
 0x102   : > { %p3176_p4 = scmp.ne.s32.totalorder %s667_s0, %s3175_s25  ;;  %p3184_p10 = scmp.lt.s32.totalorder %s3175_s25, %s3175_s25 }
 0x104   : > { %p3178_p6 = pnand %p3176_p4, %p3524_p7  ;;  %p3185_p11 = por %p3184_p10, %p3183_p9 }
 0x106   : > { %p3179_p8 = pneg %p3178_p6 }
 0x108   : > { %p3186_p12 = pnand %p3185_p11, %p3179_p8 }
 0x10a   : > { %3189 = shalt.err (!%p3186_p12)
}
 0x10b   : > { %s4081_s13 = smov 8   ;;  %s3190_s27 = scalar_lea.hbm %s4041_s19, 16 }
 0x10c   : > { %2815 = dma.hbm_to_vmem [thread:$0]  (!%p3508_p5), %s4038_s16, 2048, %s667_s0, [#allocation14], %s4079_s23, %s4079_s23, %s4081_s13  }
 0x10d   : > { %p3191_p1 = scmp.ne.s32.totalorder %s4041_s19, %s3190_s27  ;;  %p3197_p0 = scmp.lt.u32.totalorder %s3190_s27, %s4041_s19 }
 0x10f   : > { %p3193_p3 = pnand %p3191_p1, %p3524_p7 }
 0x111   : > { %p3194_p13 = pneg %p3193_p3 }
 0x113   : > { %p3199_p2 = pnand %p3197_p0, %p3194_p13 }
 0x115   : > { %3202 = shalt.err (!%p3199_p2)
}
 0x116   : > { %s3203_s26 = scalar_lea.vmem %s697_s12, 16  ;;  %s3210_s23 = scalar_lea.vmem %s697_s12, 32 }
 0x117   : > { %p3204_p4 = scmp.ne.s32.totalorder %s697_s12, %s3203_s26  ;;  %p3211_p9 = scmp.lt.s32.totalorder %s697_s12, %s697_s12 }
 0x118   : > { %p3212_p10 = scmp.lt.s32.totalorder %s3210_s23, %s3203_s26 }
 0x119   : > { %p3206_p6 = pnand %p3204_p4, %p3524_p7 }
 0x11a   : > { %p3213_p11 = por %p3212_p10, %p3211_p9 }
 0x11b   : > { %p3207_p8 = pneg %p3206_p6 }
 0x11d   : > { %p3214_p12 = pnand %p3213_p11, %p3207_p8 }
 0x11f   : > { %3217 = shalt.err (!%p3214_p12)
}
 0x120   : > { %2821 = dma.hbm_to_vmem [thread:$0]  (!%p3508_p5), %s4041_s19, 16, %s697_s12, [#allocation17]  }
 0x121   : > { %s3351_s2 = smov [#allocation21]   ;;  %s3218_s8 = scalar_lea.hbm %s4043_s21, 16 }
 0x122   : > { %s720_s25 = sshll.u32 %s3351_s2, 4  ;;  %p3219_p1 = scmp.ne.s32.totalorder %s4043_s21, %s3218_s8  ;;  %s721_s25 = int_to_ptr.vmem [resolvable:$true] %s720_s25 }
 0x123   : > { %p3225_p0 = scmp.lt.u32.totalorder %s3218_s8, %s4043_s21 }
 0x124   : > { %p3221_p3 = pnand %p3219_p1, %p3524_p7 }
 0x126   : > { %p3222_p13 = pneg %p3221_p3 }
 0x128   : > { %p3227_p2 = pnand %p3225_p0, %p3222_p13 }
 0x12a   : > { %3230 = shalt.err (!%p3227_p2)
}
 0x12b   : > { %s3231_s12 = scalar_lea.vmem %s721_s25, 16  ;;  %s3238_s1 = scalar_lea.vmem %s721_s25, 32 }
 0x12c   : > { %p3232_p4 = scmp.ne.s32.totalorder %s721_s25, %s3231_s12  ;;  %p3239_p9 = scmp.lt.s32.totalorder %s721_s25, %s721_s25 }
 0x12d   : > { %p3240_p10 = scmp.lt.s32.totalorder %s3238_s1, %s3231_s12 }
 0x12e   : > { %p3234_p6 = pnand %p3232_p4, %p3524_p7 }
 0x12f   : > { %p3241_p11 = por %p3240_p10, %p3239_p9 }
 0x130   : > { %p3235_p8 = pneg %p3234_p6 }
 0x132   : > { %p3242_p12 = pnand %p3241_p11, %p3235_p8 }
 0x134   : > { %3245 = shalt.err (!%p3242_p12)
}
 0x135   : > { %s4082_s5 = sld [smem:[#allocation29_spill]]  ;;  %s4083_s26 = sld [smem:[#allocation30_spill]] }
 0x136   : > { %2827 = dma.hbm_to_vmem [thread:$0]  (!%p3508_p5), %s4043_s21, 16, %s721_s25, [#allocation20]  }
 0x137   : > { %s3777_s23 = sadd.s32 1, %s3334_s30   ;;  %s74_s6 = sadd.s32 1, %s3330_s29 }
 0x138   : > { %s71_s0 = ssub.s32 %s3334_s30, %s3777_s23  ;;  %p81_p7 = scmp.ne.s32.totalorder %s3330_s29, %s3326_s28 }
 0x139   : > { %p72_p1 = scmp.eq.s32.totalorder %s71_s0, 0  ;;  %p82_p3 = scmp.eq.s32.totalorder %s3334_s30, 0 }
 0x13a   : > { %p2844_p0 = scmp.lt.s32.totalorder %s3334_s30, 2  ;;  %s738_s13 = sand.u32 1, %s3330_s29  }
 0x13b   : > { %p87_p13 = scmp.ne.s32.totalorder %s3326_s28, %s4082_s5  ;;  %p83_p2 = por %p82_p3, %p81_p7 }
 0x13c   : > { %s3789_s17 = scalar_select %p72_p1, %s3330_s29, %s74_s6  }
 0x13d   : > { %p4084_p4 = scmp.eq.s32.totalorder %s4083_s26, 0  ;;  %s2147_s25 = sshll.u32 %s3334_s30, 7 }
 0x13e   : > { %s2146_s7 = sshll.u32 %s738_s13, 3  ;;  %s4086_s15 = sld [smem:[#allocation33_spill]] }
 0x13f   : > { %p3793_p6 = por %p4084_p4, %p87_p13  ;;  %s742_s4 = scalar_lea.vmem [#allocation2], %s2146_s7 }
 0x140   : > { %s749_s12 = sshll.u32 %s742_s4, 4  ;;  %p3804_p5 = pnand %p2844_p0, %p83_p2  ;;  %s3808_s12 = int_to_ptr.vmem [resolvable:$true] %s749_s12 }
 0x141   : > { %s739_s30 = scalar_lea.sflag [#allocation3], %s738_s13 }
 0x142   : > { %p3248_p9 = pneg %p3804_p5 }
 0x144   : > { %s3802_s27 = scalar_lea.hbm %s4086_s15, %s2147_s25  ;;  %s3251_s26 = scalar_lea.hbm %s4086_s15, 256 }
 0x145   : > { %s3246_s24 = scalar_lea.hbm %s3802_s27, 128  ;;  %p3252_p12 = scmp.lt.u32.totalorder %s3802_s27, %s4086_s15 }
 0x146   : > { %p3247_p8 = scmp.ne.s32.totalorder %s3802_s27, %s3246_s24  ;;  %p3253_p7 = scmp.lt.u32.totalorder %s3251_s26, %s3246_s24 }
 0x147   : > { %p3255_p3 = scmp.lt.u32.totalorder %s3246_s24, %s3802_s27 }
 0x148   : > { %p3249_p10 = pnand %p3248_p9, %p3247_p8  ;;  %p3254_p1 = por %p3253_p7, %p3252_p12 }
 0x14a   : > { %p3250_p11 = pneg %p3249_p10  ;;  %p3256_p13 = por %p3255_p3, %p3254_p1 }
 0x14c   : > { %p3257_p0 = pnand %p3256_p13, %p3250_p11 }
 0x14e   : > { %3260 = shalt.err (!%p3257_p0)
}
 0x14f   : > { %s3261_s13 = scalar_lea.vmem %s3808_s12, 128  ;;  %s3352_s25 = smov [#allocation2]  }
 0x150   : > { %p3262_p2 = scmp.ne.s32.totalorder %s3808_s12, %s3261_s13  ;;  %s3266_s7 = sshll.u32 %s3352_s25, 4  ;;  %s3267_s7 = int_to_ptr.vmem [resolvable:$false] %s3266_s7 }
 0x151   : > { %s3268_s8 = scalar_lea.vmem %s3267_s7, 256  ;;  %p3269_p10 = scmp.lt.s32.totalorder %s3808_s12, %s3267_s7 }
 0x152   : > { %p3264_p4 = pnand %p3262_p2, %p3248_p9  ;;  %p3270_p12 = scmp.lt.s32.totalorder %s3268_s8, %s3261_s13 }
 0x154   : > { %p3265_p8 = pneg %p3264_p4  ;;  %p3271_p7 = por %p3270_p12, %p3269_p10 }
 0x156   : > { %p3272_p1 = pnand %p3271_p7, %p3265_p8 }
 0x158   : > { %3275 = shalt.err (!%p3272_p1)
}
 0x159   : > { %2831 = dma.hbm_to_vmem [thread:$0]  (!%p3804_p5), %s3802_s27, 128, %s3808_s12, %s739_s30  }
 0x15a   : > { %s4088_s22 = sld [smem:[#allocation31_spill]] }
 0x160   : > { %p4089_p11 = scmp.ne.s32.totalorder %s4088_s22, 0 }
 0x161   : > { %s767_s4 = sand.u32 (!%p4089_p11), 1, %s3326_s28  }
 0x162   : > { %765 = sbr.rel (%p4089_p11) target bundleno = 1530 (0x5fa), region = 108  ;;  %s3838_s24 = sshll.u32 (!%p4089_p11), %s767_s4, 3 }
 0x163   : > { %s768_s3 = scalar_lea.sflag (!%p4089_p11), [#allocation3], %s767_s4  ;;  %s771_s5 = scalar_lea.vmem (!%p4089_p11), [#allocation2], %s3838_s24 }
 0x169   : > { %3293 = dma.done.wait (%p3793_p6), %s768_s3, 128  }
 0x16a   : > { %3295 = vsyncadd (%p3793_p6), %s768_s3, 4294967168  ;;  %s4090_s1 = sld [smem:[#allocation30_spill]] }
 0x170   : > { %p4091_p9 = scmp.eq.s32.totalorder %s4090_s1, 0 }
 0x172   : > { %3297 = dma.done.wait (%p4091_p9), [#allocation5], 3072   ;;  %p4092_p5 = pmov %p4091_p9 }
 0x174   : > { %3299 = vsyncadd (%p4092_p5), [#allocation5], 4294964224  ;;  %p4093_p3 = pmov %p4092_p5 }
 0x176   : > { %3301 = dma.done.wait (%p4093_p3), [#allocation8], 2064   ;;  %p4094_p13 = pmov %p4093_p3 }
 0x177   : > { %p4095_p0 = pmov %p4093_p3 }
 0x178   : > { %3303 = vsyncadd (%p4094_p13), [#allocation8], 4294965232 }
 0x179   : > { %3305 = dma.done.wait (%p4095_p0), [#allocation11], 4112   ;;  %p4096_p2 = pmov %p4095_p0 }
 0x17a   : > { %p4097_p6 = pmov %p4095_p0 }
 0x17b   : > { %3307 = vsyncadd (%p4096_p2), [#allocation11], 4294963184 }
 0x17c   : > { %3309 = dma.done.wait (%p4097_p6), [#allocation14], 4096   ;;  %p4098_p4 = pmov %p4095_p0 }
 0x17d   : > { %p4099_p8 = pmov %p4095_p0 }
 0x17e   : > { %3311 = vsyncadd (%p4098_p4), [#allocation14], 4294963200 }
 0x17f   : > { %3313 = dma.done.wait (%p4099_p8), [#allocation17], 2064   ;;  %p4100_p10 = pmov %p4095_p0 }
 0x180   : > { %p4101_p12 = pmov %p4095_p0 }
 0x181   : > { %3315 = vsyncadd (%p4100_p10), [#allocation17], 4294965232 }
 0x182   : > { %3317 = dma.done.wait (%p4101_p12), [#allocation20], 2064   ;;  %p4102_p7 = pmov %p4095_p0 }
 0x183   : > { %v3353_v0 = vmov 0.0|0.0   ;;  %vm3354_vm0 = vmmov 0   ;;  %v3355_v1 = vmov 0.0   ;;  %v917_v2 = vld [vmem:[#allocation4] sm:$0xff]  ;;  %v918_v3 = vld [vmem:[#allocation4 + $0x8] sm:$0xff]  ;;  %v919_v4 = vld [vmem:[#allocation4 + $0x10] sm:$0xff] }
 0x184   : > { %3319 = vsyncadd (%p4102_p7), [#allocation20], 4294965232  ;;  %2544 = vmatprep.subr.bf16.mxu1 %v3353_v0  ;;  %2315 = vmatprep.mubr.msk.f32.mxu1 %vm3354_vm0, %v3355_v1  ;;  %p888_p1 = scmp.lt.s32.totalorder %s4090_s1, 1  ;;  %v2545_v5 = vpack.c.bf16 %v918_v3, %v917_v2  ;;  %v920_v6 = vld [vmem:[#allocation4 + $0x18] sm:$0xff]  ;;  %v921_v8 = vld [vmem:[#allocation4 + $0x20] sm:$0xff]  ;;  %s4103_s30 = sld [smem:[#allocation32_spill]] }
 0x185   : > { %2586 = vmatprep.subr.bf16.mxu0 %v3353_v0  ;;  %2401 = vmatprep.mubr.msk.f32.mxu0 %vm3354_vm0, %v3355_v1  ;;  %v2548_v7 = vpack.c.bf16 %v920_v6, %v919_v4  ;;  %v922_v9 = vld [vmem:[#allocation4 + $0x28] sm:$0xff]  ;;  %v902_v10 = vld [vmem:[%s771_s5] sm:$0xff]  ;;  %vm3356_vm2 = vmmov 1   ;;  %s4104_s13 = sld [smem:[#allocation35_spill]]  ;;  %vm925_vm4 = vcmask 523264   ;;  %s4105_s4 = sld [smem:[#allocation34_spill]] }
 0x186   : > { %2546 = vmatpush3.bf16.msra.mxu1 %v2545_v5  ;;  %s4118_s1 = smov (!%p888_p1, %s4090_s1), 1  ;;  %v2551_v11 = vpack.c.bf16 %v922_v9, %v921_v8  ;;  %v923_v12 = vld [vmem:[#allocation4 + $0x30] sm:$0xff]  ;;  %v924_v13 = vld [vmem:[#allocation4 + $0x38] sm:$0xff]  ;;  %vm907_vm1 = vweird.f32 %v902_v10  ;;  %vm999_vm8 = vcmask 261120   ;;  %vm1078_vm9 = vcmask 1043456   ;;  %v1162_v26 = vld [vmem:[#allocation6] sm:$0xff] }
 0x187   : > { %2547 = vmatprep.subr.bf16.mxu1 %v3353_v0  ;;  %s2162_s2 = sshll.u32 %s4118_s1, 3  ;;  %v2554_v14 = vpack.c.bf16 %v924_v13, %v923_v12  ;;  %vm908_vm3 = vmxor %vm907_vm1, %vm3356_vm2  ;;  %v1163_v27 = vld [vmem:[#allocation6 + $0x8] sm:$0xff]  ;;  %vm1074_vm11 = vcmask 31744   ;;  %v1164_v30 = vld [vmem:[#allocation6 + $0x10] sm:$0xff]  ;;  %s4107_s25 = sld [smem:[#allocation41_spill]] }
 0x188   : > { %v909_v18 = vsel %vm908_vm3, %v902_v10, 0.0  ;;  %v2563_v29 = vpack.c.bf16 %v1163_v27, %v1162_v26  ;;  %v1165_v31 = vld [vmem:[#allocation6 + $0x18] sm:$0xff]  ;;  %v1166_v33 = vld [vmem:[#allocation6 + $0x20] sm:$0xff]  ;;  %v1167_v34 = vld [vmem:[#allocation6 + $0x28] sm:$0xff]  ;;  %s4108_s22 = sld [smem:[#allocation38_spill]]  ;;  %s4109_s3 = sld [smem:[#allocation42_spill]] }
 0x189   : > { %v2566_v32 = vpack.c.bf16 %v1165_v31, %v1164_v30  ;;  %v2569_v35 = vpack.c.bf16 %v1167_v34, %v1166_v33  ;;  %v1168_v36 = vld [vmem:[#allocation6 + $0x30] sm:$0xff]  ;;  %v1169_v37 = vld [vmem:[#allocation6 + $0x38] sm:$0xff]  ;;  %v1170_v39 = vld [vmem:[#allocation6 + $0x40] sm:$0xff]  ;;  %s2740_s5 = smul.u32 24, %s4118_s1  ;;  %s4111_s6 = sld [smem:[#allocation43_spill]] }
 0x18a   : > { %2549 = vmatpush3.bf16.msra.mxu1 %v2548_v7  ;;  %s891_s26 = scalar_lea.vmem %s4103_s30, %s2162_s2  ;;  %v2572_v38 = vpack.c.bf16 %v1169_v37, %v1168_v36  ;;  %v1171_v40 = vld [vmem:[#allocation6 + $0x48] sm:$0xff]  ;;  %v1172_v42 = vld [vmem:[#allocation6 + $0x50] sm:$0xff]  ;;  %v1173_v43 = vld [vmem:[#allocation6 + $0x58] sm:$0xff]  ;;  %s4112_s7 = sld [smem:[#allocation44_spill]] }
 0x18b   : > { %2550 = vmatprep.subr.bf16.mxu1 %v3353_v0  ;;  %v913_v15 = vld [vmem:[%s4104_s13] sm:$0xff]  ;;  %v914_v16 = vld [vmem:[%s4104_s13 + $0x8] sm:$0xff]  ;;  %s895_s24 = scalar_lea.vmem %s4105_s4, %s2162_s2  ;;  %v915_v20 = vld [vmem:[%s4104_s13 + $0x10] sm:$0xff]  ;;  %v2575_v41 = vpack.c.bf16 %v1171_v40, %v1170_v39  ;;  %v2578_v44 = vpack.c.bf16 %v1173_v43, %v1172_v42  ;;  %s4110_s2 = sld [smem:[#allocation45_spill]] }
 0x18c   : > { %v901_v17 = vld [vmem:[%s891_s26] sm:$0xff]  ;;  %v2557_v19 = vpack.c.bf16 %v914_v16, %v913_v15  ;;  %v916_v21 = vld [vmem:[%s4104_s13 + $0x18] sm:$0xff]  ;;  %s4106_s26 = sld [smem:[#allocation37_spill]]  ;;  %v1174_v45 = vld [vmem:[#allocation6 + $0x60] sm:$0xff] }
 0x18d   : > { %vm904_vm5 = vweird.f32 %v901_v17  ;;  %v3905_v22 = vld [vmem:[%s895_s24] sm:$0xff]  ;;  %v2560_v23 = vpack.c.bf16 %v916_v21, %v915_v20  ;;  %v1175_v46 = vld [vmem:[#allocation6 + $0x68] sm:$0xff]  ;;  %v1177_v49 = vld [vmem:[#allocation6 + $0x78] sm:$0xff] }
 0x18e   : > { %2552 = vmatpush3.bf16.msra.mxu1 %v2551_v11  ;;  %vm905_vm6 = vmxor %vm904_vm5, %vm3356_vm2  ;;  %vm910_vm7 = vweird.f32 %v3905_v22  ;;  %v2581_v47 = vpack.c.bf16 %v1175_v46, %v1174_v45  ;;  %v1176_v48 = vld [vmem:[#allocation6 + $0x70] sm:$0xff]  ;;  %v1256_v53 = vld [vmem:[#allocation9] sm:$0xff] }
 0x18f   : > { %2553 = vmatprep.subr.bf16.mxu1 %v3353_v0  ;;  %v906_v24 = vsel %vm905_vm6, %v901_v17, 0.0  ;;  %vm911_vm10 = vmxor %vm910_vm7, %vm3356_vm2  ;;  %v2584_v50 = vpack.c.bf16 %v1177_v49, %v1176_v48  ;;  %v1381_v51 = vld [vmem:[%s4107_s25] sm:$0xff]  ;;  %v1259_v57 = vld [vmem:[#allocation9 + $0x18] sm:$0xff] }
 0x190   : > { %v912_v28 = vsel %vm911_vm10, %v3905_v22, 0.0  ;;  %v1383_v52 = vcombine.high %v1381_v51, %v1381_v51  ;;  %v1257_v54 = vld [vmem:[#allocation9 + $0x8] sm:$0xff]  ;;  %v1258_v56 = vld [vmem:[#allocation9 + $0x10] sm:$0xff]  ;;  %v1260_v59 = vld [vmem:[#allocation9 + $0x20] sm:$0xff] }
 0x191   : > { %v2587_v55 = vpack.c.bf16 %v1257_v54, %v1256_v53  ;;  %v2590_v58 = vpack.c.bf16 %v1259_v57, %v1258_v56  ;;  %v1261_v60 = vld [vmem:[#allocation9 + $0x28] sm:$0xff]  ;;  %v1262_v62 = vld [vmem:[#allocation9 + $0x30] sm:$0xff]  ;;  %v1263_v63 = vld [vmem:[#allocation9 + $0x38] sm:$0xff]  ;;  %s3979_s30 = scalar_lea.vmem %s4110_s2, %s2740_s5 }
 0x192   : > { %2555 = vmatpush3.bf16.msra.mxu1 %v2554_v14  ;;  %v1073_v25 = vld [vmem:[%s4106_s26] sm:$0xf]  ;;  %v2593_v61 = vpack.c.bf16 %v1261_v60, %v1260_v59  ;;  %v2596_v2 = vpack.c.bf16 %v1263_v63, %v1262_v62  ;;  %v1264_v3 = vld [vmem:[#allocation9 + $0x40] sm:$0xff]  ;;  %v1267_v7 = vld [vmem:[#allocation9 + $0x58] sm:$0xff] }
 0x193   : > { %2556 = vmatprep.subr.bf16.mxu1 %v3353_v0  ;;  %2588 = vmatpush3.bf16.msra.mxu0 %v2587_v55  ;;  %v1265_v4 = vld [vmem:[#allocation9 + $0x48] sm:$0xff]  ;;  %v1266_v6 = vld [vmem:[#allocation9 + $0x50] sm:$0xff]  ;;  %v1268_v9 = vld [vmem:[#allocation9 + $0x60] sm:$0xff] }
 0x194   : > { %2589 = vmatprep.subr.bf16.mxu0 %v3353_v0  ;;  %v2599_v5 = vpack.c.bf16 %v1265_v4, %v1264_v3  ;;  %v2602_v8 = vpack.c.bf16 %v1267_v7, %v1266_v6  ;;  %v1269_v10 = vld [vmem:[#allocation9 + $0x68] sm:$0xff]  ;;  %v1356_v30 = vld [vmem:[#allocation12 + $0x38] sm:$0xff]  ;;  %v1355_v34 = vld [vmem:[#allocation12 + $0x30] sm:$0xff] }
 0x195   : > { %2316 = vmatmul.mubr.msk.f32.vlgmr.msra.gmra.mrb[0].mxu1 %vm925_vm4, %v909_v18  ;;  %v2605_v11 = vpack.c.bf16 %v1269_v10, %v1268_v9  ;;  %v2169_v18 = vld [vmem:[%s4108_s22] ss:$0 sm:$0xff]  ;;  %v1349_v27 = vld [vmem:[#allocation12] sm:$0xff]  ;;  %v1360_v36 = vld [vmem:[#allocation12 + $0x58] sm:$0xff] }
 0x196   : > { %2558 = vmatpush3.bf16.msra.mxu1 %v2557_v19  ;;  %2326 = vmatprep.mubr.msk.f32.mxu1 %vm3354_vm0, %v3355_v1  ;;  %v1350_v21 = vld [vmem:[#allocation12 + $0x8] sm:$0xff]  ;;  %v1353_v33 = vld [vmem:[#allocation12 + $0x20] sm:$0xff]  ;;  %v1359_v40 = vld [vmem:[#allocation12 + $0x50] sm:$0xff] }
 0x197   : > { %2559 = vmatprep.subr.bf16.mxu1 %v3353_v0  ;;  %2591 = vmatpush3.bf16.msra.mxu0 %v2590_v58  ;;  %v2616_v37 = vpack.c.bf16 %v1355_v34, %v1353_v33  ;;  %v1357_v39 = vld [vmem:[#allocation12 + $0x40] sm:$0xff]  ;;  %v1364_v42 = vld [vmem:[#allocation12 + $0x78] sm:$0xff]  ;;  %v1363_v46 = vld [vmem:[#allocation12 + $0x70] sm:$0xff] }
 0x198   : > { %2592 = vmatprep.subr.bf16.mxu0 %v3353_v0  ;;  %v2620_v43 = vpack.c.bf16 %v1359_v40, %v1357_v39  ;;  %v1361_v45 = vld [vmem:[#allocation12 + $0x60] sm:$0xff]  ;;  %v1368_v48 = vld [vmem:[#allocation12 + $0x98] sm:$0xff]  ;;  %v1371_v57 = vld [vmem:[#allocation12 + $0xb0] sm:$0xff] }
 0x199   : > { %v1372_v53 = vld [vmem:[#allocation12 + $0xb8] sm:$0xff]  ;;  %v1369_v56 = vld [vmem:[#allocation12 + $0xa0] sm:$0xff]  ;;  %v1374_v58 = vld [vmem:[#allocation12 + $0xc8] sm:$0xff] }
 0x19a   : > { %2561 = vmatpush3.bf16.msra.mxu1 %v2560_v23  ;;  %v1352_v23 = vld [vmem:[#allocation12 + $0x18] sm:$0xff]  ;;  %v2632_v60 = vpack.c.bf16 %v1371_v57, %v1369_v56  ;;  %v1373_v62 = vld [vmem:[#allocation12 + $0xc0] sm:$0xff]  ;;  %v1375_v63 = vld [vmem:[#allocation12 + $0xd0] sm:$0xff] }
 0x19b   : > { %2329 = vmatprep.subr.mxu1 %v3355_v1  ;;  %2594 = vmatpush3.bf16.msra.mxu0 %v2593_v61  ;;  %v2610_v26 = vpack.c.bf16 %v1352_v23, %v1350_v21  ;;  %v1376_v59 = vld [vmem:[#allocation12 + $0xd8] sm:$0xff]  ;;  %v1378_v3 = vld [vmem:[#allocation12 + $0xe8] sm:$0xff]  ;;  %v1379_v10 = vld [vmem:[#allocation12 + $0xf0] sm:$0xff] }
 0x19c   : > { %2595 = vmatprep.subr.bf16.mxu0 %v3353_v0  ;;  %v2634_v61 = vpack.c.bf16 %v1376_v59, %v1374_v58  ;;  %v1380_v4 = vld [vmem:[#allocation12 + $0xf8] sm:$0xff]  ;;  %v1270_v6 = vld [vmem:[#allocation9 + $0x70] sm:$0xff] }
 0x19d   : > { %2327 = vmatmul.mubr.msk.f32.vlgmr.msra.gmra.mrb[2].mxu1 %vm999_vm8, %v906_v24  ;;  %v1271_v7 = vld [vmem:[#allocation9 + $0x78] sm:$0xff]  ;;  %v1741_v33 = vld [vmem:[#allocation16 + $0x28] sm:$0xff] }
 0x19e   : > { %2330 = vmatpush3.msk.msra.mxu1 %vm1078_vm9, %v1073_v25  ;;  %2331 = vmatprep.mubr.msk.f32.mxu1 %vm3354_vm0, %v3355_v1  ;;  %v2608_v9 = vpack.c.bf16 %v1271_v7, %v1270_v6  ;;  %v1551_v23 = vld [vmem:[#allocation13 + $0x10] sm:$0xff]  ;;  %v1743_v39 = vld [vmem:[#allocation16 + $0x38] sm:$0xff]  ;;  %v1749_v56 = vld [vmem:[#allocation16 + $0x68] sm:$0xff] }
 0x19f   : > { %2562 = vmatprep.subr.bf16.mxu1 %v3353_v0  ;;  %2597 = vmatpush3.bf16.msra.mxu0 %v2596_v2  ;;  %v2636_v2 = vpack.c.bf16 %v1375_v63, %v1373_v62  ;;  %v1563_v59 = vld [vmem:[#allocation13 + $0x70] sm:$0xff]  ;;  %v1751_v63 = vld [vmem:[#allocation16 + $0x78] sm:$0xff]  ;;  %v1533_v6 = vld [vmem:[%s4109_s3] sm:$0x3] }
 0x1a0   : > { %2598 = vmatprep.subr.bf16.mxu0 %v3353_v0  ;;  %v1750_v62 = vld [vmem:[#allocation16 + $0x70] sm:$0xff] }
 0x1a1   : > { %2332 = vmatmul.mubr.msk.f32.vlgmr.msra.gmra.mrb[4].mxu1 %vm1074_vm11, %v912_v28  ;;  %v1351_v28 = vld [vmem:[#allocation12 + $0x10] sm:$0xff] }
 0x1a2   : > { %2564 = vmatpush3.bf16.msra.mxu1 %v2563_v29  ;;  %2366 = vmatprep.mubr.msk.f32.mxu1 %vm3354_vm0, %v3355_v1  ;;  %v1354_v29 = vld [vmem:[#allocation12 + $0x28] sm:$0xff]  ;;  %v2612_v31 = vpack.c.bf16 %v1351_v28, %v1349_v27  ;;  %v1739_v27 = vld [vmem:[#allocation16 + $0x18] sm:$0xff] }
 0x1a3   : > { %2565 = vmatprep.subr.bf16.mxu1 %v3353_v0  ;;  %2600 = vmatpush3.bf16.msra.mxu0 %v2599_v5  ;;  %v2638_v5 = vpack.c.bf16 %v1380_v4, %v1378_v3  ;;  %v1535_v3 = vlaneseq }
 0x1a4   : > { %2601 = vmatprep.subr.bf16.mxu0 %v3353_v0 }
 0x1a5   : > { %v1536_v4 = vshrl.u32 %v1535_v3, 7 }
 0x1a6   : > { %2567 = vmatpush3.bf16.msra.mxu1 %v2566_v32  ;;  %v2614_v32 = vpack.c.bf16 %v1356_v30, %v1354_v29  ;;  %v1553_v30 = vld [vmem:[#allocation13 + $0x20] sm:$0xff] }
 0x1a7   : > { %2568 = vmatprep.subr.bf16.mxu1 %v3353_v0  ;;  %2603 = vmatpush3.bf16.msra.mxu0 %v2602_v8  ;;  %v1377_v8 = vld [vmem:[#allocation12 + $0xe0] sm:$0xff]  ;;  %v1541_v7 = vsub.s32 1, %v1536_v4 }
 0x1a8   : > { %2604 = vmatprep.subr.bf16.mxu0 %v3353_v0 }
 0x1aa   : > { %2570 = vmatpush3.bf16.msra.mxu1 %v2569_v35  ;;  %v1358_v35 = vld [vmem:[#allocation12 + $0x48] sm:$0xff] }
 0x1ab   : > { %2571 = vmatprep.subr.bf16.mxu1 %v3353_v0  ;;  %2606 = vmatpush3.bf16.msra.mxu0 %v2605_v11  ;;  %v2640_v11 = vpack.c.bf16 %v1379_v10, %v1377_v8  ;;  %v1542_v10 = vrot.slane %v1533_v6, %v1541_v7  ;;  %v1843_v7 = vld [vmem:[#allocation19 + $0x68] sm:$0xff] }
 0x1ac   : > { %2607 = vmatprep.subr.bf16.mxu0 %v3353_v0 }
 0x1ae   : > { %2573 = vmatpush3.bf16.msra.mxu1 %v2572_v38  ;;  %v2618_v38 = vpack.c.bf16 %v1360_v36, %v1358_v35  ;;  %v1555_v36 = vld [vmem:[#allocation13 + $0x30] sm:$0xff] }
 0x1af   : > { %2574 = vmatprep.subr.bf16.mxu1 %v3353_v0  ;;  %2609 = vmatpush3.bf16.msra.mxu0 %v2608_v9  ;;  %v2171_v9 = vld [vmem:[#allocation10] ss:$0 sm:$0xff] }
 0x1b0   : > { %2642 = vmatprep.subr.bf16.mxu0 %v3353_v0 }
 0x1b2   : > { %2576 = vmatpush3.bf16.msra.mxu1 %v2575_v41  ;;  %v1362_v41 = vld [vmem:[#allocation12 + $0x68] sm:$0xff] }
 0x1b3   : > { %2577 = vmatprep.subr.bf16.mxu1 %v3353_v0 }
 0x1b6   : > { %2579 = vmatpush3.bf16.msra.mxu1 %v2578_v44  ;;  %v2622_v44 = vpack.c.bf16 %v1364_v42, %v1362_v41  ;;  %v1557_v42 = vld [vmem:[#allocation13 + $0x40] sm:$0xff] }
 0x1b7   : > { %2580 = vmatprep.subr.bf16.mxu1 %v3353_v0 }
 0x1ba   : > { %2582 = vmatpush3.bf16.msra.mxu1 %v2581_v47  ;;  %v1366_v47 = vld [vmem:[#allocation12 + $0x88] sm:$0xff] }
 0x1bb   : > { %2583 = vmatprep.subr.bf16.mxu1 %v3353_v0  ;;  %v2626_v49 = vpack.c.bf16 %v1368_v48, %v1366_v47  ;;  %v1559_v48 = vld [vmem:[#allocation13 + $0x50] sm:$0xff] }
 0x1be   : > { %2585 = vmatpush3.bf16.msra.mxu1 %v2584_v50  ;;  %v1365_v50 = vld [vmem:[#allocation12 + $0x80] sm:$0xff] }
 0x1bf   : > { %2172 = vmatprep.subr.msk.mxu1 %vm1078_vm9, %v1383_v52  ;;  %v1370_v52 = vld [vmem:[#allocation12 + $0xa8] sm:$0xff] }
 0x1c0   : > { %v2630_v55 = vpack.c.bf16 %v1372_v53, %v1370_v52  ;;  %v1561_v53 = vld [vmem:[#allocation13 + $0x60] sm:$0xff] }
 0x268   : > { %v995_v12 = vpop.f32.mrb[0].mxu1 }
 0x269   : > { %v2317_v13 = vpop.f32.mrb[1].mxu1 }
 0x26a   : > { %v1549_v13 = vld [vmem:[#allocation13] sm:$0xff] }
 0x270   : > { %v1069_v14 = vpop.f32.mrb[2].mxu1 }
 0x271   : > { %v1070_v15 = vadd.f32 %v1069_v14, %v995_v12  ;;  %v2328_v16 = vpop.f32.mrb[3].mxu1  ;;  %v2170_v12 = vld [vmem:[#allocation7] ss:$0 sm:$0xff]  ;;  %v1550_v14 = vld [vmem:[#allocation13 + $0x8] sm:$0xff] }
 0x272   : > { %v1737_v16 = vld [vmem:[#allocation16 + $0x8] sm:$0xff] }
 0x274   : > { %v1148_v17 = vpop.f32.mrb[4].mxu1 }
 0x275   : > { %v1152_v19 = vadd.f32 %v1148_v17, %v1070_v15  ;;  %v2333_v20 = vpop.f32.mrb[5].mxu1  ;;  %v1736_v15 = vld [vmem:[#allocation16] sm:$0xff] }
 0x276   : > { %v2643_v20 = vpack.c.bf16 %v1550_v14, %v1549_v13  ;;  %v2691_v21 = vpack.c.bf16 %v1737_v16, %v1736_v15 }
 0x277   : > { %v1160_v24 = vadd.f32 %v2169_v18, %v1152_v19 }
 0x279   : > { %v1161_v25 = vmax.f32 %v1160_v24, 0.0 }
 0x27b   : > { %2367 = vmatmul.mubr.f32.vlgmr.msra.gmra.mrb[6].mxu1 %v1161_v25  ;;  %v1552_v25 = vld [vmem:[#allocation13 + $0x18] sm:$0xff] }
 0x27c   : > { %2173 = vmatpush1.msk.msra.mxu1 %vm1078_vm9, %v1381_v51  ;;  %1455 = vmatprep.mubr.f32.mxu1 %v3355_v1  ;;  %v1367_v51 = vld [vmem:[#allocation12 + $0x90] sm:$0xff]  ;;  %v2646_v28 = vpack.c.bf16 %v1552_v25, %v1551_v23 }
 0x27d   : > { %2611 = vmatprep.subr.bf16.mxu1 %v2610_v26  ;;  %v2628_v54 = vpack.c.bf16 %v1367_v51, %v1365_v50  ;;  %v1738_v26 = vld [vmem:[#allocation16 + $0x10] sm:$0xff]  ;;  %v1747_v50 = vld [vmem:[#allocation16 + $0x58] sm:$0xff] }
 0x27e   : > { %v2694_v29 = vpack.c.bf16 %v1739_v27, %v1738_v26  ;;  %v1645_v23 = vld [vmem:[#allocation15 + $0x10] sm:$0xff]  ;;  %v1647_v27 = vld [vmem:[#allocation15 + $0x20] sm:$0xff] }
 0x27f   : > { %2174 = vmatmul.mubr.msk.f32.vlgmr.msra.gmra.mrb[8].mxu1 %vm1074_vm11, %v3905_v22  ;;  %v2624_v22 = vpack.c.bf16 %v1363_v46, %v1361_v45  ;;  %v1745_v45 = vld [vmem:[#allocation16 + $0x48] sm:$0xff] }
 0x280   : > { %2613 = vmatpush1.bf16.msra.mxu1 %v2612_v31  ;;  %1526 = vmatprep.mubr.f32.mxu1 %v3355_v1  ;;  %v1554_v31 = vld [vmem:[#allocation13 + $0x28] sm:$0xff] }
 0x281   : > { %2615 = vmatprep.subr.bf16.mxu1 %v2614_v32  ;;  %v1740_v32 = vld [vmem:[#allocation16 + $0x20] sm:$0xff]  ;;  %v2649_v34 = vpack.c.bf16 %v1554_v31, %v1553_v30  ;;  %v1649_v30 = vld [vmem:[#allocation15 + $0x30] sm:$0xff]  ;;  %v1650_v31 = vld [vmem:[#allocation15 + $0x38] sm:$0xff] }
 0x282   : > { %v2697_v35 = vpack.c.bf16 %v1741_v33, %v1740_v32  ;;  %v2676_v32 = vpack.c.bf16 %v1650_v31, %v1649_v30  ;;  %v1651_v33 = vld [vmem:[#allocation15 + $0x40] sm:$0xff] }
 0x284   : > { %2617 = vmatpush1.bf16.msra.mxu1 %v2616_v37  ;;  %v1556_v37 = vld [vmem:[#allocation13 + $0x38] sm:$0xff] }
 0x285   : > { %2619 = vmatprep.subr.bf16.mxu1 %v2618_v38  ;;  %v1742_v38 = vld [vmem:[#allocation16 + $0x30] sm:$0xff]  ;;  %v2652_v40 = vpack.c.bf16 %v1556_v37, %v1555_v36  ;;  %v1654_v37 = vld [vmem:[#allocation15 + $0x58] sm:$0xff] }
 0x286   : > { %v2700_v41 = vpack.c.bf16 %v1743_v39, %v1742_v38  ;;  %v1653_v36 = vld [vmem:[#allocation15 + $0x50] sm:$0xff]  ;;  %v1655_v39 = vld [vmem:[#allocation15 + $0x60] sm:$0xff] }
 0x287   : > { %v2682_v38 = vpack.c.bf16 %v1654_v37, %v1653_v36 }
 0x288   : > { %2621 = vmatpush1.bf16.msra.mxu1 %v2620_v43  ;;  %v1558_v43 = vld [vmem:[#allocation13 + $0x48] sm:$0xff] }
 0x289   : > { %2623 = vmatprep.subr.bf16.mxu1 %v2622_v44  ;;  %v1744_v44 = vld [vmem:[#allocation16 + $0x40] sm:$0xff]  ;;  %v2655_v46 = vpack.c.bf16 %v1558_v43, %v1557_v42  ;;  %v1657_v42 = vld [vmem:[#allocation15 + $0x70] sm:$0xff]  ;;  %v1658_v43 = vld [vmem:[#allocation15 + $0x78] sm:$0xff] }
 0x28a   : > { %v2703_v47 = vpack.c.bf16 %v1745_v45, %v1744_v44  ;;  %v2688_v44 = vpack.c.bf16 %v1658_v43, %v1657_v42  ;;  %v2175_v45 = vld [vmem:[%s4111_s6] ss:$0 sm:$0xff] }
 0x28c   : > { %2625 = vmatpush1.bf16.msra.mxu1 %v2624_v22  ;;  %v1560_v22 = vld [vmem:[#allocation13 + $0x58] sm:$0xff] }
 0x28d   : > { %2627 = vmatprep.subr.bf16.mxu1 %v2626_v49  ;;  %v1746_v49 = vld [vmem:[#allocation16 + $0x50] sm:$0xff]  ;;  %v2658_v51 = vpack.c.bf16 %v1560_v22, %v1559_v48 }
 0x28e   : > { %v2706_v52 = vpack.c.bf16 %v1747_v50, %v1746_v49 }
 0x290   : > { %2629 = vmatpush1.bf16.msra.mxu1 %v2628_v54  ;;  %v1562_v54 = vld [vmem:[#allocation13 + $0x68] sm:$0xff] }
 0x291   : > { %2631 = vmatprep.subr.bf16.mxu1 %v2630_v55  ;;  %v1748_v55 = vld [vmem:[#allocation16 + $0x60] sm:$0xff]  ;;  %v2661_v57 = vpack.c.bf16 %v1562_v54, %v1561_v53  ;;  %v1832_v54 = vld [vmem:[#allocation19 + $0x10] sm:$0xff] }
 0x292   : > { %v2709_v58 = vpack.c.bf16 %v1749_v56, %v1748_v55  ;;  %v1833_v55 = vld [vmem:[#allocation19 + $0x18] sm:$0xff] }
 0x293   : > { %v2718_v56 = vpack.c.bf16 %v1833_v55, %v1832_v54 }
 0x294   : > { %2633 = vmatpush1.bf16.msra.mxu1 %v2632_v60  ;;  %v1564_v60 = vld [vmem:[#allocation13 + $0x78] sm:$0xff] }
 0x295   : > { %2635 = vmatprep.subr.bf16.mxu1 %v2634_v61  ;;  %v2664_v61 = vpack.c.bf16 %v1564_v60, %v1563_v59  ;;  %v1836_v60 = vld [vmem:[#allocation19 + $0x30] sm:$0xff] }
 0x298   : > { %2637 = vmatpush1.bf16.msra.mxu1 %v2636_v2  ;;  %v2712_v2 = vpack.c.bf16 %v1751_v63, %v1750_v62  ;;  %v1838_v63 = vld [vmem:[#allocation19 + $0x40] sm:$0xff] }
 0x299   : > { %2639 = vmatprep.subr.bf16.mxu1 %v2638_v5  ;;  %v1537_v5 = vsub.s32 0, %v1536_v4  ;;  %v1841_v4 = vld [vmem:[#allocation19 + $0x58] sm:$0xff] }
 0x29b   : > { %v1538_v8 = vrot.slane %v1533_v6, %v1537_v5  ;;  %v1842_v6 = vld [vmem:[#allocation19 + $0x60] sm:$0xff] }
 0x29c   : > { %2641 = vmatpush1.bf16.msra.mxu1 %v2640_v11  ;;  %v1643_v11 = vld [vmem:[#allocation15] sm:$0xff] }
 0x29d   : > { %2690 = vmatprep.subr.bf16.mxu1 %v3353_v0 }
 0x34e   : > { %v1251_v17 = vpop.f32.mrb[6].mxu1 }
 0x34f   : > { %v1252_v18 = vadd.f32 %v2170_v12, %v1251_v17  ;;  %v2368_v19 = vpop.f32.mrb[7].mxu1  ;;  %v1644_v12 = vld [vmem:[#allocation15 + $0x8] sm:$0xff] }
 0x351   : > { %v1255_v24 = vmax.f32 %v1252_v18, 0.0 }
 0x353   : > { %2402 = vmatmul.mubr.f32.vlgmr.msra.gmra.mrb[0].mxu0 %v1255_v24  ;;  %1527 = vmatmul.mubr.f32.vlgmr.msra.gmra.mrb[8].mxu1 %v1255_v24  ;;  %v1646_v24 = vld [vmem:[#allocation15 + $0x18] sm:$0xff] }
 0x354   : > { %2644 = vmatpush3.bf16.msra.mxu0 %v2643_v20  ;;  %2692 = vmatpush3.bf16.msra.mxu1 %v2691_v21  ;;  %v2667_v20 = vpack.c.bf16 %v1644_v12, %v1643_v11  ;;  %v2670_v26 = vpack.c.bf16 %v1646_v24, %v1645_v23  ;;  %v2177_v11 = vld [vmem:[#allocation18] ss:$0 sm:$0xff] }
 0x355   : > { %2645 = vmatprep.subr.bf16.mxu0 %v3353_v0  ;;  %2693 = vmatprep.subr.bf16.mxu1 %v3353_v0 }
 0x356   : > { %2436 = vmatprep.mubr.msk.f32.mxu0 %vm3354_vm0, %v3355_v1  ;;  %2506 = vmatprep.mubr.msk.f32.mxu1 %vm3354_vm0, %v3355_v1 }
 0x358   : > { %2647 = vmatpush3.bf16.msra.mxu0 %v2646_v28  ;;  %2695 = vmatpush3.bf16.msra.mxu1 %v2694_v29  ;;  %v1648_v28 = vld [vmem:[#allocation15 + $0x28] sm:$0xff] }
 0x359   : > { %2648 = vmatprep.subr.bf16.mxu0 %v3353_v0  ;;  %2696 = vmatprep.subr.bf16.mxu1 %v3353_v0  ;;  %v2673_v29 = vpack.c.bf16 %v1648_v28, %v1647_v27 }
 0x35c   : > { %2650 = vmatpush3.bf16.msra.mxu0 %v2649_v34  ;;  %2698 = vmatpush3.bf16.msra.mxu1 %v2697_v35  ;;  %v1652_v34 = vld [vmem:[#allocation15 + $0x48] sm:$0xff] }
 0x35d   : > { %2651 = vmatprep.subr.bf16.mxu0 %v3353_v0  ;;  %2699 = vmatprep.subr.bf16.mxu1 %v3353_v0  ;;  %v2679_v35 = vpack.c.bf16 %v1652_v34, %v1651_v33 }
 0x360   : > { %2653 = vmatpush3.bf16.msra.mxu0 %v2652_v40  ;;  %2701 = vmatpush3.bf16.msra.mxu1 %v2700_v41  ;;  %v1656_v40 = vld [vmem:[#allocation15 + $0x68] sm:$0xff] }
 0x361   : > { %2654 = vmatprep.subr.bf16.mxu0 %v3353_v0  ;;  %2702 = vmatprep.subr.bf16.mxu1 %v3353_v0  ;;  %v2685_v41 = vpack.c.bf16 %v1656_v40, %v1655_v39 }
 0x364   : > { %2656 = vmatpush3.bf16.msra.mxu0 %v2655_v46  ;;  %2704 = vmatpush3.bf16.msra.mxu1 %v2703_v47  ;;  %v1830_v46 = vld [vmem:[#allocation19] sm:$0xff]  ;;  %v1831_v47 = vld [vmem:[#allocation19 + $0x8] sm:$0xff] }
 0x365   : > { %2657 = vmatprep.subr.bf16.mxu0 %v3353_v0  ;;  %2705 = vmatprep.subr.bf16.mxu1 %v3353_v0 }
 0x368   : > { %2659 = vmatpush3.bf16.msra.mxu0 %v2658_v51  ;;  %2707 = vmatpush3.bf16.msra.mxu1 %v2706_v52  ;;  %v2715_v52 = vpack.c.bf16 %v1831_v47, %v1830_v46 }
 0x369   : > { %2660 = vmatprep.subr.bf16.mxu0 %v3353_v0  ;;  %2708 = vmatprep.subr.bf16.mxu1 %v3353_v0 }
 0x36c   : > { %2662 = vmatpush3.bf16.msra.mxu0 %v2661_v57  ;;  %2710 = vmatpush3.bf16.msra.mxu1 %v2709_v58  ;;  %v1834_v57 = vld [vmem:[#allocation19 + $0x20] sm:$0xff]  ;;  %v1835_v58 = vld [vmem:[#allocation19 + $0x28] sm:$0xff] }
 0x36d   : > { %2663 = vmatprep.subr.bf16.mxu0 %v3353_v0  ;;  %2711 = vmatprep.subr.bf16.mxu1 %v3353_v0  ;;  %v2721_v59 = vpack.c.bf16 %v1835_v58, %v1834_v57 }
 0x370   : > { %2665 = vmatpush3.bf16.msra.mxu0 %v2664_v61  ;;  %2713 = vmatpush3.bf16.msra.mxu1 %v2712_v2  ;;  %v1837_v61 = vld [vmem:[#allocation19 + $0x38] sm:$0xff]  ;;  %v1839_v2 = vld [vmem:[#allocation19 + $0x48] sm:$0xff] }
 0x371   : > { %2666 = vmatprep.subr.bf16.mxu0 %v3353_v0  ;;  %v2724_v62 = vpack.c.bf16 %v1837_v61, %v1836_v60  ;;  %v2727_v3 = vpack.c.bf16 %v1839_v2, %v1838_v63 }
 0x426   : > { %v1345_v13 = vpop.f32.mrb[0].mxu0  ;;  %v1528_v14 = vpop.f32.mrb[8].mxu1 }
 0x427   : > { %v1346_v15 = vadd.f32 %v2171_v9, %v1345_v13  ;;  %v1545_v16 = vadd.f32 %v1538_v8, %v1528_v14  ;;  %v2403_v17 = vpop.f32.mrb[1].mxu0  ;;  %v1530_v18 = vpop.f32.mrb[9].mxu1  ;;  %v2733_v8 = vpack.c.bf16 %v1843_v7, %v1842_v6  ;;  %v1844_v9 = vld [vmem:[#allocation19 + $0x70] sm:$0xff] }
 0x428   : > { %v1546_v19 = vadd.f32 %v1542_v10, %v1530_v18  ;;  %v1845_v10 = vld [vmem:[#allocation19 + $0x78] sm:$0xff] }
 0x429   : > { %1923 = vst [vmem:[%s3979_s30] sm:$0xff] %v1346_v15  ;;  %v1547_v21 = vmax.f32 %v1545_v16, 0.0  ;;  %v2736_v12 = vpack.c.bf16 %v1845_v10, %v1844_v9  ;;  %v2176_v15 = vld [vmem:[%s4112_s7] ss:$0 sm:$0xff] }
 0x42a   : > { %v1548_v25 = vmax.f32 %v1546_v19, 0.0  ;;  %v2178_v19 = vld [vmem:[#allocation21] ss:$0 sm:$0xff] }
 0x42b   : > { %2437 = vmatmul.mubr.f32.vlgmr.msra.gmra.mrb[2].mxu0 %v1547_v21 }
 0x42c   : > { %2507 = vmatmul.mubr.f32.vlgmr.msra.gmra.mrb[10].mxu1 %v1548_v25  ;;  %2668 = vmatpush3.bf16.msra.mxu0 %v2667_v20 }
 0x42d   : > { %2669 = vmatprep.subr.bf16.mxu0 %v3353_v0  ;;  %2471 = vmatprep.mubr.msk.f32.mxu0 %vm3354_vm0, %v3355_v1 }
 0x430   : > { %2671 = vmatpush3.bf16.msra.mxu0 %v2670_v26 }
 0x431   : > { %2672 = vmatprep.subr.bf16.mxu0 %v3353_v0 }
 0x434   : > { %2674 = vmatpush3.bf16.msra.mxu0 %v2673_v29 }
 0x435   : > { %2675 = vmatprep.subr.bf16.mxu0 %v3353_v0 }
 0x438   : > { %2677 = vmatpush3.bf16.msra.mxu0 %v2676_v32 }
 0x439   : > { %2678 = vmatprep.subr.bf16.mxu0 %v3353_v0 }
 0x43c   : > { %2680 = vmatpush3.bf16.msra.mxu0 %v2679_v35 }
 0x43d   : > { %2681 = vmatprep.subr.bf16.mxu0 %v3353_v0 }
 0x440   : > { %2683 = vmatpush3.bf16.msra.mxu0 %v2682_v38 }
 0x441   : > { %2684 = vmatprep.subr.bf16.mxu0 %v3353_v0 }
 0x444   : > { %2686 = vmatpush3.bf16.msra.mxu0 %v2685_v41 }
 0x445   : > { %2687 = vmatprep.subr.bf16.mxu0 %v3353_v0 }
 0x448   : > { %2689 = vmatpush3.bf16.msra.mxu0 %v2688_v44 }
 0x449   : > { %2714 = vmatprep.subr.bf16.mxu0 %v3353_v0 }
 0x4fe   : > { %v1638_v48 = vpop.f32.mrb[2].mxu0 }
 0x4ff   : > { %v1639_v22 = vadd.f32 %v2175_v45, %v1638_v48  ;;  %v2438_v49 = vpop.f32.mrb[3].mxu0  ;;  %v1825_v50 = vpop.f32.mrb[10].mxu1 }
 0x500   : > { %v2508_v51 = vpop.f32.mrb[11].mxu1  ;;  %v1826_v13 = vadd.f32 %v2177_v11, %v1825_v50 }
 0x501   : > { %v1642_v53 = vmax.f32 %v1639_v22, 0.0 }
 0x502   : > { %v1829_v14 = vmax.f32 %v1826_v13, 0.0 }
 0x503   : > { %2472 = vmatmul.mubr.f32.vlgmr.msra.gmra.mrb[4].mxu0 %v1642_v53 }
 0x504   : > { %2716 = vmatpush3.bf16.msra.mxu0 %v2715_v52  ;;  %2541 = vmatprep.mubr.msk.f32.mxu0 %vm3354_vm0, %v3355_v1  ;;  %v1840_v1 = vld [vmem:[#allocation19 + $0x50] sm:$0xff] }
 0x505   : > { %2717 = vmatprep.subr.bf16.mxu0 %v3353_v0  ;;  %v2730_v5 = vpack.c.bf16 %v1841_v4, %v1840_v1 }
 0x508   : > { %2719 = vmatpush3.bf16.msra.mxu0 %v2718_v56 }
 0x509   : > { %2720 = vmatprep.subr.bf16.mxu0 %v3353_v0 }
 0x50c   : > { %2722 = vmatpush3.bf16.msra.mxu0 %v2721_v59 }
 0x50d   : > { %2723 = vmatprep.subr.bf16.mxu0 %v3353_v0 }
 0x510   : > { %2725 = vmatpush3.bf16.msra.mxu0 %v2724_v62 }
 0x511   : > { %2726 = vmatprep.subr.bf16.mxu0 %v3353_v0 }
 0x514   : > { %2728 = vmatpush3.bf16.msra.mxu0 %v2727_v3 }
 0x515   : > { %2729 = vmatprep.subr.bf16.mxu0 %v3353_v0 }
 0x518   : > { %2731 = vmatpush3.bf16.msra.mxu0 %v2730_v5 }
 0x519   : > { %2732 = vmatprep.subr.bf16.mxu0 %v3353_v0 }
 0x51c   : > { %2734 = vmatpush3.bf16.msra.mxu0 %v2733_v8 }
 0x51d   : > { %2735 = vmatprep.subr.bf16.mxu0 %v3353_v0 }
 0x520   : > { %2737 = vmatpush3.bf16.msra.mxu0 %v2736_v12 }
 0x523   : > { %2542 = vmatmul.mubr.f32.vlgmr.msra.gmra.mrb[6].mxu0 %v1829_v14 }
 0x5d6   : > { %v1732_v16 = vpop.f32.mrb[4].mxu0 }
 0x5d7   : > { %v1733_v17 = vadd.f32 %v2176_v15, %v1732_v16  ;;  %v2473_v18 = vpop.f32.mrb[5].mxu0 }
 0x5d9   : > { %1924 = vst [vmem:[%s3979_s30 + $0x8] sm:$0xff] %v1733_v17 }
 0x5f6   : > { %v1919_v20 = vpop.f32.mrb[6].mxu0 }
 0x5f7   : > { %v1920_v21 = vadd.f32 %v2178_v19, %v1919_v20  ;;  %v2543_v23 = vpop.f32.mrb[7].mxu0 }
 0x5f9   : > { %1925 = vst [vmem:[%s3979_s30 + $0x10] sm:$0xff] %v1920_v21 }
 0x5fa PF: > { %p38_p11 = scmp.ge.s32.totalorder %s3777_s23, 4   ;;  %s4113_s3 = smov %s3326_s28 }
 0x5fb   : > { %s4114_s28 = smov %s3330_s29  ;;  %s4115_s29 = smov %s3789_s17 }
 0x5fc   : > { %s4116_s30 = smov %s3777_s23  ;;  %40 = sbr.rel (!%p38_p11) target bundleno = 24 (0x18), region = 202 }
 0x603   :  { %1947 = vsyncpa [#allocation3], 1 }
 0x604   :  { %1949 = vsyncpa [#allocation3 + $0x1], 1 }
 0x605   :  { %1950 = vsyncpa [#allocation5], 1 }
 0x606   :  { %1951 = vsyncpa [#allocation8], 1 }
 0x607   :  { %1952 = vsyncpa [#allocation11], 1 }
 0x608   :  { %1953 = vsyncpa [#allocation14], 1 }
 0x609   :  { %1954 = vsyncpa [#allocation17], 1 }
 0x60a   :  { %1955 = vsyncpa [#allocation20], 1 }

</bundles_post_ra>
